<compile_context>
chip_gen: v5e
topology: v5e:2x2
jax: 0.10.0
libtpu: 0.0.40
codegen_flags: <defaults>
</compile_context>

<pallas_src>
import math
from functools import partial

import jax
import jax.numpy as jnp
from jax.experimental import pallas as pl
from jax.experimental.pallas import tpu as pltpu

_VMEM_LIMIT = 48 * 1024 * 1024  # above 16/32 MiB scoped defaults, < 64 MiB v7x physical


# ----------------- feature probe: single-buffered constant blocks ------------

def _probe_buffered_support():
    """Check that pl.BlockSpec(pipeline_mode=pl.Buffered(1)) lowers & runs."""
    try:
        def _k(x_ref, o_ref):
            o_ref[...] = x_ref[...] + 1.0

        f = pl.pallas_call(
            _k,
            out_shape=jax.ShapeDtypeStruct((16, 128), jnp.float32),
            grid=(2,),
            in_specs=[pl.BlockSpec((8, 128), lambda i: (0, 0),
                                   pipeline_mode=pl.Buffered(1))],
            out_specs=pl.BlockSpec((8, 128), lambda i: (i, 0)),
        )
        out = jax.block_until_ready(jax.jit(f)(jnp.zeros((8, 128), jnp.float32)))
        return bool(jnp.all(out == 1.0))
    except Exception:
        return False


_BUFFERED_OK = _probe_buffered_support()


def _const_spec(shape):
    """BlockSpec for a block whose index_map never changes (weights / biases).

    Single-buffer it when supported: default double-buffering of constant
    blocks only doubles their VMEM footprint (critical at H ~ 1024 on v7x).
    """
    index_map = lambda bt, s: tuple(0 for _ in shape)
    if _BUFFERED_OK:
        return pl.BlockSpec(shape, index_map, pipeline_mode=pl.Buffered(1))
    return pl.BlockSpec(shape, index_map)


# ----------------------------- LSTM chunk recurrence --------------------------

def _lstm_chunk(x_ref, wih_ref, whh_ref, b_ref, h_sc, c_sc, emit):
    """Run `chunk` timesteps of the LSTM recurrence; emit(t, h_f32) per step."""
    @pl.when(pl.program_id(1) == 0)            # new batch tile -> reset state
    def _():
        h_sc[...] = jnp.zeros_like(h_sc)
        c_sc[...] = jnp.zeros_like(c_sc)

    T, B, D = x_ref.shape
    H = h_sc.shape[-1]

    # Hoisted, time-independent input projection for the whole chunk:
    # one bf16 (T*B, D) x (D, 4H) MXU matmul, f32 accumulate, fused bias,
    # then bounded to bf16 so the intermediate stays small in VMEM.
    xg = (jnp.dot(x_ref[...].reshape(T * B, D), wih_ref[...],
                  preferred_element_type=jnp.float32)
          + b_ref[...]).astype(jnp.bfloat16)                       # (T*B, 4H)

    whh = whh_ref[...]                                             # bf16 (H, 4H)
    h = h_sc[...]                                                  # f32 (B, H)
    c = c_sc[...]
    for t in range(T):                         # short static unroll over the chunk
        gates = (xg[t * B:(t + 1) * B, :].astype(jnp.float32)
                 + jnp.dot(h.astype(jnp.bfloat16), whh,
                           preferred_element_type=jnp.float32))    # f32 (B, 4H)
        # gate layout (i, f, o, g): one contiguous sigmoid slab + one tanh slab
        sg = jax.nn.sigmoid(gates[:, :3 * H])
        g_g = jnp.tanh(gates[:, 3 * H:])
        c = sg[:, H:2 * H] * c + sg[:, :H] * g_g
        h = sg[:, 2 * H:] * jnp.tanh(c)
        emit(t, h)                             # per-step store (no stacking)

    h_sc[...] = h
    c_sc[...] = c


def _lstm_layer_kernel(x_ref, wih_ref, whh_ref, b_ref, out_ref, h_sc, c_sc):
    def emit(t, h):
        out_ref[t] = h.astype(out_ref.dtype)
    _lstm_chunk(x_ref, wih_ref, whh_ref, b_ref, h_sc, c_sc, emit)


def _lstm_last_fused_kernel(x_ref, wih_ref, whh_ref, b_ref, wout_ref, bout_ref,
                            out_ref, h_sc, c_sc):
    wout = wout_ref[...]                        # bf16 (H, Opad) loaded once
    bout = bout_ref[...]                        # f32  (1, Opad)

    def emit(t, h):                             # fused final Linear, lane-dense Opad
        y = jnp.dot(h.astype(jnp.bfloat16), wout,
                    preferred_element_type=jnp.float32) + bout
        out_ref[t] = y.astype(out_ref.dtype)

    _lstm_chunk(x_ref, wih_ref, whh_ref, b_ref, h_sc, c_sc, emit)


# ------------------------------ pallas_call wrappers --------------------------

def _compiler_params():
    return pltpu.CompilerParams(
        dimension_semantics=("parallel", "arbitrary"),   # batch tiles || time seq
        vmem_limit_bytes=_VMEM_LIMIT)


def lstm_layer(x_tmajor, w_ih, w_hh, b, *, chunk, batch_tile):
    """x_tmajor: (K, B, D) bf16 time-major -> (K, B, H) bf16."""
    K, B, D = x_tmajor.shape
    H = w_hh.shape[0]
    assert K % chunk == 0 and B % batch_tile == 0 and batch_tile % 8 == 0
    return pl.pallas_call(
        _lstm_layer_kernel,
        out_shape=jax.ShapeDtypeStruct((K, B, H), jnp.bfloat16),
        grid_spec=pltpu.PrefetchScalarGridSpec(
            num_scalar_prefetch=0,
            grid=(B // batch_tile, K // chunk),
            in_specs=[
                pl.BlockSpec((chunk, batch_tile, D), lambda bt, s: (s, bt, 0)),
                _const_spec((D, 4 * H)),
                _const_spec((H, 4 * H)),
                _const_spec((1, 4 * H)),
            ],
            out_specs=pl.BlockSpec((chunk, batch_tile, H), lambda bt, s: (s, bt, 0)),
            scratch_shapes=[
                pltpu.VMEM((batch_tile, H), jnp.float32),   # h state (f32)
                pltpu.VMEM((batch_tile, H), jnp.float32),   # c state (f32)
            ],
        ),
        compiler_params=_compiler_params(),
    )(x_tmajor, w_ih, w_hh, b)


def lstm_last_layer_fused(x_tmajor, w_ih, w_hh, b, w_out, b_out, *, chunk, batch_tile):
    """Last LSTM layer with the output Linear fused in. Returns (K, B, Opad) f32."""
    K, B, D = x_tmajor.shape
    H = w_hh.shape[0]
    Opad = w_out.shape[1]
    assert K % chunk == 0 and B % batch_tile == 0 and Opad % 128 == 0
    return pl.pallas_call(
        _lstm_last_fused_kernel,
        out_shape=jax.ShapeDtypeStruct((K, B, Opad), jnp.float32),
        grid_spec=pltpu.PrefetchScalarGridSpec(
            num_scalar_prefetch=0,
            grid=(B // batch_tile, K // chunk),
            in_specs=[
                pl.BlockSpec((chunk, batch_tile, D), lambda bt, s: (s, bt, 0)),
                _const_spec((D, 4 * H)),
                _const_spec((H, 4 * H)),
                _const_spec((1, 4 * H)),
                _const_spec((H, Opad)),
                _const_spec((1, Opad)),
            ],
            out_specs=pl.BlockSpec((chunk, batch_tile, Opad),
                                   lambda bt, s: (s, bt, 0)),
            scratch_shapes=[
                pltpu.VMEM((batch_tile, H), jnp.float32),
                pltpu.VMEM((batch_tile, H), jnp.float32),
            ],
        ),
        compiler_params=_compiler_params(),
    )(x_tmajor, w_ih, w_hh, b, w_out, b_out)


# ------------------------------- Full model ----------------------------------

def _batch_tiling(m):
    """Pad batch to a multiple of 16 (bf16 sublane packing) and split into
    <=128-row tiles so the 'parallel' batch axis can shard across TensorCores."""
    b16 = ((m + 15) // 16) * 16
    n_tiles = max(1, (b16 + 127) // 128)
    bt = (((b16 + n_tiles - 1) // n_tiles) + 15) // 16 * 16
    return bt, bt * n_tiles


@partial(jax.jit, static_argnames=("out_dim", "chunk"))
def lstm_model(x, params, *, out_dim, chunk=16):
    """x: (m, K, input_dim) batch-first f32 -> (m, K, out_dim) batch-first f32.

    chunk: timesteps per grid step (amortizes ~0.35us/step overhead).
    Re-derive smaller (e.g. 8) on v7x at H >= 1024 to fit the 64 MiB VMEM.
    """
    m, K, _ = x.shape
    batch_tile, B = _batch_tiling(m)
    T = min(chunk, K)
    Kp = pl.cdiv(K, T) * T

    h = jnp.transpose(x, (1, 0, 2)).astype(jnp.bfloat16)    # time-major bf16
    h = jnp.pad(h, ((0, Kp - K), (0, B - m), (0, 0)))

    layers = params["layers"]
    for (w_ih, w_hh, b) in layers[:-1]:
        h = lstm_layer(h, w_ih, w_hh, b, chunk=T, batch_tile=batch_tile)
    # TODO(synk): inter-layer dropout omitted (dropout=0; train-time only in PyTorch).

    w_ih, w_hh, b = layers[-1]
    y = lstm_last_layer_fused(h, w_ih, w_hh, b, params["w_out"], params["b_out"],
                              chunk=T, batch_tile=batch_tile)
    y = y[:K, :m, :out_dim]                                  # drop seq/batch/O padding
    return jnp.transpose(y, (1, 0, 2))                       # back to batch-first


# ----------------------------- Param init (PyTorch-like) ---------------------

def _reorder_ifgo_to_ifog(w):
    """Rows of w are (4H, ...) in PyTorch (i, f, g, o) order -> (i, f, o, g)."""
    H = w.shape[0] // 4
    i, f, g, o = (w[k * H:(k + 1) * H] for k in range(4))
    return jnp.concatenate([i, f, o, g], axis=0)


def init_params(key, input_dim, hidden_dim, output_dim, num_layers):
    layers = []
    k_lstm = 1.0 / math.sqrt(hidden_dim)
    for layer in range(num_layers):
        d_in = input_dim if layer == 0 else hidden_dim
        key, k1, k2, k3, k4 = jax.random.split(key, 5)
        # PyTorch stores (4H, D)/(4H, H) with gates in (i,f,g,o) row order.
        w_ih = jax.random.uniform(k1, (4 * hidden_dim, d_in), jnp.float32,
                                  -k_lstm, k_lstm)
        w_hh = jax.random.uniform(k2, (4 * hidden_dim, hidden_dim), jnp.float32,
                                  -k_lstm, k_lstm)
        b_ih = jax.random.uniform(k3, (4 * hidden_dim,), jnp.float32, -k_lstm, k_lstm)
        b_hh = jax.random.uniform(k4, (4 * hidden_dim,), jnp.float32, -k_lstm, k_lstm)
        # Kernel layout: reorder to (i,f,o,g), transpose to (D,4H)/(H,4H),
        # fuse biases (f32), cast matmul weights to bf16 (f32 accumulate on MXU).
        w_ih_k = _reorder_ifgo_to_ifog(w_ih).T.astype(jnp.bfloat16)   # (D, 4H)
        w_hh_k = _reorder_ifgo_to_ifog(w_hh).T.astype(jnp.bfloat16)   # (H, 4H)
        b_k = _reorder_ifgo_to_ifog((b_ih + b_hh)[:, None]).T         # (1, 4H) f32
        layers.append((w_ih_k, w_hh_k, b_k))

    key, k5, k6 = jax.random.split(key, 3)
    k_lin = 1.0 / math.sqrt(hidden_dim)
    w_out = jax.random.uniform(k5, (output_dim, hidden_dim), jnp.float32,
                               -k_lin, k_lin).T                       # (H, O)
    b_out = jax.random.uniform(k6, (output_dim,), jnp.float32, -k_lin, k_lin)
    # Pad O to a multiple of 128 so the fused projection's stores are lane-dense.
    o_pad = pl.cdiv(output_dim, 128) * 128
    w_out_p = jnp.zeros((hidden_dim, o_pad), jnp.float32).at[:, :output_dim].set(w_out)
    b_out_p = jnp.zeros((1, o_pad), jnp.float32).at[0, :output_dim].set(b_out)
    return {"layers": layers,
            "w_out": w_out_p.astype(jnp.bfloat16),                    # (H, Opad) bf16
            "b_out": b_out_p}                                         # (1, Opad) f32


# --------------------------- Pure-JAX reference check -------------------------

def lstm_ref(x, params, out_dim):
    """f32 reference using the same (bf16-quantized) weights, gate order (i,f,o,g)."""
    h_seq = jnp.transpose(x, (1, 0, 2)).astype(jnp.float32)
    B = h_seq.shape[1]
    for (w_ih, w_hh, b) in params["layers"]:
        w_ih = w_ih.astype(jnp.float32)
        w_hh = w_hh.astype(jnp.float32)
        H = w_hh.shape[0]

        def step(carry, x_t, w_ih=w_ih, w_hh=w_hh, b=b, H=H):
            h, c = carry
            gates = x_t @ w_ih + h @ w_hh + b[0]
            i = jax.nn.sigmoid(gates[:, :H])
            f = jax.nn.sigmoid(gates[:, H:2 * H])
            o = jax.nn.sigmoid(gates[:, 2 * H:3 * H])
            g = jnp.tanh(gates[:, 3 * H:])
            c = f * c + i * g
            h = o * jnp.tanh(c)
            return (h, c), h

        init = (jnp.zeros((B, H), jnp.float32), jnp.zeros((B, H), jnp.float32))
        _, h_seq = jax.lax.scan(step, init, h_seq)
    out = h_seq @ params["w_out"].astype(jnp.float32) + params["b_out"][0]
    out = out[..., :out_dim]
    return jnp.transpose(out, (1, 0, 2))


if __name__ == "__main__":
    m, K = 2, 8                 # batch, sequence length
    input_dim, hidden_dim, output_dim, num_layers = 16, 32, 8, 2

    key = jax.random.PRNGKey(0)
    key, kx, kp = jax.random.split(key, 3)
    x = jax.random.normal(kx, (m, K, input_dim), jnp.float32)
    params = init_params(kp, input_dim, hidden_dim, output_dim, num_layers)

    out = jax.block_until_ready(lstm_model(x, params, out_dim=output_dim))
    ref = lstm_ref(x, params, output_dim)

    assert out.shape == (m, K, output_dim)
    # bf16 matmul operands / activations vs f32 reference -> loosened tolerance.
    assert jnp.allclose(out, ref, atol=3e-2, rtol=3e-2), "mismatch vs reference"

    print("KERNEL_OK")
</pallas_src>

<mosaic_0001>
module attributes {stable_mosaic.version = 11 : i64} {
  func.func @_k(%arg0: i32, %arg1: memref<8x128xf32, #tpu.memory_space<vmem>>, %arg2: memref<8x128xf32, #tpu.memory_space<vmem>>) attributes {dimension_semantics = [#tpu.dimension_semantics<arbitrary>], iteration_bounds = array<i64: 2>, scalar_prefetch = 0 : i64, scratch_operands = 0 : i64, tpu.core_type = #tpu.core_type<tc>, window_params = [{pipeline_mode = #tpu.pipeline_mode<synchronous>, transform_indices = @transform_0, window_bounds = array<i64: 8, 128>}, {transform_indices = @transform_1, window_bounds = array<i64: 8, 128>}]} {
    %c0 = arith.constant 0 : index
    %c0_0 = arith.constant 0 : index
    %0 = vector.load %arg1[%c0, %c0_0] : memref<8x128xf32, #tpu.memory_space<vmem>>, vector<8x128xf32>
    %cst = arith.constant 1.000000e+00 : f32
    %1 = vector.broadcast %cst : f32 to vector<8x128xf32>
    %2 = arith.addf %0, %1 : vector<8x128xf32>
    %c0_1 = arith.constant 0 : index
    %c0_2 = arith.constant 0 : index
    %3 = vector.load %arg2[%c0_1, %c0_2] : memref<8x128xf32, #tpu.memory_space<vmem>>, vector<8x128xf32>
    tpu.vector_store %arg2[%c0_1, %c0_2], %2 {strides = array<i32>} : memref<8x128xf32, #tpu.memory_space<vmem>>, vector<8x128xf32>,
    return
  }
  func.func @transform_0(%arg0: i32) -> (i32, i32) {
    %c0_i32 = arith.constant 0 : i32
    %c0_i32_0 = arith.constant 0 : i32
    %c0_i32_1 = arith.constant 0 : i32
    return %c0_i32, %c0_i32_0 : i32, i32
  }
  func.func @transform_1(%arg0: i32) -> (i32, i32) {
    %c0_i32 = arith.constant 0 : i32
    %c0_i32_0 = arith.constant 0 : i32
    return %arg0, %c0_i32 : i32, i32
  }
}

module attributes {stable_mosaic.version = 11 : i64} {
  func.func @_lstm_last_fused_kernel(%arg0: i32, %arg1: i32, %arg2: memref<8x16x32xbf16, #tpu.memory_space<vmem>>, %arg3: memref<32x128xbf16, #tpu.memory_space<vmem>>, %arg4: memref<32x128xbf16, #tpu.memory_space<vmem>>, %arg5: memref<1x128xf32, #tpu.memory_space<vmem>>, %arg6: memref<32x128xbf16, #tpu.memory_space<vmem>>, %arg7: memref<1x128xf32, #tpu.memory_space<vmem>>, %arg8: memref<8x16x128xf32, #tpu.memory_space<vmem>>, %arg9: memref<16x32xf32, #tpu.memory_space<vmem>>, %arg10: memref<16x32xf32, #tpu.memory_space<vmem>>) attributes {dimension_semantics = [#tpu.dimension_semantics<parallel>, #tpu.dimension_semantics<arbitrary>], iteration_bounds = array<i64: 1, 1>, scalar_prefetch = 0 : i64, scratch_operands = 2 : i64, tpu.core_type = #tpu.core_type<tc>, window_params = [{transform_indices = @transform_0, window_bounds = array<i64: 8, 16, 32>}, {pipeline_mode = #tpu.pipeline_mode<synchronous>, transform_indices = @transform_1, window_bounds = array<i64: 32, 128>}, {pipeline_mode = #tpu.pipeline_mode<synchronous>, transform_indices = @transform_2, window_bounds = array<i64: 32, 128>}, {pipeline_mode = #tpu.pipeline_mode<synchronous>, transform_indices = @transform_3, window_bounds = array<i64: 1, 128>}, {pipeline_mode = #tpu.pipeline_mode<synchronous>, transform_indices = @transform_4, window_bounds = array<i64: 32, 128>}, {pipeline_mode = #tpu.pipeline_mode<synchronous>, transform_indices = @transform_5, window_bounds = array<i64: 1, 128>}, {transform_indices = @transform_6, window_bounds = array<i64: 8, 16, 128>}]} {
    %c0 = arith.constant 0 : index
    %c0_0 = arith.constant 0 : index
    %0 = vector.load %arg6[%c0, %c0_0] : memref<32x128xbf16, #tpu.memory_space<vmem>>, vector<32x128xbf16>
    %c0_1 = arith.constant 0 : index
    %c0_2 = arith.constant 0 : index
    %1 = vector.load %arg7[%c0_1, %c0_2] : memref<1x128xf32, #tpu.memory_space<vmem>>, vector<1x128xf32>
    %c0_i32 = arith.constant 0 : i32
    %2 = arith.cmpi eq, %arg1, %c0_i32 : i32
    %3 = arith.extui %2 : i1 to i32
    %c0_i32_3 = arith.constant 0 : i32
    %4 = arith.cmpi ne, %3, %c0_i32_3 : i32
    scf.if %4 {
      %cst_62 = arith.constant 0.000000e+00 : f32
      %242 = vector.broadcast %cst_62 : f32 to vector<16x32xf32>
      %c0_63 = arith.constant 0 : index
      %c0_64 = arith.constant 0 : index
      %243 = vector.load %arg9[%c0_63, %c0_64] : memref<16x32xf32, #tpu.memory_space<vmem>>, vector<16x32xf32>
      tpu.vector_store %arg9[%c0_63, %c0_64], %242 {strides = array<i32>} : memref<16x32xf32, #tpu.memory_space<vmem>>, vector<16x32xf32>,
      %cst_65 = arith.constant 0.000000e+00 : f32
      %244 = vector.broadcast %cst_65 : f32 to vector<16x32xf32>
      %c0_66 = arith.constant 0 : index
      %c0_67 = arith.constant 0 : index
      %245 = vector.load %arg10[%c0_66, %c0_67] : memref<16x32xf32, #tpu.memory_space<vmem>>, vector<16x32xf32>
      tpu.vector_store %arg10[%c0_66, %c0_67], %244 {strides = array<i32>} : memref<16x32xf32, #tpu.memory_space<vmem>>, vector<16x32xf32>,
    } else {
    }
    %c0_4 = arith.constant 0 : index
    %c0_5 = arith.constant 0 : index
    %c0_6 = arith.constant 0 : index
    %5 = vector.load %arg2[%c0_4, %c0_5, %c0_6] : memref<8x16x32xbf16, #tpu.memory_space<vmem>>, vector<8x16x32xbf16>
    %6 = vector.shape_cast %5 : vector<8x16x32xbf16> to vector<128x32xbf16>
    %c0_7 = arith.constant 0 : index
    %c0_8 = arith.constant 0 : index
    %7 = vector.load %arg3[%c0_7, %c0_8] : memref<32x128xbf16, #tpu.memory_space<vmem>>, vector<32x128xbf16>
    %cst = arith.constant dense<0.000000e+00> : vector<128x128xf32>
    %8 = tpu.matmul %6, %7, %cst {dimension_numbers = #tpu.dot_dimension_numbers<[1], [0], [0], [1], [0, 0, 1, 1], [], []>} : vector<128x32xbf16>, vector<32x128xbf16>, vector<128x128xf32> -> vector<128x128xf32>
    %c0_9 = arith.constant 0 : index
    %c0_10 = arith.constant 0 : index
    %9 = vector.load %arg5[%c0_9, %c0_10] : memref<1x128xf32, #tpu.memory_space<vmem>>, vector<1x128xf32>
    %10 = vector.broadcast %9 : vector<1x128xf32> to vector<128x128xf32>
    %11 = arith.addf %8, %10 : vector<128x128xf32>
    %12 = arith.truncf %11 : vector<128x128xf32> to vector<128x128xbf16>
    %c0_11 = arith.constant 0 : index
    %c0_12 = arith.constant 0 : index
    %13 = vector.load %arg4[%c0_11, %c0_12] : memref<32x128xbf16, #tpu.memory_space<vmem>>, vector<32x128xbf16>
    %c0_13 = arith.constant 0 : index
    %c0_14 = arith.constant 0 : index
    %14 = vector.load %arg9[%c0_13, %c0_14] : memref<16x32xf32, #tpu.memory_space<vmem>>, vector<16x32xf32>
    %c0_15 = arith.constant 0 : index
    %c0_16 = arith.constant 0 : index
    %15 = vector.load %arg10[%c0_15, %c0_16] : memref<16x32xf32, #tpu.memory_space<vmem>>, vector<16x32xf32>
    %16 = vector.extract_strided_slice %12 {offsets = [0, 0], sizes = [16, 128], strides = [1, 1]} : vector<128x128xbf16> to vector<16x128xbf16>
    %17 = arith.extf %16 : vector<16x128xbf16> to vector<16x128xf32>
    %18 = arith.truncf %14 : vector<16x32xf32> to vector<16x32xbf16>
    %cst_17 = arith.constant dense<0.000000e+00> : vector<16x128xf32>
    %19 = tpu.matmul %18, %13, %cst_17 {dimension_numbers = #tpu.dot_dimension_numbers<[1], [0], [0], [1], [0, 0, 1, 1], [], []>} : vector<16x32xbf16>, vector<32x128xbf16>, vector<16x128xf32> -> vector<16x128xf32>
    %20 = arith.addf %17, %19 : vector<16x128xf32>
    %21 = vector.extract_strided_slice %20 {offsets = [0, 0], sizes = [16, 96], strides = [1, 1]} : vector<16x128xf32> to vector<16x96xf32>
    %22 = arith.negf %21 : vector<16x96xf32>
    %23 = math.exp %22 : vector<16x96xf32>
    %cst_18 = arith.constant 1.000000e+00 : f32
    %24 = vector.broadcast %cst_18 : f32 to vector<16x96xf32>
    %25 = arith.addf %24, %23 : vector<16x96xf32>
    %26 = arith.divf %24, %25 : vector<16x96xf32>
    %27 = vector.extract_strided_slice %20 {offsets = [0, 96], sizes = [16, 32], strides = [1, 1]} : vector<16x128xf32> to vector<16x32xf32>
    %28 = math.tanh %27 : vector<16x32xf32>
    %29 = vector.extract_strided_slice %26 {offsets = [0, 32], sizes = [16, 32], strides = [1, 1]} : vector<16x96xf32> to vector<16x32xf32>
    %30 = arith.mulf %29, %15 : vector<16x32xf32>
    %31 = vector.extract_strided_slice %26 {offsets = [0, 0], sizes = [16, 32], strides = [1, 1]} : vector<16x96xf32> to vector<16x32xf32>
    %32 = arith.mulf %31, %28 : vector<16x32xf32>
    %33 = arith.addf %30, %32 : vector<16x32xf32>
    %34 = vector.extract_strided_slice %26 {offsets = [0, 64], sizes = [16, 32], strides = [1, 1]} : vector<16x96xf32> to vector<16x32xf32>
    %35 = math.tanh %33 : vector<16x32xf32>
    %36 = arith.mulf %34, %35 : vector<16x32xf32>
    %37 = arith.truncf %36 : vector<16x32xf32> to vector<16x32xbf16>
    %cst_19 = arith.constant dense<0.000000e+00> : vector<16x128xf32>
    %38 = tpu.matmul %37, %0, %cst_19 {dimension_numbers = #tpu.dot_dimension_numbers<[1], [0], [0], [1], [0, 0, 1, 1], [], []>} : vector<16x32xbf16>, vector<32x128xbf16>, vector<16x128xf32> -> vector<16x128xf32>
    %39 = vector.broadcast %1 : vector<1x128xf32> to vector<16x128xf32>
    %40 = arith.addf %38, %39 : vector<16x128xf32>
    %c0_20 = arith.constant 0 : index
    %c0_21 = arith.constant 0 : index
    %c0_22 = arith.constant 0 : index
    %41 = vector.load %arg8[%c0_20, %c0_21, %c0_22] : memref<8x16x128xf32, #tpu.memory_space<vmem>>, vector<1x16x128xf32>
    %42 = vector.shape_cast %41 : vector<1x16x128xf32> to vector<16x128xf32>
    %43 = vector.shape_cast %40 : vector<16x128xf32> to vector<1x16x128xf32>
    tpu.vector_store %arg8[%c0_20, %c0_21, %c0_22], %43 {strides = array<i32>} : memref<8x16x128xf32, #tpu.memory_space<vmem>>, vector<1x16x128xf32>,
    %44 = vector.extract_strided_slice %12 {offsets = [16, 0], sizes = [16, 128], strides = [1, 1]} : vector<128x128xbf16> to vector<16x128xbf16>
    %45 = arith.extf %44 : vector<16x128xbf16> to vector<16x128xf32>
    %46 = arith.truncf %36 : vector<16x32xf32> to vector<16x32xbf16>
    %cst_23 = arith.constant dense<0.000000e+00> : vector<16x128xf32>
    %47 = tpu.matmul %46, %13, %cst_23 {dimension_numbers = #tpu.dot_dimension_numbers<[1], [0], [0], [1], [0, 0, 1, 1], [], []>} : vector<16x32xbf16>, vector<32x128xbf16>, vector<16x128xf32> -> vector<16x128xf32>
    %48 = arith.addf %45, %47 : vector<16x128xf32>
    %49 = vector.extract_strided_slice %48 {offsets = [0, 0], sizes = [16, 96], strides = [1, 1]} : vector<16x128xf32> to vector<16x96xf32>
    %50 = arith.negf %49 : vector<16x96xf32>
    %51 = math.exp %50 : vector<16x96xf32>
    %cst_24 = arith.constant 1.000000e+00 : f32
    %52 = vector.broadcast %cst_24 : f32 to vector<16x96xf32>
    %53 = arith.addf %52, %51 : vector<16x96xf32>
    %54 = arith.divf %52, %53 : vector<16x96xf32>
    %55 = vector.extract_strided_slice %48 {offsets = [0, 96], sizes = [16, 32], strides = [1, 1]} : vector<16x128xf32> to vector<16x32xf32>
    %56 = math.tanh %55 : vector<16x32xf32>
    %57 = vector.extract_strided_slice %54 {offsets = [0, 32], sizes = [16, 32], strides = [1, 1]} : vector<16x96xf32> to vector<16x32xf32>
    %58 = arith.mulf %57, %33 : vector<16x32xf32>
    %59 = vector.extract_strided_slice %54 {offsets = [0, 0], sizes = [16, 32], strides = [1, 1]} : vector<16x96xf32> to vector<16x32xf32>
    %60 = arith.mulf %59, %56 : vector<16x32xf32>
    %61 = arith.addf %58, %60 : vector<16x32xf32>
    %62 = vector.extract_strided_slice %54 {offsets = [0, 64], sizes = [16, 32], strides = [1, 1]} : vector<16x96xf32> to vector<16x32xf32>
    %63 = math.tanh %61 : vector<16x32xf32>
    %64 = arith.mulf %62, %63 : vector<16x32xf32>
    %65 = arith.truncf %64 : vector<16x32xf32> to vector<16x32xbf16>
    %cst_25 = arith.constant dense<0.000000e+00> : vector<16x128xf32>
    %66 = tpu.matmul %65, %0, %cst_25 {dimension_numbers = #tpu.dot_dimension_numbers<[1], [0], [0], [1], [0, 0, 1, 1], [], []>} : vector<16x32xbf16>, vector<32x128xbf16>, vector<16x128xf32> -> vector<16x128xf32>
    %67 = vector.broadcast %1 : vector<1x128xf32> to vector<16x128xf32>
    %68 = arith.addf %66, %67 : vector<16x128xf32>
    %c1 = arith.constant 1 : index
    %c0_26 = arith.constant 0 : index
    %c0_27 = arith.constant 0 : index
    %69 = vector.load %arg8[%c1, %c0_26, %c0_27] : memref<8x16x128xf32, #tpu.memory_space<vmem>>, vector<1x16x128xf32>
    %70 = vector.shape_cast %69 : vector<1x16x128xf32> to vector<16x128xf32>
    %71 = vector.shape_cast %68 : vector<16x128xf32> to vector<1x16x128xf32>
    tpu.vector_store %arg8[%c1, %c0_26, %c0_27], %71 {strides = array<i32>} : memref<8x16x128xf32, #tpu.memory_space<vmem>>, vector<1x16x128xf32>,
    %72 = vector.extract_strided_slice %12 {offsets = [32, 0], sizes = [16, 128], strides = [1, 1]} : vector<128x128xbf16> to vector<16x128xbf16>
    %73 = arith.extf %72 : vector<16x128xbf16> to vector<16x128xf32>
    %74 = arith.truncf %64 : vector<16x32xf32> to vector<16x32xbf16>
    %cst_28 = arith.constant dense<0.000000e+00> : vector<16x128xf32>
    %75 = tpu.matmul %74, %13, %cst_28 {dimension_numbers = #tpu.dot_dimension_numbers<[1], [0], [0], [1], [0, 0, 1, 1], [], []>} : vector<16x32xbf16>, vector<32x128xbf16>, vector<16x128xf32> -> vector<16x128xf32>
    %76 = arith.addf %73, %75 : vector<16x128xf32>
    %77 = vector.extract_strided_slice %76 {offsets = [0, 0], sizes = [16, 96], strides = [1, 1]} : vector<16x128xf32> to vector<16x96xf32>
    %78 = arith.negf %77 : vector<16x96xf32>
    %79 = math.exp %78 : vector<16x96xf32>
    %cst_29 = arith.constant 1.000000e+00 : f32
    %80 = vector.broadcast %cst_29 : f32 to vector<16x96xf32>
    %81 = arith.addf %80, %79 : vector<16x96xf32>
    %82 = arith.divf %80, %81 : vector<16x96xf32>
    %83 = vector.extract_strided_slice %76 {offsets = [0, 96], sizes = [16, 32], strides = [1, 1]} : vector<16x128xf32> to vector<16x32xf32>
    %84 = math.tanh %83 : vector<16x32xf32>
    %85 = vector.extract_strided_slice %82 {offsets = [0, 32], sizes = [16, 32], strides = [1, 1]} : vector<16x96xf32> to vector<16x32xf32>
    %86 = arith.mulf %85, %61 : vector<16x32xf32>
    %87 = vector.extract_strided_slice %82 {offsets = [0, 0], sizes = [16, 32], strides = [1, 1]} : vector<16x96xf32> to vector<16x32xf32>
    %88 = arith.mulf %87, %84 : vector<16x32xf32>
    %89 = arith.addf %86, %88 : vector<16x32xf32>
    %90 = vector.extract_strided_slice %82 {offsets = [0, 64], sizes = [16, 32], strides = [1, 1]} : vector<16x96xf32> to vector<16x32xf32>
    %91 = math.tanh %89 : vector<16x32xf32>
    %92 = arith.mulf %90, %91 : vector<16x32xf32>
    %93 = arith.truncf %92 : vector<16x32xf32> to vector<16x32xbf16>
    %cst_30 = arith.constant dense<0.000000e+00> : vector<16x128xf32>
    %94 = tpu.matmul %93, %0, %cst_30 {dimension_numbers = #tpu.dot_dimension_numbers<[1], [0], [0], [1], [0, 0, 1, 1], [], []>} : vector<16x32xbf16>, vector<32x128xbf16>, vector<16x128xf32> -> vector<16x128xf32>
    %95 = vector.broadcast %1 : vector<1x128xf32> to vector<16x128xf32>
    %96 = arith.addf %94, %95 : vector<16x128xf32>
    %c2 = arith.constant 2 : index
    %c0_31 = arith.constant 0 : index
    %c0_32 = arith.constant 0 : index
    %97 = vector.load %arg8[%c2, %c0_31, %c0_32] : memref<8x16x128xf32, #tpu.memory_space<vmem>>, vector<1x16x128xf32>
    %98 = vector.shape_cast %97 : vector<1x16x128xf32> to vector<16x128xf32>
    %99 = vector.shape_cast %96 : vector<16x128xf32> to vector<1x16x128xf32>
    tpu.vector_store %arg8[%c2, %c0_31, %c0_32], %99 {strides = array<i32>} : memref<8x16x128xf32, #tpu.memory_space<vmem>>, vector<1x16x128xf32>,
    %100 = vector.extract_strided_slice %12 {offsets = [48, 0], sizes = [16, 128], strides = [1, 1]} : vector<128x128xbf16> to vector<16x128xbf16>
    %101 = arith.extf %100 : vector<16x128xbf16> to vector<16x128xf32>
    %102 = arith.truncf %92 : vector<16x32xf32> to vector<16x32xbf16>
    %cst_33 = arith.constant dense<0.000000e+00> : vector<16x128xf32>
    %103 = tpu.matmul %102, %13, %cst_33 {dimension_numbers = #tpu.dot_dimension_numbers<[1], [0], [0], [1], [0, 0, 1, 1], [], []>} : vector<16x32xbf16>, vector<32x128xbf16>, vector<16x128xf32> -> vector<16x128xf32>
    %104 = arith.addf %101, %103 : vector<16x128xf32>
    %105 = vector.extract_strided_slice %104 {offsets = [0, 0], sizes = [16, 96], strides = [1, 1]} : vector<16x128xf32> to vector<16x96xf32>
    %106 = arith.negf %105 : vector<16x96xf32>
    %107 = math.exp %106 : vector<16x96xf32>
    %cst_34 = arith.constant 1.000000e+00 : f32
    %108 = vector.broadcast %cst_34 : f32 to vector<16x96xf32>
    %109 = arith.addf %108, %107 : vector<16x96xf32>
    %110 = arith.divf %108, %109 : vector<16x96xf32>
    %111 = vector.extract_strided_slice %104 {offsets = [0, 96], sizes = [16, 32], strides = [1, 1]} : vector<16x128xf32> to vector<16x32xf32>
    %112 = math.tanh %111 : vector<16x32xf32>
    %113 = vector.extract_strided_slice %110 {offsets = [0, 32], sizes = [16, 32], strides = [1, 1]} : vector<16x96xf32> to vector<16x32xf32>
    %114 = arith.mulf %113, %89 : vector<16x32xf32>
    %115 = vector.extract_strided_slice %110 {offsets = [0, 0], sizes = [16, 32], strides = [1, 1]} : vector<16x96xf32> to vector<16x32xf32>
    %116 = arith.mulf %115, %112 : vector<16x32xf32>
    %117 = arith.addf %114, %116 : vector<16x32xf32>
    %118 = vector.extract_strided_slice %110 {offsets = [0, 64], sizes = [16, 32], strides = [1, 1]} : vector<16x96xf32> to vector<16x32xf32>
    %119 = math.tanh %117 : vector<16x32xf32>
    %120 = arith.mulf %118, %119 : vector<16x32xf32>
    %121 = arith.truncf %120 : vector<16x32xf32> to vector<16x32xbf16>
    %cst_35 = arith.constant dense<0.000000e+00> : vector<16x128xf32>
    %122 = tpu.matmul %121, %0, %cst_35 {dimension_numbers = #tpu.dot_dimension_numbers<[1], [0], [0], [1], [0, 0, 1, 1], [], []>} : vector<16x32xbf16>, vector<32x128xbf16>, vector<16x128xf32> -> vector<16x128xf32>
    %123 = vector.broadcast %1 : vector<1x128xf32> to vector<16x128xf32>
    %124 = arith.addf %122, %123 : vector<16x128xf32>
    %c3 = arith.constant 3 : index
    %c0_36 = arith.constant 0 : index
    %c0_37 = arith.constant 0 : index
    %125 = vector.load %arg8[%c3, %c0_36, %c0_37] : memref<8x16x128xf32, #tpu.memory_space<vmem>>, vector<1x16x128xf32>
    %126 = vector.shape_cast %125 : vector<1x16x128xf32> to vector<16x128xf32>
    %127 = vector.shape_cast %124 : vector<16x128xf32> to vector<1x16x128xf32>
    tpu.vector_store %arg8[%c3, %c0_36, %c0_37], %127 {strides = array<i32>} : memref<8x16x128xf32, #tpu.memory_space<vmem>>, vector<1x16x128xf32>,
    %128 = vector.extract_strided_slice %12 {offsets = [64, 0], sizes = [16, 128], strides = [1, 1]} : vector<128x128xbf16> to vector<16x128xbf16>
    %129 = arith.extf %128 : vector<16x128xbf16> to vector<16x128xf32>
    %130 = arith.truncf %120 : vector<16x32xf32> to vector<16x32xbf16>
    %cst_38 = arith.constant dense<0.000000e+00> : vector<16x128xf32>
    %131 = tpu.matmul %130, %13, %cst_38 {dimension_numbers = #tpu.dot_dimension_numbers<[1], [0], [0], [1], [0, 0, 1, 1], [], []>} : vector<16x32xbf16>, vector<32x128xbf16>, vector<16x128xf32> -> vector<16x128xf32>
    %132 = arith.addf %129, %131 : vector<16x128xf32>
    %133 = vector.extract_strided_slice %132 {offsets = [0, 0], sizes = [16, 96], strides = [1, 1]} : vector<16x128xf32> to vector<16x96xf32>
    %134 = arith.negf %133 : vector<16x96xf32>
    %135 = math.exp %134 : vector<16x96xf32>
    %cst_39 = arith.constant 1.000000e+00 : f32
    %136 = vector.broadcast %cst_39 : f32 to vector<16x96xf32>
    %137 = arith.addf %136, %135 : vector<16x96xf32>
    %138 = arith.divf %136, %137 : vector<16x96xf32>
    %139 = vector.extract_strided_slice %132 {offsets = [0, 96], sizes = [16, 32], strides = [1, 1]} : vector<16x128xf32> to vector<16x32xf32>
    %140 = math.tanh %139 : vector<16x32xf32>
    %141 = vector.extract_strided_slice %138 {offsets = [0, 32], sizes = [16, 32], strides = [1, 1]} : vector<16x96xf32> to vector<16x32xf32>
    %142 = arith.mulf %141, %117 : vector<16x32xf32>
    %143 = vector.extract_strided_slice %138 {offsets = [0, 0], sizes = [16, 32], strides = [1, 1]} : vector<16x96xf32> to vector<16x32xf32>
    %144 = arith.mulf %143, %140 : vector<16x32xf32>
    %145 = arith.addf %142, %144 : vector<16x32xf32>
    %146 = vector.extract_strided_slice %138 {offsets = [0, 64], sizes = [16, 32], strides = [1, 1]} : vector<16x96xf32> to vector<16x32xf32>
    %147 = math.tanh %145 : vector<16x32xf32>
    %148 = arith.mulf %146, %147 : vector<16x32xf32>
    %149 = arith.truncf %148 : vector<16x32xf32> to vector<16x32xbf16>
    %cst_40 = arith.constant dense<0.000000e+00> : vector<16x128xf32>
    %150 = tpu.matmul %149, %0, %cst_40 {dimension_numbers = #tpu.dot_dimension_numbers<[1], [0], [0], [1], [0, 0, 1, 1], [], []>} : vector<16x32xbf16>, vector<32x128xbf16>, vector<16x128xf32> -> vector<16x128xf32>
    %151 = vector.broadcast %1 : vector<1x128xf32> to vector<16x128xf32>
    %152 = arith.addf %150, %151 : vector<16x128xf32>
    %c4 = arith.constant 4 : index
    %c0_41 = arith.constant 0 : index
    %c0_42 = arith.constant 0 : index
    %153 = vector.load %arg8[%c4, %c0_41, %c0_42] : memref<8x16x128xf32, #tpu.memory_space<vmem>>, vector<1x16x128xf32>
    %154 = vector.shape_cast %153 : vector<1x16x128xf32> to vector<16x128xf32>
    %155 = vector.shape_cast %152 : vector<16x128xf32> to vector<1x16x128xf32>
    tpu.vector_store %arg8[%c4, %c0_41, %c0_42], %155 {strides = array<i32>} : memref<8x16x128xf32, #tpu.memory_space<vmem>>, vector<1x16x128xf32>,
    %156 = vector.extract_strided_slice %12 {offsets = [80, 0], sizes = [16, 128], strides = [1, 1]} : vector<128x128xbf16> to vector<16x128xbf16>
    %157 = arith.extf %156 : vector<16x128xbf16> to vector<16x128xf32>
    %158 = arith.truncf %148 : vector<16x32xf32> to vector<16x32xbf16>
    %cst_43 = arith.constant dense<0.000000e+00> : vector<16x128xf32>
    %159 = tpu.matmul %158, %13, %cst_43 {dimension_numbers = #tpu.dot_dimension_numbers<[1], [0], [0], [1], [0, 0, 1, 1], [], []>} : vector<16x32xbf16>, vector<32x128xbf16>, vector<16x128xf32> -> vector<16x128xf32>
    %160 = arith.addf %157, %159 : vector<16x128xf32>
    %161 = vector.extract_strided_slice %160 {offsets = [0, 0], sizes = [16, 96], strides = [1, 1]} : vector<16x128xf32> to vector<16x96xf32>
    %162 = arith.negf %161 : vector<16x96xf32>
    %163 = math.exp %162 : vector<16x96xf32>
    %cst_44 = arith.constant 1.000000e+00 : f32
    %164 = vector.broadcast %cst_44 : f32 to vector<16x96xf32>
    %165 = arith.addf %164, %163 : vector<16x96xf32>
    %166 = arith.divf %164, %165 : vector<16x96xf32>
    %167 = vector.extract_strided_slice %160 {offsets = [0, 96], sizes = [16, 32], strides = [1, 1]} : vector<16x128xf32> to vector<16x32xf32>
    %168 = math.tanh %167 : vector<16x32xf32>
    %169 = vector.extract_strided_slice %166 {offsets = [0, 32], sizes = [16, 32], strides = [1, 1]} : vector<16x96xf32> to vector<16x32xf32>
    %170 = arith.mulf %169, %145 : vector<16x32xf32>
    %171 = vector.extract_strided_slice %166 {offsets = [0, 0], sizes = [16, 32], strides = [1, 1]} : vector<16x96xf32> to vector<16x32xf32>
    %172 = arith.mulf %171, %168 : vector<16x32xf32>
    %173 = arith.addf %170, %172 : vector<16x32xf32>
    %174 = vector.extract_strided_slice %166 {offsets = [0, 64], sizes = [16, 32], strides = [1, 1]} : vector<16x96xf32> to vector<16x32xf32>
    %175 = math.tanh %173 : vector<16x32xf32>
    %176 = arith.mulf %174, %175 : vector<16x32xf32>
    %177 = arith.truncf %176 : vector<16x32xf32> to vector<16x32xbf16>
    %cst_45 = arith.constant dense<0.000000e+00> : vector<16x128xf32>
    %178 = tpu.matmul %177, %0, %cst_45 {dimension_numbers = #tpu.dot_dimension_numbers<[1], [0], [0], [1], [0, 0, 1, 1], [], []>} : vector<16x32xbf16>, vector<32x128xbf16>, vector<16x128xf32> -> vector<16x128xf32>
    %179 = vector.broadcast %1 : vector<1x128xf32> to vector<16x128xf32>
    %180 = arith.addf %178, %179 : vector<16x128xf32>
    %c5 = arith.constant 5 : index
    %c0_46 = arith.constant 0 : index
    %c0_47 = arith.constant 0 : index
    %181 = vector.load %arg8[%c5, %c0_46, %c0_47] : memref<8x16x128xf32, #tpu.memory_space<vmem>>, vector<1x16x128xf32>
    %182 = vector.shape_cast %181 : vector<1x16x128xf32> to vector<16x128xf32>
    %183 = vector.shape_cast %180 : vector<16x128xf32> to vector<1x16x128xf32>
    tpu.vector_store %arg8[%c5, %c0_46, %c0_47], %183 {strides = array<i32>} : memref<8x16x128xf32, #tpu.memory_space<vmem>>, vector<1x16x128xf32>,
    %184 = vector.extract_strided_slice %12 {offsets = [96, 0], sizes = [16, 128], strides = [1, 1]} : vector<128x128xbf16> to vector<16x128xbf16>
    %185 = arith.extf %184 : vector<16x128xbf16> to vector<16x128xf32>
    %186 = arith.truncf %176 : vector<16x32xf32> to vector<16x32xbf16>
    %cst_48 = arith.constant dense<0.000000e+00> : vector<16x128xf32>
    %187 = tpu.matmul %186, %13, %cst_48 {dimension_numbers = #tpu.dot_dimension_numbers<[1], [0], [0], [1], [0, 0, 1, 1], [], []>} : vector<16x32xbf16>, vector<32x128xbf16>, vector<16x128xf32> -> vector<16x128xf32>
    %188 = arith.addf %185, %187 : vector<16x128xf32>
    %189 = vector.extract_strided_slice %188 {offsets = [0, 0], sizes = [16, 96], strides = [1, 1]} : vector<16x128xf32> to vector<16x96xf32>
    %190 = arith.negf %189 : vector<16x96xf32>
    %191 = math.exp %190 : vector<16x96xf32>
    %cst_49 = arith.constant 1.000000e+00 : f32
    %192 = vector.broadcast %cst_49 : f32 to vector<16x96xf32>
    %193 = arith.addf %192, %191 : vector<16x96xf32>
    %194 = arith.divf %192, %193 : vector<16x96xf32>
    %195 = vector.extract_strided_slice %188 {offsets = [0, 96], sizes = [16, 32], strides = [1, 1]} : vector<16x128xf32> to vector<16x32xf32>
    %196 = math.tanh %195 : vector<16x32xf32>
    %197 = vector.extract_strided_slice %194 {offsets = [0, 32], sizes = [16, 32], strides = [1, 1]} : vector<16x96xf32> to vector<16x32xf32>
    %198 = arith.mulf %197, %173 : vector<16x32xf32>
    %199 = vector.extract_strided_slice %194 {offsets = [0, 0], sizes = [16, 32], strides = [1, 1]} : vector<16x96xf32> to vector<16x32xf32>
    %200 = arith.mulf %199, %196 : vector<16x32xf32>
    %201 = arith.addf %198, %200 : vector<16x32xf32>
    %202 = vector.extract_strided_slice %194 {offsets = [0, 64], sizes = [16, 32], strides = [1, 1]} : vector<16x96xf32> to vector<16x32xf32>
    %203 = math.tanh %201 : vector<16x32xf32>
    %204 = arith.mulf %202, %203 : vector<16x32xf32>
    %205 = arith.truncf %204 : vector<16x32xf32> to vector<16x32xbf16>
    %cst_50 = arith.constant dense<0.000000e+00> : vector<16x128xf32>
    %206 = tpu.matmul %205, %0, %cst_50 {dimension_numbers = #tpu.dot_dimension_numbers<[1], [0], [0], [1], [0, 0, 1, 1], [], []>} : vector<16x32xbf16>, vector<32x128xbf16>, vector<16x128xf32> -> vector<16x128xf32>
    %207 = vector.broadcast %1 : vector<1x128xf32> to vector<16x128xf32>
    %208 = arith.addf %206, %207 : vector<16x128xf32>
    %c6 = arith.constant 6 : index
    %c0_51 = arith.constant 0 : index
    %c0_52 = arith.constant 0 : index
    %209 = vector.load %arg8[%c6, %c0_51, %c0_52] : memref<8x16x128xf32, #tpu.memory_space<vmem>>, vector<1x16x128xf32>
    %210 = vector.shape_cast %209 : vector<1x16x128xf32> to vector<16x128xf32>
    %211 = vector.shape_cast %208 : vector<16x128xf32> to vector<1x16x128xf32>
    tpu.vector_store %arg8[%c6, %c0_51, %c0_52], %211 {strides = array<i32>} : memref<8x16x128xf32, #tpu.memory_space<vmem>>, vector<1x16x128xf32>,
    %212 = vector.extract_strided_slice %12 {offsets = [112, 0], sizes = [16, 128], strides = [1, 1]} : vector<128x128xbf16> to vector<16x128xbf16>
    %213 = arith.extf %212 : vector<16x128xbf16> to vector<16x128xf32>
    %214 = arith.truncf %204 : vector<16x32xf32> to vector<16x32xbf16>
    %cst_53 = arith.constant dense<0.000000e+00> : vector<16x128xf32>
    %215 = tpu.matmul %214, %13, %cst_53 {dimension_numbers = #tpu.dot_dimension_numbers<[1], [0], [0], [1], [0, 0, 1, 1], [], []>} : vector<16x32xbf16>, vector<32x128xbf16>, vector<16x128xf32> -> vector<16x128xf32>
    %216 = arith.addf %213, %215 : vector<16x128xf32>
    %217 = vector.extract_strided_slice %216 {offsets = [0, 0], sizes = [16, 96], strides = [1, 1]} : vector<16x128xf32> to vector<16x96xf32>
    %218 = arith.negf %217 : vector<16x96xf32>
    %219 = math.exp %218 : vector<16x96xf32>
    %cst_54 = arith.constant 1.000000e+00 : f32
    %220 = vector.broadcast %cst_54 : f32 to vector<16x96xf32>
    %221 = arith.addf %220, %219 : vector<16x96xf32>
    %222 = arith.divf %220, %221 : vector<16x96xf32>
    %223 = vector.extract_strided_slice %216 {offsets = [0, 96], sizes = [16, 32], strides = [1, 1]} : vector<16x128xf32> to vector<16x32xf32>
    %224 = math.tanh %223 : vector<16x32xf32>
    %225 = vector.extract_strided_slice %222 {offsets = [0, 32], sizes = [16, 32], strides = [1, 1]} : vector<16x96xf32> to vector<16x32xf32>
    %226 = arith.mulf %225, %201 : vector<16x32xf32>
    %227 = vector.extract_strided_slice %222 {offsets = [0, 0], sizes = [16, 32], strides = [1, 1]} : vector<16x96xf32> to vector<16x32xf32>
    %228 = arith.mulf %227, %224 : vector<16x32xf32>
    %229 = arith.addf %226, %228 : vector<16x32xf32>
    %230 = vector.extract_strided_slice %222 {offsets = [0, 64], sizes = [16, 32], strides = [1, 1]} : vector<16x96xf32> to vector<16x32xf32>
    %231 = math.tanh %229 : vector<16x32xf32>
    %232 = arith.mulf %230, %231 : vector<16x32xf32>
    %233 = arith.truncf %232 : vector<16x32xf32> to vector<16x32xbf16>
    %cst_55 = arith.constant dense<0.000000e+00> : vector<16x128xf32>
    %234 = tpu.matmul %233, %0, %cst_55 {dimension_numbers = #tpu.dot_dimension_numbers<[1], [0], [0], [1], [0, 0, 1, 1], [], []>} : vector<16x32xbf16>, vector<32x128xbf16>, vector<16x128xf32> -> vector<16x128xf32>
    %235 = vector.broadcast %1 : vector<1x128xf32> to vector<16x128xf32>
    %236 = arith.addf %234, %235 : vector<16x128xf32>
    %c7 = arith.constant 7 : index
    %c0_56 = arith.constant 0 : index
    %c0_57 = arith.constant 0 : index
    %237 = vector.load %arg8[%c7, %c0_56, %c0_57] : memref<8x16x128xf32, #tpu.memory_space<vmem>>, vector<1x16x128xf32>
    %238 = vector.shape_cast %237 : vector<1x16x128xf32> to vector<16x128xf32>
    %239 = vector.shape_cast %236 : vector<16x128xf32> to vector<1x16x128xf32>
    tpu.vector_store %arg8[%c7, %c0_56, %c0_57], %239 {strides = array<i32>} : memref<8x16x128xf32, #tpu.memory_space<vmem>>, vector<1x16x128xf32>,
    %c0_58 = arith.constant 0 : index
    %c0_59 = arith.constant 0 : index
    %240 = vector.load %arg9[%c0_58, %c0_59] : memref<16x32xf32, #tpu.memory_space<vmem>>, vector<16x32xf32>
    tpu.vector_store %arg9[%c0_58, %c0_59], %232 {strides = array<i32>} : memref<16x32xf32, #tpu.memory_space<vmem>>, vector<16x32xf32>,
    %c0_60 = arith.constant 0 : index
    %c0_61 = arith.constant 0 : index
    %241 = vector.load %arg10[%c0_60, %c0_61] : memref<16x32xf32, #tpu.memory_space<vmem>>, vector<16x32xf32>
    tpu.vector_store %arg10[%c0_60, %c0_61], %229 {strides = array<i32>} : memref<16x32xf32, #tpu.memory_space<vmem>>, vector<16x32xf32>,
    return
  }
  func.func @transform_0(%arg0: i32, %arg1: i32) -> (i32, i32, i32) {
    %c0_i32 = arith.constant 0 : i32
    %c0_i32_0 = arith.constant 0 : i32
    return %arg1, %arg0, %c0_i32 : i32, i32, i32
  }
  func.func @transform_1(%arg0: i32, %arg1: i32) -> (i32, i32) {
    %c0_i32 = arith.constant 0 : i32
    %c0_i32_0 = arith.constant 0 : i32
    %c0_i32_1 = arith.constant 0 : i32
    return %c0_i32, %c0_i32_0 : i32, i32
  }
  func.func @transform_2(%arg0: i32, %arg1: i32) -> (i32, i32) {
    %c0_i32 = arith.constant 0 : i32
    %c0_i32_0 = arith.constant 0 : i32
    %c0_i32_1 = arith.constant 0 : i32
    return %c0_i32, %c0_i32_0 : i32, i32
  }
  func.func @transform_3(%arg0: i32, %arg1: i32) -> (i32, i32) {
    %c0_i32 = arith.constant 0 : i32
    %c0_i32_0 = arith.constant 0 : i32
    %c0_i32_1 = arith.constant 0 : i32
    return %c0_i32, %c0_i32_0 : i32, i32
  }
  func.func @transform_4(%arg0: i32, %arg1: i32) -> (i32, i32) {
    %c0_i32 = arith.constant 0 : i32
    %c0_i32_0 = arith.constant 0 : i32
    %c0_i32_1 = arith.constant 0 : i32
    return %c0_i32, %c0_i32_0 : i32, i32
  }
  func.func @transform_5(%arg0: i32, %arg1: i32) -> (i32, i32) {
    %c0_i32 = arith.constant 0 : i32
    %c0_i32_0 = arith.constant 0 : i32
    %c0_i32_1 = arith.constant 0 : i32
    return %c0_i32, %c0_i32_0 : i32, i32
  }
  func.func @transform_6(%arg0: i32, %arg1: i32) -> (i32, i32, i32) {
    %c0_i32 = arith.constant 0 : i32
    %c0_i32_0 = arith.constant 0 : i32
    return %arg1, %arg0, %c0_i32 : i32, i32, i32
  }
}

module attributes {stable_mosaic.version = 11 : i64} {
  func.func @_lstm_layer_kernel(%arg0: i32, %arg1: i32, %arg2: memref<8x16x16xbf16, #tpu.memory_space<vmem>>, %arg3: memref<16x128xbf16, #tpu.memory_space<vmem>>, %arg4: memref<32x128xbf16, #tpu.memory_space<vmem>>, %arg5: memref<1x128xf32, #tpu.memory_space<vmem>>, %arg6: memref<8x16x32xbf16, #tpu.memory_space<vmem>>, %arg7: memref<16x32xf32, #tpu.memory_space<vmem>>, %arg8: memref<16x32xf32, #tpu.memory_space<vmem>>) attributes {dimension_semantics = [#tpu.dimension_semantics<parallel>, #tpu.dimension_semantics<arbitrary>], iteration_bounds = array<i64: 1, 1>, scalar_prefetch = 0 : i64, scratch_operands = 2 : i64, tpu.core_type = #tpu.core_type<tc>, window_params = [{transform_indices = @transform_0, window_bounds = array<i64: 8, 16, 16>}, {pipeline_mode = #tpu.pipeline_mode<synchronous>, transform_indices = @transform_1, window_bounds = array<i64: 16, 128>}, {pipeline_mode = #tpu.pipeline_mode<synchronous>, transform_indices = @transform_2, window_bounds = array<i64: 32, 128>}, {pipeline_mode = #tpu.pipeline_mode<synchronous>, transform_indices = @transform_3, window_bounds = array<i64: 1, 128>}, {transform_indices = @transform_4, window_bounds = array<i64: 8, 16, 32>}]} {
    %c0_i32 = arith.constant 0 : i32
    %0 = arith.cmpi eq, %arg1, %c0_i32 : i32
    %1 = arith.extui %0 : i1 to i32
    %c0_i32_0 = arith.constant 0 : i32
    %2 = arith.cmpi ne, %1, %c0_i32_0 : i32
    scf.if %2 {
      %cst_50 = arith.constant 0.000000e+00 : f32
      %216 = vector.broadcast %cst_50 : f32 to vector<16x32xf32>
      %c0_51 = arith.constant 0 : index
      %c0_52 = arith.constant 0 : index
      %217 = vector.load %arg7[%c0_51, %c0_52] : memref<16x32xf32, #tpu.memory_space<vmem>>, vector<16x32xf32>
      tpu.vector_store %arg7[%c0_51, %c0_52], %216 {strides = array<i32>} : memref<16x32xf32, #tpu.memory_space<vmem>>, vector<16x32xf32>,
      %cst_53 = arith.constant 0.000000e+00 : f32
      %218 = vector.broadcast %cst_53 : f32 to vector<16x32xf32>
      %c0_54 = arith.constant 0 : index
      %c0_55 = arith.constant 0 : index
      %219 = vector.load %arg8[%c0_54, %c0_55] : memref<16x32xf32, #tpu.memory_space<vmem>>, vector<16x32xf32>
      tpu.vector_store %arg8[%c0_54, %c0_55], %218 {strides = array<i32>} : memref<16x32xf32, #tpu.memory_space<vmem>>, vector<16x32xf32>,
    } else {
    }
    %c0 = arith.constant 0 : index
    %c0_1 = arith.constant 0 : index
    %c0_2 = arith.constant 0 : index
    %3 = vector.load %arg2[%c0, %c0_1, %c0_2] : memref<8x16x16xbf16, #tpu.memory_space<vmem>>, vector<8x16x16xbf16>
    %4 = vector.shape_cast %3 : vector<8x16x16xbf16> to vector<128x16xbf16>
    %c0_3 = arith.constant 0 : index
    %c0_4 = arith.constant 0 : index
    %5 = vector.load %arg3[%c0_3, %c0_4] : memref<16x128xbf16, #tpu.memory_space<vmem>>, vector<16x128xbf16>
    %cst = arith.constant dense<0.000000e+00> : vector<128x128xf32>
    %6 = tpu.matmul %4, %5, %cst {dimension_numbers = #tpu.dot_dimension_numbers<[1], [0], [0], [1], [0, 0, 1, 1], [], []>} : vector<128x16xbf16>, vector<16x128xbf16>, vector<128x128xf32> -> vector<128x128xf32>
    %c0_5 = arith.constant 0 : index
    %c0_6 = arith.constant 0 : index
    %7 = vector.load %arg5[%c0_5, %c0_6] : memref<1x128xf32, #tpu.memory_space<vmem>>, vector<1x128xf32>
    %8 = vector.broadcast %7 : vector<1x128xf32> to vector<128x128xf32>
    %9 = arith.addf %6, %8 : vector<128x128xf32>
    %10 = arith.truncf %9 : vector<128x128xf32> to vector<128x128xbf16>
    %c0_7 = arith.constant 0 : index
    %c0_8 = arith.constant 0 : index
    %11 = vector.load %arg4[%c0_7, %c0_8] : memref<32x128xbf16, #tpu.memory_space<vmem>>, vector<32x128xbf16>
    %c0_9 = arith.constant 0 : index
    %c0_10 = arith.constant 0 : index
    %12 = vector.load %arg7[%c0_9, %c0_10] : memref<16x32xf32, #tpu.memory_space<vmem>>, vector<16x32xf32>
    %c0_11 = arith.constant 0 : index
    %c0_12 = arith.constant 0 : index
    %13 = vector.load %arg8[%c0_11, %c0_12] : memref<16x32xf32, #tpu.memory_space<vmem>>, vector<16x32xf32>
    %14 = vector.extract_strided_slice %10 {offsets = [0, 0], sizes = [16, 128], strides = [1, 1]} : vector<128x128xbf16> to vector<16x128xbf16>
    %15 = arith.extf %14 : vector<16x128xbf16> to vector<16x128xf32>
    %16 = arith.truncf %12 : vector<16x32xf32> to vector<16x32xbf16>
    %cst_13 = arith.constant dense<0.000000e+00> : vector<16x128xf32>
    %17 = tpu.matmul %16, %11, %cst_13 {dimension_numbers = #tpu.dot_dimension_numbers<[1], [0], [0], [1], [0, 0, 1, 1], [], []>} : vector<16x32xbf16>, vector<32x128xbf16>, vector<16x128xf32> -> vector<16x128xf32>
    %18 = arith.addf %15, %17 : vector<16x128xf32>
    %19 = vector.extract_strided_slice %18 {offsets = [0, 0], sizes = [16, 96], strides = [1, 1]} : vector<16x128xf32> to vector<16x96xf32>
    %20 = arith.negf %19 : vector<16x96xf32>
    %21 = math.exp %20 : vector<16x96xf32>
    %cst_14 = arith.constant 1.000000e+00 : f32
    %22 = vector.broadcast %cst_14 : f32 to vector<16x96xf32>
    %23 = arith.addf %22, %21 : vector<16x96xf32>
    %24 = arith.divf %22, %23 : vector<16x96xf32>
    %25 = vector.extract_strided_slice %18 {offsets = [0, 96], sizes = [16, 32], strides = [1, 1]} : vector<16x128xf32> to vector<16x32xf32>
    %26 = math.tanh %25 : vector<16x32xf32>
    %27 = vector.extract_strided_slice %24 {offsets = [0, 32], sizes = [16, 32], strides = [1, 1]} : vector<16x96xf32> to vector<16x32xf32>
    %28 = arith.mulf %27, %13 : vector<16x32xf32>
    %29 = vector.extract_strided_slice %24 {offsets = [0, 0], sizes = [16, 32], strides = [1, 1]} : vector<16x96xf32> to vector<16x32xf32>
    %30 = arith.mulf %29, %26 : vector<16x32xf32>
    %31 = arith.addf %28, %30 : vector<16x32xf32>
    %32 = vector.extract_strided_slice %24 {offsets = [0, 64], sizes = [16, 32], strides = [1, 1]} : vector<16x96xf32> to vector<16x32xf32>
    %33 = math.tanh %31 : vector<16x32xf32>
    %34 = arith.mulf %32, %33 : vector<16x32xf32>
    %35 = arith.truncf %34 : vector<16x32xf32> to vector<16x32xbf16>
    %c0_15 = arith.constant 0 : index
    %c0_16 = arith.constant 0 : index
    %c0_17 = arith.constant 0 : index
    %36 = vector.load %arg6[%c0_15, %c0_16, %c0_17] : memref<8x16x32xbf16, #tpu.memory_space<vmem>>, vector<1x16x32xbf16>
    %37 = vector.shape_cast %36 : vector<1x16x32xbf16> to vector<16x32xbf16>
    %38 = vector.shape_cast %35 : vector<16x32xbf16> to vector<1x16x32xbf16>
    tpu.vector_store %arg6[%c0_15, %c0_16, %c0_17], %38 {strides = array<i32>} : memref<8x16x32xbf16, #tpu.memory_space<vmem>>, vector<1x16x32xbf16>,
    %39 = vector.extract_strided_slice %10 {offsets = [16, 0], sizes = [16, 128], strides = [1, 1]} : vector<128x128xbf16> to vector<16x128xbf16>
    %40 = arith.extf %39 : vector<16x128xbf16> to vector<16x128xf32>
    %41 = arith.truncf %34 : vector<16x32xf32> to vector<16x32xbf16>
    %cst_18 = arith.constant dense<0.000000e+00> : vector<16x128xf32>
    %42 = tpu.matmul %41, %11, %cst_18 {dimension_numbers = #tpu.dot_dimension_numbers<[1], [0], [0], [1], [0, 0, 1, 1], [], []>} : vector<16x32xbf16>, vector<32x128xbf16>, vector<16x128xf32> -> vector<16x128xf32>
    %43 = arith.addf %40, %42 : vector<16x128xf32>
    %44 = vector.extract_strided_slice %43 {offsets = [0, 0], sizes = [16, 96], strides = [1, 1]} : vector<16x128xf32> to vector<16x96xf32>
    %45 = arith.negf %44 : vector<16x96xf32>
    %46 = math.exp %45 : vector<16x96xf32>
    %cst_19 = arith.constant 1.000000e+00 : f32
    %47 = vector.broadcast %cst_19 : f32 to vector<16x96xf32>
    %48 = arith.addf %47, %46 : vector<16x96xf32>
    %49 = arith.divf %47, %48 : vector<16x96xf32>
    %50 = vector.extract_strided_slice %43 {offsets = [0, 96], sizes = [16, 32], strides = [1, 1]} : vector<16x128xf32> to vector<16x32xf32>
    %51 = math.tanh %50 : vector<16x32xf32>
    %52 = vector.extract_strided_slice %49 {offsets = [0, 32], sizes = [16, 32], strides = [1, 1]} : vector<16x96xf32> to vector<16x32xf32>
    %53 = arith.mulf %52, %31 : vector<16x32xf32>
    %54 = vector.extract_strided_slice %49 {offsets = [0, 0], sizes = [16, 32], strides = [1, 1]} : vector<16x96xf32> to vector<16x32xf32>
    %55 = arith.mulf %54, %51 : vector<16x32xf32>
    %56 = arith.addf %53, %55 : vector<16x32xf32>
    %57 = vector.extract_strided_slice %49 {offsets = [0, 64], sizes = [16, 32], strides = [1, 1]} : vector<16x96xf32> to vector<16x32xf32>
    %58 = math.tanh %56 : vector<16x32xf32>
    %59 = arith.mulf %57, %58 : vector<16x32xf32>
    %60 = arith.truncf %59 : vector<16x32xf32> to vector<16x32xbf16>
    %c1 = arith.constant 1 : index
    %c0_20 = arith.constant 0 : index
    %c0_21 = arith.constant 0 : index
    %61 = vector.load %arg6[%c1, %c0_20, %c0_21] : memref<8x16x32xbf16, #tpu.memory_space<vmem>>, vector<1x16x32xbf16>
    %62 = vector.shape_cast %61 : vector<1x16x32xbf16> to vector<16x32xbf16>
    %63 = vector.shape_cast %60 : vector<16x32xbf16> to vector<1x16x32xbf16>
    tpu.vector_store %arg6[%c1, %c0_20, %c0_21], %63 {strides = array<i32>} : memref<8x16x32xbf16, #tpu.memory_space<vmem>>, vector<1x16x32xbf16>,
    %64 = vector.extract_strided_slice %10 {offsets = [32, 0], sizes = [16, 128], strides = [1, 1]} : vector<128x128xbf16> to vector<16x128xbf16>
    %65 = arith.extf %64 : vector<16x128xbf16> to vector<16x128xf32>
    %66 = arith.truncf %59 : vector<16x32xf32> to vector<16x32xbf16>
    %cst_22 = arith.constant dense<0.000000e+00> : vector<16x128xf32>
    %67 = tpu.matmul %66, %11, %cst_22 {dimension_numbers = #tpu.dot_dimension_numbers<[1], [0], [0], [1], [0, 0, 1, 1], [], []>} : vector<16x32xbf16>, vector<32x128xbf16>, vector<16x128xf32> -> vector<16x128xf32>
    %68 = arith.addf %65, %67 : vector<16x128xf32>
    %69 = vector.extract_strided_slice %68 {offsets = [0, 0], sizes = [16, 96], strides = [1, 1]} : vector<16x128xf32> to vector<16x96xf32>
    %70 = arith.negf %69 : vector<16x96xf32>
    %71 = math.exp %70 : vector<16x96xf32>
    %cst_23 = arith.constant 1.000000e+00 : f32
    %72 = vector.broadcast %cst_23 : f32 to vector<16x96xf32>
    %73 = arith.addf %72, %71 : vector<16x96xf32>
    %74 = arith.divf %72, %73 : vector<16x96xf32>
    %75 = vector.extract_strided_slice %68 {offsets = [0, 96], sizes = [16, 32], strides = [1, 1]} : vector<16x128xf32> to vector<16x32xf32>
    %76 = math.tanh %75 : vector<16x32xf32>
    %77 = vector.extract_strided_slice %74 {offsets = [0, 32], sizes = [16, 32], strides = [1, 1]} : vector<16x96xf32> to vector<16x32xf32>
    %78 = arith.mulf %77, %56 : vector<16x32xf32>
    %79 = vector.extract_strided_slice %74 {offsets = [0, 0], sizes = [16, 32], strides = [1, 1]} : vector<16x96xf32> to vector<16x32xf32>
    %80 = arith.mulf %79, %76 : vector<16x32xf32>
    %81 = arith.addf %78, %80 : vector<16x32xf32>
    %82 = vector.extract_strided_slice %74 {offsets = [0, 64], sizes = [16, 32], strides = [1, 1]} : vector<16x96xf32> to vector<16x32xf32>
    %83 = math.tanh %81 : vector<16x32xf32>
    %84 = arith.mulf %82, %83 : vector<16x32xf32>
    %85 = arith.truncf %84 : vector<16x32xf32> to vector<16x32xbf16>
    %c2 = arith.constant 2 : index
    %c0_24 = arith.constant 0 : index
    %c0_25 = arith.constant 0 : index
    %86 = vector.load %arg6[%c2, %c0_24, %c0_25] : memref<8x16x32xbf16, #tpu.memory_space<vmem>>, vector<1x16x32xbf16>
    %87 = vector.shape_cast %86 : vector<1x16x32xbf16> to vector<16x32xbf16>
    %88 = vector.shape_cast %85 : vector<16x32xbf16> to vector<1x16x32xbf16>
    tpu.vector_store %arg6[%c2, %c0_24, %c0_25], %88 {strides = array<i32>} : memref<8x16x32xbf16, #tpu.memory_space<vmem>>, vector<1x16x32xbf16>,
    %89 = vector.extract_strided_slice %10 {offsets = [48, 0], sizes = [16, 128], strides = [1, 1]} : vector<128x128xbf16> to vector<16x128xbf16>
    %90 = arith.extf %89 : vector<16x128xbf16> to vector<16x128xf32>
    %91 = arith.truncf %84 : vector<16x32xf32> to vector<16x32xbf16>
    %cst_26 = arith.constant dense<0.000000e+00> : vector<16x128xf32>
    %92 = tpu.matmul %91, %11, %cst_26 {dimension_numbers = #tpu.dot_dimension_numbers<[1], [0], [0], [1], [0, 0, 1, 1], [], []>} : vector<16x32xbf16>, vector<32x128xbf16>, vector<16x128xf32> -> vector<16x128xf32>
    %93 = arith.addf %90, %92 : vector<16x128xf32>
    %94 = vector.extract_strided_slice %93 {offsets = [0, 0], sizes = [16, 96], strides = [1, 1]} : vector<16x128xf32> to vector<16x96xf32>
    %95 = arith.negf %94 : vector<16x96xf32>
    %96 = math.exp %95 : vector<16x96xf32>
    %cst_27 = arith.constant 1.000000e+00 : f32
    %97 = vector.broadcast %cst_27 : f32 to vector<16x96xf32>
    %98 = arith.addf %97, %96 : vector<16x96xf32>
    %99 = arith.divf %97, %98 : vector<16x96xf32>
    %100 = vector.extract_strided_slice %93 {offsets = [0, 96], sizes = [16, 32], strides = [1, 1]} : vector<16x128xf32> to vector<16x32xf32>
    %101 = math.tanh %100 : vector<16x32xf32>
    %102 = vector.extract_strided_slice %99 {offsets = [0, 32], sizes = [16, 32], strides = [1, 1]} : vector<16x96xf32> to vector<16x32xf32>
    %103 = arith.mulf %102, %81 : vector<16x32xf32>
    %104 = vector.extract_strided_slice %99 {offsets = [0, 0], sizes = [16, 32], strides = [1, 1]} : vector<16x96xf32> to vector<16x32xf32>
    %105 = arith.mulf %104, %101 : vector<16x32xf32>
    %106 = arith.addf %103, %105 : vector<16x32xf32>
    %107 = vector.extract_strided_slice %99 {offsets = [0, 64], sizes = [16, 32], strides = [1, 1]} : vector<16x96xf32> to vector<16x32xf32>
    %108 = math.tanh %106 : vector<16x32xf32>
    %109 = arith.mulf %107, %108 : vector<16x32xf32>
    %110 = arith.truncf %109 : vector<16x32xf32> to vector<16x32xbf16>
    %c3 = arith.constant 3 : index
    %c0_28 = arith.constant 0 : index
    %c0_29 = arith.constant 0 : index
    %111 = vector.load %arg6[%c3, %c0_28, %c0_29] : memref<8x16x32xbf16, #tpu.memory_space<vmem>>, vector<1x16x32xbf16>
    %112 = vector.shape_cast %111 : vector<1x16x32xbf16> to vector<16x32xbf16>
    %113 = vector.shape_cast %110 : vector<16x32xbf16> to vector<1x16x32xbf16>
    tpu.vector_store %arg6[%c3, %c0_28, %c0_29], %113 {strides = array<i32>} : memref<8x16x32xbf16, #tpu.memory_space<vmem>>, vector<1x16x32xbf16>,
    %114 = vector.extract_strided_slice %10 {offsets = [64, 0], sizes = [16, 128], strides = [1, 1]} : vector<128x128xbf16> to vector<16x128xbf16>
    %115 = arith.extf %114 : vector<16x128xbf16> to vector<16x128xf32>
    %116 = arith.truncf %109 : vector<16x32xf32> to vector<16x32xbf16>
    %cst_30 = arith.constant dense<0.000000e+00> : vector<16x128xf32>
    %117 = tpu.matmul %116, %11, %cst_30 {dimension_numbers = #tpu.dot_dimension_numbers<[1], [0], [0], [1], [0, 0, 1, 1], [], []>} : vector<16x32xbf16>, vector<32x128xbf16>, vector<16x128xf32> -> vector<16x128xf32>
    %118 = arith.addf %115, %117 : vector<16x128xf32>
    %119 = vector.extract_strided_slice %118 {offsets = [0, 0], sizes = [16, 96], strides = [1, 1]} : vector<16x128xf32> to vector<16x96xf32>
    %120 = arith.negf %119 : vector<16x96xf32>
    %121 = math.exp %120 : vector<16x96xf32>
    %cst_31 = arith.constant 1.000000e+00 : f32
    %122 = vector.broadcast %cst_31 : f32 to vector<16x96xf32>
    %123 = arith.addf %122, %121 : vector<16x96xf32>
    %124 = arith.divf %122, %123 : vector<16x96xf32>
    %125 = vector.extract_strided_slice %118 {offsets = [0, 96], sizes = [16, 32], strides = [1, 1]} : vector<16x128xf32> to vector<16x32xf32>
    %126 = math.tanh %125 : vector<16x32xf32>
    %127 = vector.extract_strided_slice %124 {offsets = [0, 32], sizes = [16, 32], strides = [1, 1]} : vector<16x96xf32> to vector<16x32xf32>
    %128 = arith.mulf %127, %106 : vector<16x32xf32>
    %129 = vector.extract_strided_slice %124 {offsets = [0, 0], sizes = [16, 32], strides = [1, 1]} : vector<16x96xf32> to vector<16x32xf32>
    %130 = arith.mulf %129, %126 : vector<16x32xf32>
    %131 = arith.addf %128, %130 : vector<16x32xf32>
    %132 = vector.extract_strided_slice %124 {offsets = [0, 64], sizes = [16, 32], strides = [1, 1]} : vector<16x96xf32> to vector<16x32xf32>
    %133 = math.tanh %131 : vector<16x32xf32>
    %134 = arith.mulf %132, %133 : vector<16x32xf32>
    %135 = arith.truncf %134 : vector<16x32xf32> to vector<16x32xbf16>
    %c4 = arith.constant 4 : index
    %c0_32 = arith.constant 0 : index
    %c0_33 = arith.constant 0 : index
    %136 = vector.load %arg6[%c4, %c0_32, %c0_33] : memref<8x16x32xbf16, #tpu.memory_space<vmem>>, vector<1x16x32xbf16>
    %137 = vector.shape_cast %136 : vector<1x16x32xbf16> to vector<16x32xbf16>
    %138 = vector.shape_cast %135 : vector<16x32xbf16> to vector<1x16x32xbf16>
    tpu.vector_store %arg6[%c4, %c0_32, %c0_33], %138 {strides = array<i32>} : memref<8x16x32xbf16, #tpu.memory_space<vmem>>, vector<1x16x32xbf16>,
    %139 = vector.extract_strided_slice %10 {offsets = [80, 0], sizes = [16, 128], strides = [1, 1]} : vector<128x128xbf16> to vector<16x128xbf16>
    %140 = arith.extf %139 : vector<16x128xbf16> to vector<16x128xf32>
    %141 = arith.truncf %134 : vector<16x32xf32> to vector<16x32xbf16>
    %cst_34 = arith.constant dense<0.000000e+00> : vector<16x128xf32>
    %142 = tpu.matmul %141, %11, %cst_34 {dimension_numbers = #tpu.dot_dimension_numbers<[1], [0], [0], [1], [0, 0, 1, 1], [], []>} : vector<16x32xbf16>, vector<32x128xbf16>, vector<16x128xf32> -> vector<16x128xf32>
    %143 = arith.addf %140, %142 : vector<16x128xf32>
    %144 = vector.extract_strided_slice %143 {offsets = [0, 0], sizes = [16, 96], strides = [1, 1]} : vector<16x128xf32> to vector<16x96xf32>
    %145 = arith.negf %144 : vector<16x96xf32>
    %146 = math.exp %145 : vector<16x96xf32>
    %cst_35 = arith.constant 1.000000e+00 : f32
    %147 = vector.broadcast %cst_35 : f32 to vector<16x96xf32>
    %148 = arith.addf %147, %146 : vector<16x96xf32>
    %149 = arith.divf %147, %148 : vector<16x96xf32>
    %150 = vector.extract_strided_slice %143 {offsets = [0, 96], sizes = [16, 32], strides = [1, 1]} : vector<16x128xf32> to vector<16x32xf32>
    %151 = math.tanh %150 : vector<16x32xf32>
    %152 = vector.extract_strided_slice %149 {offsets = [0, 32], sizes = [16, 32], strides = [1, 1]} : vector<16x96xf32> to vector<16x32xf32>
    %153 = arith.mulf %152, %131 : vector<16x32xf32>
    %154 = vector.extract_strided_slice %149 {offsets = [0, 0], sizes = [16, 32], strides = [1, 1]} : vector<16x96xf32> to vector<16x32xf32>
    %155 = arith.mulf %154, %151 : vector<16x32xf32>
    %156 = arith.addf %153, %155 : vector<16x32xf32>
    %157 = vector.extract_strided_slice %149 {offsets = [0, 64], sizes = [16, 32], strides = [1, 1]} : vector<16x96xf32> to vector<16x32xf32>
    %158 = math.tanh %156 : vector<16x32xf32>
    %159 = arith.mulf %157, %158 : vector<16x32xf32>
    %160 = arith.truncf %159 : vector<16x32xf32> to vector<16x32xbf16>
    %c5 = arith.constant 5 : index
    %c0_36 = arith.constant 0 : index
    %c0_37 = arith.constant 0 : index
    %161 = vector.load %arg6[%c5, %c0_36, %c0_37] : memref<8x16x32xbf16, #tpu.memory_space<vmem>>, vector<1x16x32xbf16>
    %162 = vector.shape_cast %161 : vector<1x16x32xbf16> to vector<16x32xbf16>
    %163 = vector.shape_cast %160 : vector<16x32xbf16> to vector<1x16x32xbf16>
    tpu.vector_store %arg6[%c5, %c0_36, %c0_37], %163 {strides = array<i32>} : memref<8x16x32xbf16, #tpu.memory_space<vmem>>, vector<1x16x32xbf16>,
    %164 = vector.extract_strided_slice %10 {offsets = [96, 0], sizes = [16, 128], strides = [1, 1]} : vector<128x128xbf16> to vector<16x128xbf16>
    %165 = arith.extf %164 : vector<16x128xbf16> to vector<16x128xf32>
    %166 = arith.truncf %159 : vector<16x32xf32> to vector<16x32xbf16>
    %cst_38 = arith.constant dense<0.000000e+00> : vector<16x128xf32>
    %167 = tpu.matmul %166, %11, %cst_38 {dimension_numbers = #tpu.dot_dimension_numbers<[1], [0], [0], [1], [0, 0, 1, 1], [], []>} : vector<16x32xbf16>, vector<32x128xbf16>, vector<16x128xf32> -> vector<16x128xf32>
    %168 = arith.addf %165, %167 : vector<16x128xf32>
    %169 = vector.extract_strided_slice %168 {offsets = [0, 0], sizes = [16, 96], strides = [1, 1]} : vector<16x128xf32> to vector<16x96xf32>
    %170 = arith.negf %169 : vector<16x96xf32>
    %171 = math.exp %170 : vector<16x96xf32>
    %cst_39 = arith.constant 1.000000e+00 : f32
    %172 = vector.broadcast %cst_39 : f32 to vector<16x96xf32>
    %173 = arith.addf %172, %171 : vector<16x96xf32>
    %174 = arith.divf %172, %173 : vector<16x96xf32>
    %175 = vector.extract_strided_slice %168 {offsets = [0, 96], sizes = [16, 32], strides = [1, 1]} : vector<16x128xf32> to vector<16x32xf32>
    %176 = math.tanh %175 : vector<16x32xf32>
    %177 = vector.extract_strided_slice %174 {offsets = [0, 32], sizes = [16, 32], strides = [1, 1]} : vector<16x96xf32> to vector<16x32xf32>
    %178 = arith.mulf %177, %156 : vector<16x32xf32>
    %179 = vector.extract_strided_slice %174 {offsets = [0, 0], sizes = [16, 32], strides = [1, 1]} : vector<16x96xf32> to vector<16x32xf32>
    %180 = arith.mulf %179, %176 : vector<16x32xf32>
    %181 = arith.addf %178, %180 : vector<16x32xf32>
    %182 = vector.extract_strided_slice %174 {offsets = [0, 64], sizes = [16, 32], strides = [1, 1]} : vector<16x96xf32> to vector<16x32xf32>
    %183 = math.tanh %181 : vector<16x32xf32>
    %184 = arith.mulf %182, %183 : vector<16x32xf32>
    %185 = arith.truncf %184 : vector<16x32xf32> to vector<16x32xbf16>
    %c6 = arith.constant 6 : index
    %c0_40 = arith.constant 0 : index
    %c0_41 = arith.constant 0 : index
    %186 = vector.load %arg6[%c6, %c0_40, %c0_41] : memref<8x16x32xbf16, #tpu.memory_space<vmem>>, vector<1x16x32xbf16>
    %187 = vector.shape_cast %186 : vector<1x16x32xbf16> to vector<16x32xbf16>
    %188 = vector.shape_cast %185 : vector<16x32xbf16> to vector<1x16x32xbf16>
    tpu.vector_store %arg6[%c6, %c0_40, %c0_41], %188 {strides = array<i32>} : memref<8x16x32xbf16, #tpu.memory_space<vmem>>, vector<1x16x32xbf16>,
    %189 = vector.extract_strided_slice %10 {offsets = [112, 0], sizes = [16, 128], strides = [1, 1]} : vector<128x128xbf16> to vector<16x128xbf16>
    %190 = arith.extf %189 : vector<16x128xbf16> to vector<16x128xf32>
    %191 = arith.truncf %184 : vector<16x32xf32> to vector<16x32xbf16>
    %cst_42 = arith.constant dense<0.000000e+00> : vector<16x128xf32>
    %192 = tpu.matmul %191, %11, %cst_42 {dimension_numbers = #tpu.dot_dimension_numbers<[1], [0], [0], [1], [0, 0, 1, 1], [], []>} : vector<16x32xbf16>, vector<32x128xbf16>, vector<16x128xf32> -> vector<16x128xf32>
    %193 = arith.addf %190, %192 : vector<16x128xf32>
    %194 = vector.extract_strided_slice %193 {offsets = [0, 0], sizes = [16, 96], strides = [1, 1]} : vector<16x128xf32> to vector<16x96xf32>
    %195 = arith.negf %194 : vector<16x96xf32>
    %196 = math.exp %195 : vector<16x96xf32>
    %cst_43 = arith.constant 1.000000e+00 : f32
    %197 = vector.broadcast %cst_43 : f32 to vector<16x96xf32>
    %198 = arith.addf %197, %196 : vector<16x96xf32>
    %199 = arith.divf %197, %198 : vector<16x96xf32>
    %200 = vector.extract_strided_slice %193 {offsets = [0, 96], sizes = [16, 32], strides = [1, 1]} : vector<16x128xf32> to vector<16x32xf32>
    %201 = math.tanh %200 : vector<16x32xf32>
    %202 = vector.extract_strided_slice %199 {offsets = [0, 32], sizes = [16, 32], strides = [1, 1]} : vector<16x96xf32> to vector<16x32xf32>
    %203 = arith.mulf %202, %181 : vector<16x32xf32>
    %204 = vector.extract_strided_slice %199 {offsets = [0, 0], sizes = [16, 32], strides = [1, 1]} : vector<16x96xf32> to vector<16x32xf32>
    %205 = arith.mulf %204, %201 : vector<16x32xf32>
    %206 = arith.addf %203, %205 : vector<16x32xf32>
    %207 = vector.extract_strided_slice %199 {offsets = [0, 64], sizes = [16, 32], strides = [1, 1]} : vector<16x96xf32> to vector<16x32xf32>
    %208 = math.tanh %206 : vector<16x32xf32>
    %209 = arith.mulf %207, %208 : vector<16x32xf32>
    %210 = arith.truncf %209 : vector<16x32xf32> to vector<16x32xbf16>
    %c7 = arith.constant 7 : index
    %c0_44 = arith.constant 0 : index
    %c0_45 = arith.constant 0 : index
    %211 = vector.load %arg6[%c7, %c0_44, %c0_45] : memref<8x16x32xbf16, #tpu.memory_space<vmem>>, vector<1x16x32xbf16>
    %212 = vector.shape_cast %211 : vector<1x16x32xbf16> to vector<16x32xbf16>
    %213 = vector.shape_cast %210 : vector<16x32xbf16> to vector<1x16x32xbf16>
    tpu.vector_store %arg6[%c7, %c0_44, %c0_45], %213 {strides = array<i32>} : memref<8x16x32xbf16, #tpu.memory_space<vmem>>, vector<1x16x32xbf16>,
    %c0_46 = arith.constant 0 : index
    %c0_47 = arith.constant 0 : index
    %214 = vector.load %arg7[%c0_46, %c0_47] : memref<16x32xf32, #tpu.memory_space<vmem>>, vector<16x32xf32>
    tpu.vector_store %arg7[%c0_46, %c0_47], %209 {strides = array<i32>} : memref<16x32xf32, #tpu.memory_space<vmem>>, vector<16x32xf32>,
    %c0_48 = arith.constant 0 : index
    %c0_49 = arith.constant 0 : index
    %215 = vector.load %arg8[%c0_48, %c0_49] : memref<16x32xf32, #tpu.memory_space<vmem>>, vector<16x32xf32>
    tpu.vector_store %arg8[%c0_48, %c0_49], %206 {strides = array<i32>} : memref<16x32xf32, #tpu.memory_space<vmem>>, vector<16x32xf32>,
    return
  }
  func.func @transform_0(%arg0: i32, %arg1: i32) -> (i32, i32, i32) {
    %c0_i32 = arith.constant 0 : i32
    %c0_i32_0 = arith.constant 0 : i32
    return %arg1, %arg0, %c0_i32 : i32, i32, i32
  }
  func.func @transform_1(%arg0: i32, %arg1: i32) -> (i32, i32) {
    %c0_i32 = arith.constant 0 : i32
    %c0_i32_0 = arith.constant 0 : i32
    %c0_i32_1 = arith.constant 0 : i32
    return %c0_i32, %c0_i32_0 : i32, i32
  }
  func.func @transform_2(%arg0: i32, %arg1: i32) -> (i32, i32) {
    %c0_i32 = arith.constant 0 : i32
    %c0_i32_0 = arith.constant 0 : i32
    %c0_i32_1 = arith.constant 0 : i32
    return %c0_i32, %c0_i32_0 : i32, i32
  }
  func.func @transform_3(%arg0: i32, %arg1: i32) -> (i32, i32) {
    %c0_i32 = arith.constant 0 : i32
    %c0_i32_0 = arith.constant 0 : i32
    %c0_i32_1 = arith.constant 0 : i32
    return %c0_i32, %c0_i32_0 : i32, i32
  }
  func.func @transform_4(%arg0: i32, %arg1: i32) -> (i32, i32, i32) {
    %c0_i32 = arith.constant 0 : i32
    %c0_i32_0 = arith.constant 0 : i32
    return %arg1, %arg0, %c0_i32 : i32, i32, i32
  }
}

</mosaic_0001>

<bundles_post_ra>
// kernel: tpu_custom_call.1
= control target key start
LH: loop header
LB: loop body
LE: loop exit
PB: predicated region body
PF: predicated region fallthrough
CT: control target
= control target key end

     0   :  { %6 = vsyncpa [#allocation3], 0  ;;  %s441_s0 = inlined_call_operand.hbm [shape: f32[8,128], index: 0, kind: input, shape index: {}]   ;;  %s442_s1 = inlined_call_operand.hbm [shape: f32[16,128], index: 1, kind: output, shape index: {}]  }
   0x1   :  { %7 = vsyncpa [#allocation4], 0 }
   0x2   :  { %9 = vsyncpa [#allocation4 + $0x1], 0  ;;  %s357_s6 = smov 0   ;;  %s359_s7 = smov 0  }
   0x3   :  { %s361_s8 = smov 0   ;;  %s363_s9 = smov 0  }
   0x4 LB: > { %s378_s10 = sadd.s32 4294967295, %s344_s9   ;;  %s188_s11 = sadd.s32 4294967294, %s344_s9   ;;  %s344_s9 = sphi %s363_s9, %s448_s9   ;;  %s340_s8 = sphi %s361_s8, %s447_s8   ;;  %s336_s7 = sphi %s359_s7, %s446_s7   ;;  %s332_s6 = sphi %s357_s6, %s445_s6  }
   0x5   : > { %s382_s12 = sadd.s32 1, %s344_s9   ;;  %s43_s13 = sadd.s32 1, %s340_s8 }
   0x6   : > { %s40_s14 = ssub.s32 %s344_s9, %s382_s12  ;;  %p53_p0 = scmp.ne.s32.totalorder %s340_s8, %s336_s7 }
   0x7   : > { %p41_p1 = scmp.eq.s32.totalorder %s40_s14, 0  ;;  %p54_p2 = scmp.eq.s32.totalorder %s378_s10, 1 }
   0x8   : > { %p59_p3 = scmp.ne.s32.totalorder %s336_s7, %s332_s6  ;;  %p60_p4 = scmp.eq.s32.totalorder %s188_s11, 1 }
   0x9   : > { %s393_s15 = scalar_select %p41_p1, %s340_s8, %s43_s13  }
   0xa   : > { %p395_p5 = por %p54_p2, %p53_p0  ;;  %p399_p6 = por %p60_p4, %p59_p3 }
   0xb   : > { %p189_p7 = scmp.ge.s32.totalorder %s344_s9, 1  ;;  %p67_p8 = scmp.lt.s32.totalorder %s344_s9, 3 }
   0xc   : > { %p212_p9 = scmp.eq.s32.totalorder %s378_s10, 0  ;;  %s79_s20 = sshll.u32 %s441_s0, 4  ;;  %s80_s20 = int_to_ptr.hbm [resolvable:$true] %s79_s20 }
   0xd   : > { %p68_p10 = pnand %p189_p7, %p67_p8  ;;  %s346_s21 = smov [#allocation2]  }
   0xe   : > { %s81_s22 = sshll.u32 %s346_s21, 4  ;;  %s82_s22 = int_to_ptr.vmem [resolvable:$true] %s81_s22 }
   0xf   : > { %p204_p11 = pneg %p68_p10  ;;  %94 = sbr.rel (%p68_p10) target bundleno = 37 (0x25), region = 24 }
  0x11   : > { %p205_p12 = pnand %p212_p9, %p204_p11 }
  0x13   : > { %207 = dma.hbm_to_vmem [thread:$0]  (!%p205_p12), %s80_s20, 128, %s82_s22, [#allocation3]  }
  0x14   : > { %323 = dma.done.wait (%p212_p9), [#allocation3], 128  }
  0x15   : > { %325 = vsyncadd (%p212_p9), [#allocation3], 4294967168  ;;  %s107_s23 = sand.u32 1, %s336_s7   ;;  %s195_s24 = sshll.u32 %s378_s10, 3  ;;  %v110_v0 = vld [vmem:[#allocation2] sm:$0xff] }
  0x16   : > { %s193_s25 = sshll.u32 %s107_s23, 3  ;;  %s124_s28 = scalar_lea.hbm %s442_s1, %s195_s24  ;;  %v111_v1 = vadd.f32 1.0, %v110_v0 }
  0x17   : > { %s109_s29 = scalar_lea.vmem [#allocation5], %s193_s25  ;;  %s128_s2 = sshll.u32 %s124_s28, 4  ;;  %s129_s2 = int_to_ptr.hbm [resolvable:$true] %s128_s2 }
  0x18   : > { %s126_s30 = sshll.u32 %s109_s29, 4  ;;  %112 = vst [vmem:[%s109_s29] sm:$0xff] %v111_v1  ;;  %s114_s3 = scalar_lea.sflag [#allocation4], %s107_s23  ;;  %s127_s30 = int_to_ptr.vmem [resolvable:$true] %s126_s30 }
  0x19   : > { %s292_s4 = sshra.s32 %s129_s2, 4  ;;  %s298_s13 = scalar_lea.hbm %s442_s1, 16  ;;  %s293_s4 = int_to_ptr.hbm [resolvable:$true] %s292_s4 }
  0x1a   : > { %s294_s5 = scalar_lea.hbm %s293_s4, 8  ;;  %p299_p2 = scmp.lt.s32.totalorder %s293_s4, %s442_s1 }
  0x1b   : > { %p295_p13 = scmp.ne.s32.totalorder %s293_s4, %s294_s5  ;;  %p300_p3 = scmp.lt.s32.totalorder %s298_s13, %s294_s5 }
  0x1d   : > { %p296_p0 = pnand %p295_p13, %p395_p5  ;;  %p301_p4 = por %p300_p3, %p299_p2 }
  0x1f   : > { %p297_p1 = pneg %p296_p0 }
  0x21   : > { %p302_p7 = pnand %p301_p4, %p297_p1 }
  0x23   : > { %305 = shalt.err (!%p302_p7)
}
  0x24   : > { %202 = dma.vmem_to_hbm [thread:$0]  (%p395_p5), %s127_s30, 128, %s129_s2, %s114_s3  }
  0x25 PF: > { %p214_p8 = scmp.ge.s32.totalorder %s344_s9, 2  ;;  %s140_s19 = sand.u32 1, %s332_s6  }
  0x26   : > { %s141_s20 = scalar_lea.sflag [#allocation4], %s140_s19 }
  0x27   : > { %p209_p9 = pnand %p214_p8, %p399_p6 }
  0x29   : > { %p210_p10 = pneg %p209_p9 }
  0x2b   : > { %327 = dma.done.wait (%p210_p10), %s141_s20, 128  }
  0x2c   : > { %329 = vsyncadd (%p210_p10), %s141_s20, 4294967168  ;;  %p12_p11 = scmp.ge.s32.totalorder %s382_s12, 4   ;;  %s445_s6 = smov %s336_s7 }
  0x2d   : > { %s446_s7 = smov %s340_s8  ;;  %s447_s8 = smov %s393_s15 }
  0x2e   : > { %s448_s9 = smov %s382_s12  ;;  %14 = sbr.rel (!%p12_p11) target bundleno = 4 (0x4), region = 61 }
  0x33   :  { %147 = vsyncpa [#allocation3], 1 }
  0x34   :  { %149 = vsyncpa [#allocation3 + $0x1], 1 }
  0x35   :  { %150 = vsyncpa [#allocation4], 1 }
  0x36   :  { %152 = vsyncpa [#allocation4 + $0x1], 1 }

// kernel: lstm_model.3
= control target key start
LH: loop header
LB: loop body
LE: loop exit
PB: predicated region body
PF: predicated region fallthrough
CT: control target
= control target key end

     0   :  { %vm33_vm0 = vcmask 261120   ;;  %v1466_v2 = vmov 0.0   ;;  %s1469_s7 = smov 96   ;;  %s1847_s1 = inlined_call_operand.vmem [shape: bf16[32,128], index: 1, kind: input, shape index: {}]   ;;  %s1848_s2 = inlined_call_operand.vmem [shape: bf16[32,128], index: 2, kind: input, shape index: {}]   ;;  %s1849_s3 = inlined_call_operand.vmem [shape: f32[1,128], index: 3, kind: input, shape index: {}]   ;;  %s1850_s0 = inlined_call_operand.vmem [shape: bf16[8,16,32], index: 0, kind: input, shape index: {}]   ;;  %s1851_s4 = inlined_call_operand.vmem [shape: bf16[32,128], index: 4, kind: input, shape index: {}]   ;;  %s1852_s5 = inlined_call_operand.vmem [shape: f32[1,128], index: 5, kind: input, shape index: {}]   ;;  %s1853_s6 = inlined_call_operand.vmem [shape: f32[8,16,128], index: 6, kind: output, shape index: {}]  }
   0x1   :  { %v1323_v0 = vld [vmem:[%s1847_s1 + $0x8] sm:$0xff]  ;;  %34 = vst.msk [vmem:[#allocation2] sm:$0xff] %vm33_vm0, %v1466_v2  ;;  %v1322_v3 = vld [vmem:[%s1847_s1] sm:$0xff]  ;;  %s1467_s1 = smov 32  }
   0x2   :  { %v1511_v1 = vld [vmem:[%s1848_s2 + $0x8] sm:$0xff]  ;;  %35 = vst.msk [vmem:[#allocation2 + $0x8] sm:$0xff] %vm33_vm0, %v1466_v2  ;;  %145 = vmatpush.bf16.msra.mxu0 %v1323_v0  ;;  %v1522_v4 = vld [vmem:[%s1848_s2] sm:$0xff]  ;;  %1327 = vmatpush.bf16.msra.mxu3 %v1323_v0 }
   0x3   :  { %236 = vmatpush.bf16.msra.mxu1 %v1511_v1  ;;  %36 = vst.msk [vmem:[#allocation3] sm:$0xff] %vm33_vm0, %v1466_v2  ;;  %1326 = vmatpush.bf16.msra.mxu2 %v1323_v0  ;;  %v1314_v5 = vld [vmem:[%s1850_s0] sm:$0xff] }
   0x4   :  { %37 = vst.msk [vmem:[#allocation3 + $0x8] sm:$0xff] %vm33_vm0, %v1466_v2  ;;  %v1539_v11 = vld [vmem:[%s1849_s3] ss:$0 sm:$0xff] }
   0x6   :  { %146 = vmatpush.bf16.msra.mxu0 %v1322_v3  ;;  %1329 = vmatpush.bf16.msra.mxu3 %v1322_v3 }
   0x7   :  { %237 = vmatpush.bf16.msra.mxu1 %v1522_v4  ;;  %1328 = vmatpush.bf16.msra.mxu2 %v1322_v3  ;;  %v1321_v3 = vld [vmem:[%s1850_s0 + $0x38] sm:$0xff] }
   0x8   :  { %v208_v6 = vld [vmem:[#allocation2] sm:$0xff] }
   0x9   :  { %v209_v7 = vld [vmem:[#allocation2 + $0x8] sm:$0xff]  ;;  %1242 = vmatmul.msk.bf16.vlgmr.msra.gmra.mxu0 %vm33_vm0, %v1314_v5  ;;  %v1320_v5 = vld [vmem:[%s1850_s0 + $0x30] sm:$0xff]  ;;  %1249 = vmatmul.msk.bf16.vlgmr.msra.gmra.mxu3 %vm33_vm0, %v1321_v3 }
   0xa   :  { %374 = vmatpush.bf16.msrb.mxu3 %v1511_v1  ;;  %v214_v8 = vpack.c.bf16 %v209_v7, %v208_v6  ;;  %v210_v9 = vld [vmem:[#allocation3] sm:$0xff]  ;;  %v1315_v6 = vld [vmem:[%s1850_s0 + $0x8] sm:$0xff]  ;;  %1248 = vmatmul.msk.bf16.vlgmr.msra.gmra.mxu2 %vm33_vm0, %v1320_v5 }
   0xb   :  { %288 = vrot.lane.b32.xlu1 %v210_v9, %s1467_s1  ;;  %v211_v10 = vld [vmem:[#allocation3 + $0x8] sm:$0xff]  ;;  %v1567_v7 = vld [vmem:[%s1851_s4 + $0x8] sm:$0xff] }
   0xc   :  { %1258 = vmatmul.msk.bf16.vlgmr.msra.gmra.mxu1 %vm33_vm0, %v214_v8  ;;  %356 = vmatpush.bf16.msrb.mxu2 %v1567_v7  ;;  %v1576_v8 = vld [vmem:[%s1851_s4] sm:$0xff]  ;;  %s1468_s4 = smov 64  }
   0xd   :  { %471 = vmatpush.bf16.msrb.mxu1 %v1567_v7 }
   0xe   :  { %375 = vmatpush.bf16.msrb.mxu3 %v1522_v4 }
  0x10   :  { %357 = vmatpush.bf16.msrb.mxu2 %v1576_v8 }
  0x11   :  { %472 = vmatpush.bf16.msrb.mxu1 %v1576_v8 }
  0x12   :  { %587 = vmatpush.bf16.msra.mxu3 %v1567_v7 }
  0x13   :  { %290 = vrot.lane.b32.xlu1 %v211_v10, %s1467_s1 }
  0x14   :  { %490 = vmatpush.bf16.msra.mxu2 %v1511_v1 }
  0x15   :  { %606 = vmatpush.bf16.msra.mxu1 %v1511_v1 }
  0x16   :  { %588 = vmatpush.bf16.msra.mxu3 %v1576_v8 }
  0x18   :  { %491 = vmatpush.bf16.msra.mxu2 %v1522_v4 }
  0x19   :  { %1243 = vmatmul.msk.bf16.gmra.mxu0 %vm33_vm0, %v1315_v6  ;;  %607 = vmatpush.bf16.msra.mxu1 %v1522_v4 }
  0x7d   :  { %v289_v56 = vpop.permute.xlu1 %288 }
  0x85   :  { %v291_v60 = vpop.permute.xlu1 %290 }
  0x86   :  { %v148_v12 = vpop.f32.mrf.mxu0 }
  0x87   :  { %v149_v13 = vadd.f32 %v1539_v11, %v148_v12 }
  0x89   :  { %v188_v14 = vpack.c.bf16 %v149_v13, %v149_v13  ;;  %v239_v15 = vpop.f32.mrf.mxu1 }
  0x8b   :  { %v212_v16 = vunpack.c.l.bf16 %v188_v14 }
  0x8d   :  { %v244_v17 = vadd.f32 %v239_v15, %v212_v16  ;;  %v1594_v16 = vpop.f32.mrf.mxu2 }
  0x8e   :  { %v150_v18 = vpop.f32.mrf.mxu0 }
  0x8f   :  { %1336 = vtanh.f32 %v244_v17  ;;  %v151_v19 = vadd.f32 %v1539_v11, %v150_v18  ;;  %v1259_v26 = vmul.f32 -1.442695, %v244_v17  ;;  %v1596_v17 = vpop.f32.mrf.mxu3 }
  0x91   :  { %v189_v20 = vpack.c.bf16 %v151_v19, %v151_v19  ;;  %v241_v22 = vpop.f32.mrf.mxu1 }
  0x93   :  { %v213_v21 = vunpack.c.l.bf16 %v189_v20 }
  0x95   :  { %v1337_v23 = vpop.eup %1336  ;;  %v245_v24 = vadd.f32 %v241_v22, %v213_v21  ;;  %v1599_v20 = vpop.f32.mrf.mxu2 }
  0x96   :  { %298 = vrot.lane.b32.xlu0 %v1337_v23, %s1467_s1  ;;  %v153_v18 = vpop.f32.mrf.mxu0 }
  0x97   :  { %1338 = vtanh.f32 %v245_v24  ;;  %v1260_v27 = vmul.f32 -1.442695, %v245_v24  ;;  %v154_v19 = vadd.f32 %v1539_v11, %v153_v18  ;;  %v1601_v21 = vpop.f32.mrf.mxu3 }
  0x98   :  { %1340 = vpow2.f32 %v1259_v26 }
  0x99   :  { %1342 = vpow2.f32 %v1260_v27  ;;  %v190_v22 = vpack.c.bf16 %v154_v19, %v154_v19 }
  0x9b   :  { %v366_v24 = vunpack.c.l.bf16 %v190_v22 }
  0x9d   :  { %v1339_v25 = vpop.eup %1338 }
  0x9e   :  { %300 = vrot.lane.b32.xlu0 %v1339_v25, %s1467_s1  ;;  %v1341_v28 = vpop.eup %1340  ;;  %v155_v23 = vpop.f32.mrf.mxu0  ;;  %v1606_v25 = vld [vmem:[%s1852_s5] ss:$0 sm:$0xff] }
  0x9f   :  { %v252_v29 = vadd.f32 1.0, %v1341_v28  ;;  %v1343_v30 = vpop.eup %1342  ;;  %v156_v26 = vadd.f32 %v1539_v11, %v155_v23 }
  0xa0   :  { %v253_v31 = vadd.f32 1.0, %v1343_v30 }
  0xa1   :  { %1344 = vrcp.f32 %v252_v29  ;;  %v265_v40 = vand.u32 2147483648, %v252_v29  ;;  %vm259_vm2 = vweird.f32 %v252_v29  ;;  %v263_v41 = vand.u32 2147483647, %v252_v29 }
  0xa2   :  { %1346 = vrcp.f32 %v253_v31  ;;  %v280_v49 = vand.u32 2147483648, %v253_v31  ;;  %vm274_vm6 = vweird.f32 %v253_v31  ;;  %v278_v50 = vand.u32 2147483647, %v253_v31 }
  0xa3   :  { %v266_v44 = vor.u32 1.1754944e-38, %v265_v40  ;;  %vm264_vm4 = vcmp.eq.f32.partialorder %v263_v41, 8.507059e+37 }
  0xa4   :  { %v281_v52 = vor.u32 1.1754944e-38, %v280_v49  ;;  %vm279_vm8 = vcmp.eq.f32.partialorder %v278_v50, 8.507059e+37 }
  0xa7   :  { %v1345_v32 = vpop.eup %1344 }
  0xa8   :  { %v255_v33 = vmul.f32 %v1345_v32, %v252_v29  ;;  %v1347_v35 = vpop.eup %1346  ;;  %vm260_vm1 = vweird.f32 %v1345_v32 }
  0xa9   :  { %v270_v37 = vmul.f32 %v1347_v35, %v253_v31  ;;  %vm261_vm3 = vmor %vm259_vm2, %vm260_vm1  ;;  %vm275_vm5 = vweird.f32 %v1347_v35  ;;  %v191_v31 = vpack.c.bf16 %v156_v26, %v156_v26 }
  0xaa   :  { %v256_v34 = vsub.f32 1.0, %v255_v33  ;;  %vm276_vm7 = vmor %vm274_vm6, %vm275_vm5 }
  0xab   :  { %v271_v39 = vsub.f32 1.0, %v270_v37 }
  0xac   :  { %v257_v36 = vmul.f32 %v1345_v32, %v256_v34 }
  0xad   :  { %v272_v43 = vmul.f32 %v1347_v35, %v271_v39 }
  0xae   :  { %v258_v38 = vadd.f32 %v1345_v32, %v257_v36 }
  0xaf   :  { %v273_v47 = vadd.f32 %v1347_v35, %v272_v43 }
  0xb0   :  { %v262_v42 = vsel %vm261_vm3, %v1345_v32, %v258_v38  ;;  %v367_v32 = vunpack.c.l.bf16 %v191_v31 }
  0xb1   :  { %v267_v45 = vsel %vm264_vm4, %v266_v44, %v262_v42  ;;  %v277_v51 = vsel %vm276_vm7, %v1347_v35, %v273_v47 }
  0xb2   :  { %v282_v53 = vsel %vm279_vm8, %v281_v52, %v277_v51  ;;  %v294_v57 = vmul.f32 %v289_v56, %v267_v45 }
  0xb3   :  { %v295_v61 = vmul.f32 %v291_v60, %v282_v53 }
 0x108   :  { %v299_v46 = vpop.permute.xlu0 %298 }
 0x109   :  { %v304_v48 = vmul.f32 %v299_v46, %v267_v45 }
 0x10b   :  { %308 = vrot.lane.b32.xlu2 %v304_v48, %s1467_s1 }
 0x110   :  { %v301_v54 = vpop.permute.xlu0 %300 }
 0x111   :  { %v305_v55 = vmul.f32 %v301_v54, %v282_v53 }
 0x113   :  { %310 = vrot.lane.b32.xlu2 %v305_v55, %s1467_s1 }
 0x165   :  { %v309_v58 = vpop.permute.xlu2 %308 }
 0x166   :  { %v1547_v59 = vadd.f32 %v309_v58, %v294_v57 }
 0x168   :  { %1348 = vtanh.f32 %v1547_v59 }
 0x16d   :  { %v311_v62 = vpop.permute.xlu2 %310 }
 0x16e   :  { %v1349_v63 = vpop.eup %1348  ;;  %v1550_v0 = vadd.f32 %v311_v62, %v295_v61 }
 0x16f   :  { %320 = vrot.lane.b32.xlu0 %v1349_v63, %s1467_s1 }
 0x170   :  { %1350 = vtanh.f32 %v1550_v0 }
 0x176   :  { %v1351_v2 = vpop.eup %1350 }
 0x177   :  { %322 = vrot.lane.b32.xlu1 %v1351_v2, %s1467_s1 }
 0x1e1   :  { %v321_v9 = vpop.permute.xlu0 %320 }
 0x1e2   :  { %v326_v12 = vmul.f32 %v321_v9, %v267_v45 }
 0x1e9   :  { %v323_v10 = vpop.permute.xlu1 %322 }
 0x1ea   :  { %v327_v13 = vmul.f32 %v323_v10, %v282_v53 }
 0x1ec   :  { %v328_v14 = vpack.c.bf16 %v327_v13, %v326_v12 }
 0x1ee   :  { %333 = vrot.lane.b32.xlu2 %v328_v14, %s1468_s4 }
 0x248   :  { %v334_v15 = vpop.permute.xlu2 %333 }
 0x249   :  { %1269 = vmatmul.msk.bf16.vlgmr.msrb.gmra.mxu2 %vm33_vm0, %v334_v15  ;;  %1270 = vmatmul.msk.bf16.vlgmr.msrb.gmra.mxu3 %vm33_vm0, %v334_v15 }
 0x24a   :  { %722 = vmatpush.bf16.msrb.mxu3 %v1511_v1  ;;  %703 = vmatpush.bf16.msrb.mxu2 %v1567_v7 }
 0x24e   :  { %723 = vmatpush.bf16.msrb.mxu3 %v1522_v4  ;;  %704 = vmatpush.bf16.msrb.mxu2 %v1576_v8 }
 0x2cc   :  { %v359_v27 = vpop.f32.mrf.mxu2  ;;  %v377_v28 = vpop.f32.mrf.mxu3 }
 0x2cd   :  { %v360_v29 = vadd.f32 %v1606_v25, %v359_v27  ;;  %v382_v30 = vadd.f32 %v377_v28, %v366_v24 }
 0x2cf   :  { %364 = vst [vmem:[%s1853_s6] sm:$0xff] %v360_v29  ;;  %1352 = vtanh.f32 %v382_v30  ;;  %v1271_v39 = vmul.f32 -1.442695, %v382_v30 }
 0x2d4   :  { %v361_v33 = vpop.f32.mrf.mxu2  ;;  %v379_v34 = vpop.f32.mrf.mxu3 }
 0x2d5   :  { %v1353_v35 = vpop.eup %1352  ;;  %v362_v36 = vadd.f32 %v1606_v25, %v361_v33  ;;  %v383_v37 = vadd.f32 %v379_v34, %v367_v32 }
 0x2d6   :  { %428 = vrot.lane.b32.xlu0 %v1353_v35, %s1467_s1 }
 0x2d7   :  { %365 = vst [vmem:[%s1853_s6 + $0x8] sm:$0xff] %v362_v36  ;;  %1354 = vtanh.f32 %v383_v37  ;;  %v1272_v40 = vmul.f32 -1.442695, %v383_v37 }
 0x2d8   :  { %1356 = vpow2.f32 %v1271_v39 }
 0x2d9   :  { %1358 = vpow2.f32 %v1272_v40 }
 0x2dd   :  { %v1355_v38 = vpop.eup %1354 }
 0x2de   :  { %430 = vrot.lane.b32.xlu1 %v1355_v38, %s1467_s1  ;;  %v1357_v41 = vpop.eup %1356 }
 0x2df   :  { %v390_v42 = vadd.f32 1.0, %v1357_v41  ;;  %v1359_v43 = vpop.eup %1358 }
 0x2e0   :  { %v391_v44 = vadd.f32 1.0, %v1359_v43 }
 0x2e1   :  { %1360 = vrcp.f32 %v390_v42  ;;  %v403_v53 = vand.u32 2147483648, %v390_v42  ;;  %vm397_vm10 = vweird.f32 %v390_v42  ;;  %v401_v54 = vand.u32 2147483647, %v390_v42 }
 0x2e2   :  { %1362 = vrcp.f32 %v391_v44  ;;  %v418_v63 = vand.u32 2147483648, %v391_v44  ;;  %vm412_vm14 = vweird.f32 %v391_v44  ;;  %v416_v2 = vand.u32 2147483647, %v391_v44 }
 0x2e3   :  { %v404_v57 = vor.u32 1.1754944e-38, %v403_v53  ;;  %vm402_vm12 = vcmp.eq.f32.partialorder %v401_v54, 8.507059e+37 }
 0x2e4   :  { %v419_v5 = vor.u32 1.1754944e-38, %v418_v63  ;;  %vm417_vm1 = vcmp.eq.f32.partialorder %v416_v2, 8.507059e+37 }
 0x2e7   :  { %v1361_v45 = vpop.eup %1360 }
 0x2e8   :  { %v393_v46 = vmul.f32 %v1361_v45, %v390_v42  ;;  %v1363_v48 = vpop.eup %1362  ;;  %vm398_vm9 = vweird.f32 %v1361_v45 }
 0x2e9   :  { %v408_v50 = vmul.f32 %v1363_v48, %v391_v44  ;;  %vm399_vm11 = vmor %vm397_vm10, %vm398_vm9  ;;  %vm413_vm13 = vweird.f32 %v1363_v48 }
 0x2ea   :  { %v394_v47 = vsub.f32 1.0, %v393_v46  ;;  %vm414_vm15 = vmor %vm412_vm14, %vm413_vm13 }
 0x2eb   :  { %v409_v52 = vsub.f32 1.0, %v408_v50 }
 0x2ec   :  { %v395_v49 = vmul.f32 %v1361_v45, %v394_v47 }
 0x2ed   :  { %v410_v56 = vmul.f32 %v1363_v48, %v409_v52 }
 0x2ee   :  { %v396_v51 = vadd.f32 %v1361_v45, %v395_v49 }
 0x2ef   :  { %v411_v62 = vadd.f32 %v1363_v48, %v410_v56 }
 0x2f0   :  { %v400_v55 = vsel %vm399_vm11, %v1361_v45, %v396_v51 }
 0x2f1   :  { %v405_v60 = vsel %vm402_vm12, %v404_v57, %v400_v55  ;;  %v415_v3 = vsel %vm414_vm15, %v1363_v48, %v411_v62 }
 0x2f2   :  { %v420_v9 = vsel %vm417_vm1, %v419_v5, %v415_v3  ;;  %v424_v12 = vmul.f32 %v405_v60, %v1547_v59  ;;  %v1316_v59 = vld [vmem:[%s1850_s0 + $0x10] sm:$0xff] }
 0x2f3   :  { %v425_v18 = vmul.f32 %v420_v9, %v1550_v0  ;;  %1244 = vmatmul.msk.bf16.gmra.mxu0 %vm33_vm0, %v1316_v59 }
 0x348   :  { %v429_v58 = vpop.permute.xlu0 %428 }
 0x349   :  { %v434_v61 = vmul.f32 %v429_v58, %v405_v60 }
 0x34b   :  { %438 = vrot.lane.b32.xlu2 %v434_v61, %s1467_s1 }
 0x350   :  { %v431_v6 = vpop.permute.xlu1 %430 }
 0x351   :  { %v435_v10 = vmul.f32 %v431_v6, %v420_v9 }
 0x353   :  { %440 = vrot.lane.b32.xlu0 %v435_v10, %s1467_s1 }
 0x370   :  { %v158_v30 = vpop.f32.mrf.mxu0 }
 0x371   :  { %v159_v31 = vadd.f32 %v1539_v11, %v158_v30 }
 0x373   :  { %v192_v32 = vpack.c.bf16 %v159_v31, %v159_v31 }
 0x375   :  { %v482_v36 = vunpack.c.l.bf16 %v192_v32 }
 0x378   :  { %v160_v35 = vpop.f32.mrf.mxu0 }
 0x379   :  { %v161_v37 = vadd.f32 %v1539_v11, %v160_v35 }
 0x37b   :  { %v193_v41 = vpack.c.bf16 %v161_v37, %v161_v37 }
 0x37d   :  { %v483_v43 = vunpack.c.l.bf16 %v193_v41 }
 0x3a5   :  { %v439_v13 = vpop.permute.xlu2 %438 }
 0x3a6   :  { %v1622_v14 = vadd.f32 %v439_v13, %v424_v12 }
 0x3a8   :  { %1364 = vtanh.f32 %v1622_v14 }
 0x3ae   :  { %v1365_v15 = vpop.eup %1364 }
 0x3af   :  { %450 = vrot.lane.b32.xlu1 %v1365_v15, %s1467_s1 }
 0x3c5   :  { %v441_v19 = vpop.permute.xlu0 %440 }
 0x3c6   :  { %v1627_v22 = vadd.f32 %v441_v19, %v425_v18 }
 0x3c8   :  { %1366 = vtanh.f32 %v1627_v22 }
 0x3ce   :  { %v1367_v23 = vpop.eup %1366 }
 0x3cf   :  { %452 = vrot.lane.b32.xlu2 %v1367_v23, %s1467_s1 }
 0x421   :  { %v451_v24 = vpop.permute.xlu1 %450 }
 0x422   :  { %v456_v27 = vmul.f32 %v451_v24, %v405_v60 }
 0x429   :  { %v453_v26 = vpop.permute.xlu2 %452 }
 0x42a   :  { %v457_v28 = vmul.f32 %v453_v26, %v420_v9 }
 0x42c   :  { %v458_v29 = vpack.c.bf16 %v457_v28, %v456_v27 }
 0x42e   :  { %460 = vrot.lane.b32.xlu0 %v458_v29, %s1468_s4 }
 0x4a0   :  { %v461_v0 = vpop.permute.xlu0 %460 }
 0x4a1   :  { %1273 = vmatmul.msk.bf16.vlgmr.msrb.gmra.mxu1 %vm33_vm0, %v461_v0  ;;  %1276 = vmatmul.msk.bf16.vlgmr.msra.gmra.mxu2 %vm33_vm0, %v461_v0 }
 0x4a2   :  { %838 = vmatpush.bf16.msra.mxu2 %v1511_v1  ;;  %819 = vmatpush.bf16.msrb.mxu1 %v1567_v7 }
 0x4a6   :  { %839 = vmatpush.bf16.msra.mxu2 %v1522_v4  ;;  %820 = vmatpush.bf16.msrb.mxu1 %v1576_v8 }
 0x51e   :  { %v474_v33 = vpop.f32.mrf.mxu1 }
 0x51f   :  { %v475_v34 = vadd.f32 %v1606_v25, %v474_v33 }
 0x521   :  { %1274 = vst [vmem:[%s1853_s6 + $0x10] sm:$0xff] %v475_v34 }
 0x524   :  { %v493_v38 = vpop.f32.mrf.mxu2 }
 0x525   :  { %v498_v39 = vadd.f32 %v493_v38, %v482_v36 }
 0x526   :  { %v476_v40 = vpop.f32.mrf.mxu1 }
 0x527   :  { %1368 = vtanh.f32 %v498_v39  ;;  %v477_v42 = vadd.f32 %v1606_v25, %v476_v40  ;;  %v1277_v51 = vmul.f32 -1.442695, %v498_v39 }
 0x529   :  { %1275 = vst [vmem:[%s1853_s6 + $0x18] sm:$0xff] %v477_v42 }
 0x52c   :  { %v495_v44 = vpop.f32.mrf.mxu2 }
 0x52d   :  { %v1369_v45 = vpop.eup %1368  ;;  %v499_v46 = vadd.f32 %v495_v44, %v483_v43 }
 0x52e   :  { %544 = vrot.lane.b32.xlu1 %v1369_v45, %s1467_s1 }
 0x52f   :  { %1370 = vtanh.f32 %v499_v46  ;;  %v1278_v48 = vmul.f32 -1.442695, %v499_v46 }
 0x531   :  { %1372 = vpow2.f32 %v1278_v48 }
 0x535   :  { %v1371_v47 = vpop.eup %1370 }
 0x536   :  { %546 = vrot.lane.b32.xlu2 %v1371_v47, %s1467_s1 }
 0x537   :  { %v1373_v49 = vpop.eup %1372 }
 0x538   :  { %v507_v50 = vadd.f32 1.0, %v1373_v49 }
 0x53a   :  { %1374 = vrcp.f32 %v507_v50  ;;  %v534_v61 = vand.u32 2147483648, %v507_v50  ;;  %vm528_vm3 = vweird.f32 %v507_v50  ;;  %v532_v62 = vand.u32 2147483647, %v507_v50 }
 0x53b   :  { %1376 = vpow2.f32 %v1277_v51 }
 0x53c   :  { %v535_v3 = vor.u32 1.1754944e-38, %v534_v61  ;;  %vm533_vm5 = vcmp.eq.f32.partialorder %v532_v62, 8.507059e+37 }
 0x540   :  { %v1375_v52 = vpop.eup %1374 }
 0x541   :  { %v1377_v53 = vpop.eup %1376  ;;  %v524_v54 = vmul.f32 %v1375_v52, %v507_v50  ;;  %vm529_vm2 = vweird.f32 %v1375_v52 }
 0x542   :  { %v506_v55 = vadd.f32 1.0, %v1377_v53  ;;  %vm530_vm4 = vmor %vm528_vm3, %vm529_vm2 }
 0x543   :  { %v525_v56 = vsub.f32 1.0, %v524_v54 }
 0x544   :  { %1378 = vrcp.f32 %v506_v55  ;;  %v519_v15 = vand.u32 2147483648, %v506_v55  ;;  %vm513_vm7 = vweird.f32 %v506_v55  ;;  %v517_v18 = vand.u32 2147483647, %v506_v55 }
 0x545   :  { %v526_v57 = vmul.f32 %v1375_v52, %v525_v56 }
 0x546   :  { %v520_v23 = vor.u32 1.1754944e-38, %v519_v15  ;;  %vm518_vm9 = vcmp.eq.f32.partialorder %v517_v18, 8.507059e+37 }
 0x547   :  { %v527_v58 = vadd.f32 %v1375_v52, %v526_v57 }
 0x549   :  { %v531_v63 = vsel %vm530_vm4, %v1375_v52, %v527_v58 }
 0x54a   :  { %v1379_v60 = vpop.eup %1378  ;;  %v536_v6 = vsel %vm533_vm5, %v535_v3, %v531_v63 }
 0x54b   :  { %v509_v2 = vmul.f32 %v1379_v60, %v506_v55  ;;  %vm514_vm6 = vweird.f32 %v1379_v60  ;;  %v541_v27 = vmul.f32 %v536_v6, %v1627_v22  ;;  %v1317_v22 = vld [vmem:[%s1850_s0 + $0x18] sm:$0xff] }
 0x54c   :  { %vm515_vm8 = vmor %vm513_vm7, %vm514_vm6  ;;  %1245 = vmatmul.msk.bf16.gmra.mxu0 %vm33_vm0, %v1317_v22 }
 0x54d   :  { %v510_v10 = vsub.f32 1.0, %v509_v2 }
 0x54f   :  { %v511_v12 = vmul.f32 %v1379_v60, %v510_v10 }
 0x551   :  { %v512_v13 = vadd.f32 %v1379_v60, %v511_v12 }
 0x553   :  { %v516_v19 = vsel %vm515_vm8, %v1379_v60, %v512_v13 }
 0x554   :  { %v521_v24 = vsel %vm518_vm9, %v520_v23, %v516_v19 }
 0x555   :  { %v540_v30 = vmul.f32 %v521_v24, %v1622_v14 }
 0x590   :  { %v547_v5 = vpop.permute.xlu2 %546 }
 0x591   :  { %v551_v9 = vmul.f32 %v547_v5, %v536_v6 }
 0x593   :  { %556 = vrot.lane.b32.xlu1 %v551_v9, %s1467_s1 }
 0x5a0   :  { %v545_v59 = vpop.permute.xlu1 %544 }
 0x5a1   :  { %v550_v26 = vmul.f32 %v545_v59, %v521_v24 }
 0x5a3   :  { %554 = vrot.lane.b32.xlu0 %v550_v26, %s1467_s1 }
 0x5c9   :  { %v163_v39 = vpop.f32.mrf.mxu0 }
 0x5ca   :  { %v164_v40 = vadd.f32 %v1539_v11, %v163_v39 }
 0x5cc   :  { %v194_v41 = vpack.c.bf16 %v164_v40, %v164_v40 }
 0x5ce   :  { %v598_v43 = vunpack.c.l.bf16 %v194_v41 }
 0x5d1   :  { %v165_v42 = vpop.f32.mrf.mxu0 }
 0x5d2   :  { %v166_v44 = vadd.f32 %v1539_v11, %v165_v42 }
 0x5d4   :  { %v195_v47 = vpack.c.bf16 %v166_v44, %v166_v44 }
 0x5d6   :  { %v599_v49 = vunpack.c.l.bf16 %v195_v47 }
 0x605   :  { %v557_v28 = vpop.permute.xlu1 %556 }
 0x606   :  { %v1657_v29 = vadd.f32 %v557_v28, %v541_v27 }
 0x608   :  { %1380 = vtanh.f32 %v1657_v29 }
 0x60e   :  { %v1381_v0 = vpop.eup %1380 }
 0x60f   :  { %568 = vrot.lane.b32.xlu0 %v1381_v0, %s1467_s1 }
 0x615   :  { %v555_v31 = vpop.permute.xlu0 %554 }
 0x616   :  { %v1662_v32 = vadd.f32 %v555_v31, %v540_v30 }
 0x618   :  { %1382 = vtanh.f32 %v1662_v32 }
 0x61e   :  { %v1383_v33 = vpop.eup %1382 }
 0x61f   :  { %566 = vrot.lane.b32.xlu2 %v1383_v33, %s1467_s1 }
 0x679   :  { %v567_v34 = vpop.permute.xlu2 %566 }
 0x67a   :  { %v572_v36 = vmul.f32 %v567_v34, %v521_v24 }
 0x681   :  { %v569_v35 = vpop.permute.xlu0 %568 }
 0x682   :  { %v573_v37 = vmul.f32 %v569_v35, %v536_v6 }
 0x684   :  { %v574_v38 = vpack.c.bf16 %v573_v37, %v572_v36 }
 0x686   :  { %576 = vrot.lane.b32.xlu1 %v574_v38, %s1468_s4 }
 0x6f8   :  { %v577_v14 = vpop.permute.xlu1 %576 }
 0x6f9   :  { %1279 = vmatmul.msk.bf16.vlgmr.msra.gmra.mxu3 %vm33_vm0, %v577_v14  ;;  %1282 = vmatmul.msk.bf16.vlgmr.msra.gmra.mxu1 %vm33_vm0, %v577_v14 }
 0x6fa   :  { %954 = vmatpush.bf16.msra.mxu1 %v1511_v1  ;;  %935 = vmatpush.bf16.msra.mxu3 %v1567_v7 }
 0x6fe   :  { %955 = vmatpush.bf16.msra.mxu1 %v1522_v4  ;;  %936 = vmatpush.bf16.msra.mxu3 %v1576_v8 }
 0x776   :  { %v609_v45 = vpop.f32.mrf.mxu1 }
 0x777   :  { %v614_v46 = vadd.f32 %v609_v45, %v598_v43 }
 0x779   :  { %1384 = vtanh.f32 %v614_v46  ;;  %v1283_v57 = vmul.f32 -1.442695, %v614_v46 }
 0x77c   :  { %v590_v48 = vpop.f32.mrf.mxu3 }
 0x77d   :  { %v591_v50 = vadd.f32 %v1606_v25, %v590_v48 }
 0x77e   :  { %v611_v51 = vpop.f32.mrf.mxu1 }
 0x77f   :  { %v1385_v52 = vpop.eup %1384  ;;  %1280 = vst [vmem:[%s1853_s6 + $0x20] sm:$0xff] %v591_v50  ;;  %v615_v53 = vadd.f32 %v611_v51, %v599_v49 }
 0x780   :  { %660 = vrot.lane.b32.xlu2 %v1385_v52, %s1467_s1 }
 0x781   :  { %1386 = vtanh.f32 %v615_v53  ;;  %v1284_v2 = vmul.f32 -1.442695, %v615_v53 }
 0x782   :  { %1388 = vpow2.f32 %v1283_v57 }
 0x784   :  { %v592_v54 = vpop.f32.mrf.mxu3 }
 0x785   :  { %v593_v55 = vadd.f32 %v1606_v25, %v592_v54 }
 0x787   :  { %v1387_v56 = vpop.eup %1386  ;;  %1281 = vst [vmem:[%s1853_s6 + $0x28] sm:$0xff] %v593_v55 }
 0x788   :  { %662 = vrot.lane.b32.xlu0 %v1387_v56, %s1467_s1  ;;  %v1389_v58 = vpop.eup %1388 }
 0x789   :  { %v622_v60 = vadd.f32 1.0, %v1389_v58 }
 0x78b   :  { %1390 = vrcp.f32 %v622_v60  ;;  %v635_v6 = vand.u32 2147483648, %v622_v60  ;;  %vm629_vm11 = vweird.f32 %v622_v60  ;;  %v633_v9 = vand.u32 2147483647, %v622_v60 }
 0x78c   :  { %1392 = vpow2.f32 %v1284_v2 }
 0x78d   :  { %v636_v13 = vor.u32 1.1754944e-38, %v635_v6  ;;  %vm634_vm13 = vcmp.eq.f32.partialorder %v633_v9, 8.507059e+37 }
 0x791   :  { %v1391_v61 = vpop.eup %1390 }
 0x792   :  { %v625_v62 = vmul.f32 %v1391_v61, %v622_v60  ;;  %vm630_vm10 = vweird.f32 %v1391_v61  ;;  %v1393_v10 = vpop.eup %1392 }
 0x793   :  { %vm631_vm12 = vmor %vm629_vm11, %vm630_vm10  ;;  %v623_v15 = vadd.f32 1.0, %v1393_v10 }
 0x794   :  { %v626_v63 = vsub.f32 1.0, %v625_v62 }
 0x795   :  { %1394 = vrcp.f32 %v623_v15  ;;  %v650_v0 = vand.u32 2147483648, %v623_v15  ;;  %vm644_vm15 = vweird.f32 %v623_v15  ;;  %v648_v30 = vand.u32 2147483647, %v623_v15 }
 0x796   :  { %v627_v3 = vmul.f32 %v1391_v61, %v626_v63 }
 0x797   :  { %v651_v33 = vor.u32 1.1754944e-38, %v650_v0  ;;  %vm649_vm2 = vcmp.eq.f32.partialorder %v648_v30, 8.507059e+37 }
 0x798   :  { %v628_v5 = vadd.f32 %v1391_v61, %v627_v3 }
 0x79a   :  { %v632_v12 = vsel %vm631_vm12, %v1391_v61, %v628_v5 }
 0x79b   :  { %v637_v19 = vsel %vm634_vm13, %v636_v13, %v632_v12  ;;  %v1395_v59 = vpop.eup %1394 }
 0x79c   :  { %v640_v24 = vmul.f32 %v1395_v59, %v623_v15  ;;  %vm645_vm14 = vweird.f32 %v1395_v59  ;;  %v656_v36 = vmul.f32 %v637_v19, %v1662_v32  ;;  %v1318_v32 = vld [vmem:[%s1850_s0 + $0x20] sm:$0xff] }
 0x79d   :  { %vm646_vm1 = vmor %vm644_vm15, %vm645_vm14  ;;  %1246 = vmatmul.msk.bf16.gmra.mxu0 %vm33_vm0, %v1318_v32 }
 0x79e   :  { %v641_v26 = vsub.f32 1.0, %v640_v24 }
 0x7a0   :  { %v642_v27 = vmul.f32 %v1395_v59, %v641_v26 }
 0x7a2   :  { %v643_v28 = vadd.f32 %v1395_v59, %v642_v27 }
 0x7a4   :  { %v647_v31 = vsel %vm646_vm1, %v1395_v59, %v643_v28 }
 0x7a5   :  { %v652_v34 = vsel %vm649_vm2, %v651_v33, %v647_v31 }
 0x7a6   :  { %v657_v14 = vmul.f32 %v652_v34, %v1657_v29 }
 0x7da   :  { %v661_v18 = vpop.permute.xlu2 %660 }
 0x7db   :  { %v666_v23 = vmul.f32 %v661_v18, %v637_v19 }
 0x7dd   :  { %670 = vrot.lane.b32.xlu1 %v666_v23, %s1467_s1 }
 0x7fa   :  { %v663_v22 = vpop.permute.xlu0 %662 }
 0x7fb   :  { %v667_v35 = vmul.f32 %v663_v22, %v652_v34 }
 0x7fd   :  { %672 = vrot.lane.b32.xlu2 %v667_v35, %s1467_s1 }
 0x81a   :  { %v168_v48 = vpop.f32.mrf.mxu0 }
 0x81b   :  { %v169_v49 = vadd.f32 %v1539_v11, %v168_v48 }
 0x81d   :  { %v196_v50 = vpack.c.bf16 %v169_v49, %v169_v49 }
 0x81f   :  { %v714_v52 = vunpack.c.l.bf16 %v196_v50 }
 0x822   :  { %v170_v51 = vpop.f32.mrf.mxu0 }
 0x823   :  { %v171_v53 = vadd.f32 %v1539_v11, %v170_v51 }
 0x84f   :  { %v671_v37 = vpop.permute.xlu1 %670 }
 0x850   :  { %v1692_v38 = vadd.f32 %v671_v37, %v656_v36 }
 0x852   :  { %1396 = vtanh.f32 %v1692_v38 }
 0x857   :  { %v673_v39 = vpop.permute.xlu2 %672 }
 0x858   :  { %v1397_v40 = vpop.eup %1396  ;;  %v1696_v41 = vadd.f32 %v673_v39, %v657_v14 }
 0x859   :  { %682 = vrot.lane.b32.xlu0 %v1397_v40, %s1467_s1 }
 0x85a   :  { %1398 = vtanh.f32 %v1696_v41 }
 0x860   :  { %v1399_v42 = vpop.eup %1398 }
 0x861   :  { %684 = vrot.lane.b32.xlu1 %v1399_v42, %s1467_s1 }
 0x8cb   :  { %v683_v43 = vpop.permute.xlu0 %682 }
 0x8cc   :  { %v688_v29 = vmul.f32 %v683_v43, %v637_v19 }
 0x8d3   :  { %v685_v44 = vpop.permute.xlu1 %684 }
 0x8d4   :  { %v689_v45 = vmul.f32 %v685_v44, %v652_v34 }
 0x8d6   :  { %v690_v46 = vpack.c.bf16 %v689_v45, %v688_v29 }
 0x8d8   :  { %692 = vrot.lane.b32.xlu2 %v690_v46, %s1468_s4 }
 0x932   :  { %v693_v47 = vpop.permute.xlu2 %692 }
 0x933   :  { %1285 = vmatmul.msk.bf16.vlgmr.msrb.gmra.mxu2 %vm33_vm0, %v693_v47  ;;  %1288 = vmatmul.msk.bf16.vlgmr.msrb.gmra.mxu3 %vm33_vm0, %v693_v47 }
 0x934   :  { %1070 = vmatpush.bf16.msrb.mxu3 %v1511_v1  ;;  %1051 = vmatpush.bf16.msrb.mxu2 %v1567_v7  ;;  %v197_v1 = vpack.c.bf16 %v171_v53, %v171_v53 }
 0x938   :  { %1071 = vmatpush.bf16.msrb.mxu3 %v1522_v4  ;;  %1052 = vmatpush.bf16.msrb.mxu2 %v1576_v8  ;;  %v715_v4 = vunpack.c.l.bf16 %v197_v1 }
 0x9b6   :  { %v706_v54 = vpop.f32.mrf.mxu2  ;;  %v725_v55 = vpop.f32.mrf.mxu3 }
 0x9b7   :  { %v707_v56 = vadd.f32 %v1606_v25, %v706_v54  ;;  %v730_v57 = vadd.f32 %v725_v55, %v714_v52 }
 0x9b9   :  { %1286 = vst [vmem:[%s1853_s6 + $0x30] sm:$0xff] %v707_v56  ;;  %1400 = vtanh.f32 %v730_v57  ;;  %v1289_v3 = vmul.f32 -1.442695, %v730_v57 }
 0x9be   :  { %v708_v58 = vpop.f32.mrf.mxu2  ;;  %v727_v60 = vpop.f32.mrf.mxu3 }
 0x9bf   :  { %v1401_v61 = vpop.eup %1400  ;;  %v709_v62 = vadd.f32 %v1606_v25, %v708_v58  ;;  %v731_v63 = vadd.f32 %v727_v60, %v715_v4 }
 0x9c0   :  { %776 = vrot.lane.b32.xlu0 %v1401_v61, %s1467_s1 }
 0x9c1   :  { %1287 = vst [vmem:[%s1853_s6 + $0x38] sm:$0xff] %v709_v62  ;;  %1402 = vtanh.f32 %v731_v63  ;;  %v1290_v5 = vmul.f32 -1.442695, %v731_v63 }
 0x9c2   :  { %1404 = vpow2.f32 %v1289_v3 }
 0x9c3   :  { %1406 = vpow2.f32 %v1290_v5 }
 0x9c7   :  { %v1403_v2 = vpop.eup %1402 }
 0x9c8   :  { %778 = vrot.lane.b32.xlu1 %v1403_v2, %s1467_s1  ;;  %v1405_v6 = vpop.eup %1404 }
 0x9c9   :  { %v738_v9 = vadd.f32 1.0, %v1405_v6  ;;  %v1407_v10 = vpop.eup %1406 }
 0x9ca   :  { %v739_v12 = vadd.f32 1.0, %v1407_v10 }
 0x9cb   :  { %1408 = vrcp.f32 %v738_v9  ;;  %v751_v27 = vand.u32 2147483648, %v738_v9  ;;  %vm745_vm4 = vweird.f32 %v738_v9  ;;  %v749_v28 = vand.u32 2147483647, %v738_v9 }
 0x9cc   :  { %1410 = vrcp.f32 %v739_v12  ;;  %v766_v36 = vand.u32 2147483648, %v739_v12  ;;  %vm760_vm8 = vweird.f32 %v739_v12  ;;  %v764_v37 = vand.u32 2147483647, %v739_v12 }
 0x9cd   :  { %v752_v31 = vor.u32 1.1754944e-38, %v751_v27  ;;  %vm750_vm6 = vcmp.eq.f32.partialorder %v749_v28, 8.507059e+37 }
 0x9ce   :  { %v767_v39 = vor.u32 1.1754944e-38, %v766_v36  ;;  %vm765_vm10 = vcmp.eq.f32.partialorder %v764_v37, 8.507059e+37 }
 0x9d1   :  { %v1409_v13 = vpop.eup %1408 }
 0x9d2   :  { %v741_v15 = vmul.f32 %v1409_v13, %v738_v9  ;;  %v1411_v19 = vpop.eup %1410  ;;  %vm746_vm3 = vweird.f32 %v1409_v13 }
 0x9d3   :  { %v756_v59 = vmul.f32 %v1411_v19, %v739_v12  ;;  %vm747_vm5 = vmor %vm745_vm4, %vm746_vm3  ;;  %vm761_vm7 = vweird.f32 %v1411_v19 }
 0x9d4   :  { %v742_v18 = vsub.f32 1.0, %v741_v15  ;;  %vm762_vm9 = vmor %vm760_vm8, %vm761_vm7 }
 0x9d5   :  { %v757_v26 = vsub.f32 1.0, %v756_v59 }
 0x9d6   :  { %v743_v23 = vmul.f32 %v1409_v13, %v742_v18 }
 0x9d7   :  { %v758_v30 = vmul.f32 %v1411_v19, %v757_v26 }
 0x9d8   :  { %v744_v24 = vadd.f32 %v1409_v13, %v743_v23 }
 0x9d9   :  { %v759_v35 = vadd.f32 %v1411_v19, %v758_v30 }
 0x9da   :  { %v748_v0 = vsel %vm747_vm5, %v1409_v13, %v744_v24 }
 0x9db   :  { %v753_v22 = vsel %vm750_vm6, %v752_v31, %v748_v0  ;;  %v763_v14 = vsel %vm762_vm9, %v1411_v19, %v759_v35 }
 0x9dc   :  { %v768_v42 = vsel %vm765_vm10, %v767_v39, %v763_v14  ;;  %v772_v43 = vmul.f32 %v753_v22, %v1692_v38  ;;  %v1319_v38 = vld [vmem:[%s1850_s0 + $0x28] sm:$0xff] }
 0x9dd   :  { %v773_v46 = vmul.f32 %v768_v42, %v1696_v41  ;;  %1247 = vmatmul.msk.bf16.gmra.mxu0 %vm33_vm0, %v1319_v38 }
 0xa32   :  { %v777_v33 = vpop.permute.xlu0 %776 }
 0xa33   :  { %v782_v34 = vmul.f32 %v777_v33, %v753_v22 }
 0xa35   :  { %786 = vrot.lane.b32.xlu2 %v782_v34, %s1467_s1 }
 0xa3a   :  { %v779_v40 = vpop.permute.xlu1 %778 }
 0xa3b   :  { %v783_v32 = vmul.f32 %v779_v40, %v768_v42 }
 0xa3d   :  { %788 = vrot.lane.b32.xlu0 %v783_v32, %s1467_s1 }
 0xa5a   :  { %v173_v55 = vpop.f32.mrf.mxu0 }
 0xa5b   :  { %v174_v56 = vadd.f32 %v1539_v11, %v173_v55 }
 0xa5d   :  { %v198_v57 = vpack.c.bf16 %v174_v56, %v174_v56 }
 0xa5f   :  { %v830_v60 = vunpack.c.l.bf16 %v198_v57 }
 0xa62   :  { %v175_v58 = vpop.f32.mrf.mxu0 }
 0xa63   :  { %v176_v61 = vadd.f32 %v1539_v11, %v175_v58 }
 0xa65   :  { %v199_v2 = vpack.c.bf16 %v176_v61, %v176_v61 }
 0xa67   :  { %v831_v3 = vunpack.c.l.bf16 %v199_v2 }
 0xa8f   :  { %v787_v44 = vpop.permute.xlu2 %786 }
 0xa90   :  { %v1727_v29 = vadd.f32 %v787_v44, %v772_v43 }
 0xa92   :  { %1412 = vtanh.f32 %v1727_v29 }
 0xa98   :  { %v1413_v45 = vpop.eup %1412 }
 0xa99   :  { %798 = vrot.lane.b32.xlu1 %v1413_v45, %s1467_s1 }
 0xaaf   :  { %v789_v47 = vpop.permute.xlu0 %788 }
 0xab0   :  { %v1732_v48 = vadd.f32 %v789_v47, %v773_v46 }
 0xab2   :  { %1414 = vtanh.f32 %v1732_v48 }
 0xab8   :  { %v1415_v49 = vpop.eup %1414 }
 0xab9   :  { %800 = vrot.lane.b32.xlu2 %v1415_v49, %s1467_s1 }
 0xb0b   :  { %v799_v50 = vpop.permute.xlu1 %798 }
 0xb0c   :  { %v804_v52 = vmul.f32 %v799_v50, %v753_v22 }
 0xb13   :  { %v801_v51 = vpop.permute.xlu2 %800 }
 0xb14   :  { %v805_v53 = vmul.f32 %v801_v51, %v768_v42 }
 0xb16   :  { %v806_v54 = vpack.c.bf16 %v805_v53, %v804_v52 }
 0xb18   :  { %808 = vrot.lane.b32.xlu0 %v806_v54, %s1468_s4 }
 0xb8a   :  { %v809_v41 = vpop.permute.xlu0 %808 }
 0xb8b   :  { %1291 = vmatmul.msk.bf16.vlgmr.msrb.gmra.mxu1 %vm33_vm0, %v809_v41  ;;  %1294 = vmatmul.msk.bf16.vlgmr.msra.gmra.mxu2 %vm33_vm0, %v809_v41 }
 0xb8c   :  { %1167 = vmatpush.bf16.msrb.mxu1 %v1567_v7 }
 0xb90   :  { %1168 = vmatpush.bf16.msrb.mxu1 %v1576_v8 }
 0xc08   :  { %v822_v1 = vpop.f32.mrf.mxu1 }
 0xc09   :  { %v823_v4 = vadd.f32 %v1606_v25, %v822_v1 }
 0xc0b   :  { %1292 = vst [vmem:[%s1853_s6 + $0x40] sm:$0xff] %v823_v4 }
 0xc0e   :  { %v841_v62 = vpop.f32.mrf.mxu2 }
 0xc0f   :  { %v846_v63 = vadd.f32 %v841_v62, %v830_v60 }
 0xc10   :  { %v824_v7 = vpop.f32.mrf.mxu1 }
 0xc11   :  { %1416 = vtanh.f32 %v846_v63  ;;  %v825_v8 = vadd.f32 %v1606_v25, %v824_v7  ;;  %v1295_v15 = vmul.f32 -1.442695, %v846_v63 }
 0xc13   :  { %1293 = vst [vmem:[%s1853_s6 + $0x48] sm:$0xff] %v825_v8 }
 0xc16   :  { %v843_v5 = vpop.f32.mrf.mxu2 }
 0xc17   :  { %v1417_v6 = vpop.eup %1416  ;;  %v847_v9 = vadd.f32 %v843_v5, %v831_v3 }
 0xc18   :  { %892 = vrot.lane.b32.xlu1 %v1417_v6, %s1467_s1 }
 0xc19   :  { %1418 = vtanh.f32 %v847_v9  ;;  %v1296_v11 = vmul.f32 -1.442695, %v847_v9 }
 0xc1b   :  { %1420 = vpow2.f32 %v1296_v11 }
 0xc1f   :  { %v1419_v10 = vpop.eup %1418 }
 0xc20   :  { %894 = vrot.lane.b32.xlu2 %v1419_v10, %s1467_s1 }
 0xc21   :  { %v1421_v12 = vpop.eup %1420 }
 0xc22   :  { %v855_v13 = vadd.f32 1.0, %v1421_v12 }
 0xc24   :  { %1422 = vrcp.f32 %v855_v13  ;;  %v882_v0 = vand.u32 2147483648, %v855_v13  ;;  %vm876_vm12 = vweird.f32 %v855_v13  ;;  %v880_v30 = vand.u32 2147483647, %v855_v13 }
 0xc25   :  { %1424 = vpow2.f32 %v1295_v15 }
 0xc26   :  { %v883_v22 = vor.u32 1.1754944e-38, %v882_v0  ;;  %vm881_vm14 = vcmp.eq.f32.partialorder %v880_v30, 8.507059e+37 }
 0xc2a   :  { %v1423_v18 = vpop.eup %1422 }
 0xc2b   :  { %v1425_v19 = vpop.eup %1424  ;;  %v872_v23 = vmul.f32 %v1423_v18, %v855_v13  ;;  %vm877_vm11 = vweird.f32 %v1423_v18 }
 0xc2c   :  { %v854_v59 = vadd.f32 1.0, %v1425_v19  ;;  %vm878_vm13 = vmor %vm876_vm12, %vm877_vm11 }
 0xc2d   :  { %v873_v24 = vsub.f32 1.0, %v872_v23 }
 0xc2e   :  { %1426 = vrcp.f32 %v854_v59  ;;  %v867_v40 = vand.u32 2147483648, %v854_v59  ;;  %vm861_vm1 = vweird.f32 %v854_v59  ;;  %v865_v42 = vand.u32 2147483647, %v854_v59 }
 0xc2f   :  { %v874_v26 = vmul.f32 %v1423_v18, %v873_v24 }
 0xc30   :  { %v868_v43 = vor.u32 1.1754944e-38, %v867_v40  ;;  %vm866_vm3 = vcmp.eq.f32.partialorder %v865_v42, 8.507059e+37 }
 0xc31   :  { %v875_v27 = vadd.f32 %v1423_v18, %v874_v26 }
 0xc33   :  { %v879_v31 = vsel %vm878_vm13, %v1423_v18, %v875_v27 }
 0xc34   :  { %v1427_v28 = vpop.eup %1426  ;;  %v884_v35 = vsel %vm881_vm14, %v883_v22, %v879_v31 }
 0xc35   :  { %v857_v33 = vmul.f32 %v1427_v28, %v854_v59  ;;  %vm862_vm15 = vweird.f32 %v1427_v28  ;;  %v889_v47 = vmul.f32 %v884_v35, %v1732_v48 }
 0xc36   :  { %vm863_vm2 = vmor %vm861_vm1, %vm862_vm15 }
 0xc37   :  { %v858_v37 = vsub.f32 1.0, %v857_v33 }
 0xc39   :  { %v859_v14 = vmul.f32 %v1427_v28, %v858_v37 }
 0xc3b   :  { %v860_v39 = vadd.f32 %v1427_v28, %v859_v14 }
 0xc3d   :  { %v864_v32 = vsel %vm863_vm2, %v1427_v28, %v860_v39 }
 0xc3e   :  { %v869_v45 = vsel %vm866_vm3, %v868_v43, %v864_v32 }
 0xc3f   :  { %v888_v51 = vmul.f32 %v869_v45, %v1727_v29  ;;  %v1775_v29 = vld [vmem:[%s1849_s3] ss:$0 sm:$0xff] }
 0xc40   :  { %v179_v4 = vadd.f32 %v1775_v29, %v1594_v16  ;;  %v181_v61 = vadd.f32 %v1775_v29, %v1599_v20 }
 0xc42   :  { %v200_v58 = vpack.c.bf16 %v179_v4, %v179_v4  ;;  %v201_v7 = vpack.c.bf16 %v181_v61, %v181_v61 }
 0xc44   :  { %v946_v60 = vunpack.c.l.bf16 %v200_v58  ;;  %v947_v8 = vunpack.c.l.bf16 %v201_v7 }
 0xc7a   :  { %v895_v34 = vpop.permute.xlu2 %894 }
 0xc7b   :  { %v899_v36 = vmul.f32 %v895_v34, %v884_v35 }
 0xc7d   :  { %904 = vrot.lane.b32.xlu1 %v899_v36, %s1467_s1 }
 0xc8a   :  { %v893_v44 = vpop.permute.xlu1 %892 }
 0xc8b   :  { %v898_v46 = vmul.f32 %v893_v44, %v869_v45 }
 0xc8d   :  { %902 = vrot.lane.b32.xlu0 %v898_v46, %s1467_s1 }
 0xcef   :  { %v905_v49 = vpop.permute.xlu1 %904 }
 0xcf0   :  { %v1760_v38 = vadd.f32 %v905_v49, %v889_v47 }
 0xcf2   :  { %1428 = vtanh.f32 %v1760_v38 }
 0xcf8   :  { %v1429_v50 = vpop.eup %1428 }
 0xcf9   :  { %916 = vrot.lane.b32.xlu0 %v1429_v50, %s1467_s1 }
 0xcff   :  { %v903_v52 = vpop.permute.xlu0 %902 }
 0xd00   :  { %v1765_v53 = vadd.f32 %v903_v52, %v888_v51 }
 0xd02   :  { %1430 = vtanh.f32 %v1765_v53 }
 0xd08   :  { %v1431_v54 = vpop.eup %1430 }
 0xd09   :  { %914 = vrot.lane.b32.xlu2 %v1431_v54, %s1467_s1 }
 0xd63   :  { %v915_v41 = vpop.permute.xlu2 %914 }
 0xd64   :  { %v920_v55 = vmul.f32 %v915_v41, %v869_v45 }
 0xd6b   :  { %v917_v48 = vpop.permute.xlu0 %916 }
 0xd6c   :  { %v921_v56 = vmul.f32 %v917_v48, %v884_v35 }
 0xd6e   :  { %v922_v57 = vpack.c.bf16 %v921_v56, %v920_v55 }
 0xd70   :  { %924 = vrot.lane.b32.xlu1 %v922_v57, %s1468_s4 }
 0xde2   :  { %v925_v1 = vpop.permute.xlu1 %924 }
 0xde3   :  { %1297 = vmatmul.msk.bf16.vlgmr.msra.gmra.mxu3 %vm33_vm0, %v925_v1  ;;  %1300 = vmatmul.msk.bf16.vlgmr.msra.gmra.mxu1 %vm33_vm0, %v925_v1 }
 0xe60   :  { %v957_v62 = vpop.f32.mrf.mxu1 }
 0xe61   :  { %v962_v63 = vadd.f32 %v957_v62, %v946_v60  ;;  %v186_v60 = vadd.f32 %v1775_v29, %v1601_v21 }
 0xe63   :  { %1432 = vtanh.f32 %v962_v63  ;;  %v1301_v11 = vmul.f32 -1.442695, %v962_v63  ;;  %v1813_v63 = vld [vmem:[%s1852_s5] ss:$0 sm:$0xff] }
 0xe66   :  { %v938_v2 = vpop.f32.mrf.mxu3 }
 0xe67   :  { %v939_v3 = vadd.f32 %v1606_v25, %v938_v2 }
 0xe68   :  { %v959_v5 = vpop.f32.mrf.mxu1 }
 0xe69   :  { %v1433_v6 = vpop.eup %1432  ;;  %1298 = vst [vmem:[%s1853_s6 + $0x50] sm:$0xff] %v939_v3  ;;  %v963_v16 = vadd.f32 %v959_v5, %v947_v8  ;;  %v203_v8 = vpack.c.bf16 %v186_v60, %v186_v60 }
 0xe6a   :  { %1008 = vrot.lane.b32.xlu2 %v1433_v6, %s1467_s1 }
 0xe6b   :  { %1434 = vtanh.f32 %v963_v16  ;;  %v1302_v23 = vmul.f32 -1.442695, %v963_v16 }
 0xe6c   :  { %1436 = vpow2.f32 %v1301_v11 }
 0xe6e   :  { %v940_v9 = vpop.f32.mrf.mxu3 }
 0xe6f   :  { %v941_v20 = vadd.f32 %v1606_v25, %v940_v9 }
 0xe71   :  { %v1435_v10 = vpop.eup %1434  ;;  %1299 = vst [vmem:[%s1853_s6 + $0x58] sm:$0xff] %v941_v20 }
 0xe72   :  { %1010 = vrot.lane.b32.xlu0 %v1435_v10, %s1467_s1  ;;  %v1437_v12 = vpop.eup %1436 }
 0xe73   :  { %v970_v13 = vadd.f32 1.0, %v1437_v12 }
 0xe75   :  { %1438 = vrcp.f32 %v970_v13  ;;  %v983_v25 = vand.u32 2147483648, %v970_v13  ;;  %vm977_vm5 = vweird.f32 %v970_v13  ;;  %v981_v26 = vand.u32 2147483647, %v970_v13 }
 0xe76   :  { %1440 = vpow2.f32 %v1302_v23 }
 0xe77   :  { %v984_v0 = vor.u32 1.1754944e-38, %v983_v25  ;;  %vm982_vm7 = vcmp.eq.f32.partialorder %v981_v26, 8.507059e+37 }
 0xe7b   :  { %v1439_v15 = vpop.eup %1438 }
 0xe7c   :  { %v973_v18 = vmul.f32 %v1439_v15, %v970_v13  ;;  %vm978_vm4 = vweird.f32 %v1439_v15  ;;  %v1441_v27 = vpop.eup %1440 }
 0xe7d   :  { %vm979_vm6 = vmor %vm977_vm5, %vm978_vm4  ;;  %v971_v30 = vadd.f32 1.0, %v1441_v27 }
 0xe7e   :  { %v974_v19 = vsub.f32 1.0, %v973_v18 }
 0xe7f   :  { %1442 = vrcp.f32 %v971_v30  ;;  %v998_v39 = vand.u32 2147483648, %v971_v30  ;;  %vm992_vm9 = vweird.f32 %v971_v30  ;;  %v996_v40 = vand.u32 2147483647, %v971_v30 }
 0xe80   :  { %v975_v59 = vmul.f32 %v1439_v15, %v974_v19 }
 0xe81   :  { %v999_v32 = vor.u32 1.1754944e-38, %v998_v39  ;;  %vm997_vm11 = vcmp.eq.f32.partialorder %v996_v40, 8.507059e+37 }
 0xe82   :  { %v976_v24 = vadd.f32 %v1439_v15, %v975_v59 }
 0xe84   :  { %v980_v28 = vsel %vm979_vm6, %v1439_v15, %v976_v24 }
 0xe85   :  { %v985_v33 = vsel %vm982_vm7, %v984_v0, %v980_v28  ;;  %v1443_v34 = vpop.eup %1442 }
 0xe86   :  { %v988_v35 = vmul.f32 %v1443_v34, %v971_v30  ;;  %vm993_vm8 = vweird.f32 %v1443_v34  ;;  %v1004_v46 = vmul.f32 %v985_v33, %v1765_v53 }
 0xe87   :  { %vm994_vm10 = vmor %vm992_vm9, %vm993_vm8 }
 0xe88   :  { %v989_v36 = vsub.f32 1.0, %v988_v35 }
 0xe8a   :  { %v990_v37 = vmul.f32 %v1443_v34, %v989_v36 }
 0xe8c   :  { %v991_v14 = vadd.f32 %v1443_v34, %v990_v37 }
 0xe8e   :  { %v995_v42 = vsel %vm994_vm10, %v1443_v34, %v991_v14 }
 0xe8f   :  { %v1000_v44 = vsel %vm997_vm11, %v999_v32, %v995_v42 }
 0xe90   :  { %v1005_v50 = vmul.f32 %v1000_v44, %v1760_v38  ;;  %v184_v38 = vadd.f32 %v1775_v29, %v1596_v17  ;;  %v1063_v17 = vunpack.c.l.bf16 %v203_v8 }
 0xe92   :  { %v202_v4 = vpack.c.bf16 %v184_v38, %v184_v38 }
 0xe94   :  { %v1062_v58 = vunpack.c.l.bf16 %v202_v4 }
 0xec4   :  { %v1009_v31 = vpop.permute.xlu2 %1008 }
 0xec5   :  { %v1014_v22 = vmul.f32 %v1009_v31, %v985_v33 }
 0xec7   :  { %1018 = vrot.lane.b32.xlu1 %v1014_v22, %s1467_s1 }
 0xee4   :  { %v1011_v43 = vpop.permute.xlu0 %1010 }
 0xee5   :  { %v1015_v45 = vmul.f32 %v1011_v43, %v1000_v44 }
 0xee7   :  { %1020 = vrot.lane.b32.xlu2 %v1015_v45, %s1467_s1 }
 0xf39   :  { %v1019_v47 = vpop.permute.xlu1 %1018 }
 0xf3a   :  { %v1794_v49 = vadd.f32 %v1019_v47, %v1004_v46 }
 0xf3c   :  { %1444 = vtanh.f32 %v1794_v49 }
 0xf41   :  { %v1021_v51 = vpop.permute.xlu2 %1020 }
 0xf42   :  { %v1445_v52 = vpop.eup %1444  ;;  %v1798_v54 = vadd.f32 %v1021_v51, %v1005_v50 }
 0xf43   :  { %1030 = vrot.lane.b32.xlu0 %v1445_v52, %s1467_s1 }
 0xf44   :  { %1446 = vtanh.f32 %v1798_v54 }
 0xf4a   :  { %v1447_v41 = vpop.eup %1446 }
 0xf4b   :  { %1032 = vrot.lane.b32.xlu1 %v1447_v41, %s1467_s1 }
 0xfb5   :  { %v1031_v48 = vpop.permute.xlu0 %1030 }
 0xfb6   :  { %v1036_v55 = vmul.f32 %v1031_v48, %v985_v33 }
 0xfbd   :  { %v1033_v53 = vpop.permute.xlu1 %1032 }
 0xfbe   :  { %v1037_v56 = vmul.f32 %v1033_v53, %v1000_v44 }
 0xfc0   :  { %v1038_v57 = vpack.c.bf16 %v1037_v56, %v1036_v55 }
 0xfc2   :  { %1040 = vrot.lane.b32.xlu2 %v1038_v57, %s1468_s4 }
0x101c   :  { %v1041_v1 = vpop.permute.xlu2 %1040 }
0x101d   :  { %1303 = vmatmul.msk.bf16.vlgmr.msrb.gmra.mxu2 %vm33_vm0, %v1041_v1  ;;  %1306 = vmatmul.msk.bf16.vlgmr.msrb.gmra.mxu3 %vm33_vm0, %v1041_v1 }
0x10a0   :  { %v1054_v61 = vpop.f32.mrf.mxu2  ;;  %v1073_v62 = vpop.f32.mrf.mxu3 }
0x10a1   :  { %v1055_v7 = vadd.f32 %v1813_v63, %v1054_v61  ;;  %v1078_v2 = vadd.f32 %v1073_v62, %v1062_v58 }
0x10a3   :  { %1304 = vst [vmem:[%s1853_s6 + $0x60] sm:$0xff] %v1055_v7  ;;  %1448 = vtanh.f32 %v1078_v2  ;;  %v1307_v9 = vmul.f32 -1.442695, %v1078_v2 }
0x10a8   :  { %v1056_v3 = vpop.f32.mrf.mxu2  ;;  %v1075_v5 = vpop.f32.mrf.mxu3 }
0x10a9   :  { %v1449_v21 = vpop.eup %1448  ;;  %v1057_v29 = vadd.f32 %v1813_v63, %v1056_v3  ;;  %v1079_v6 = vadd.f32 %v1075_v5, %v1063_v17 }
0x10aa   :  { %1124 = vrot.lane.b32.xlu0 %v1449_v21, %s1467_s1 }
0x10ab   :  { %1305 = vst [vmem:[%s1853_s6 + $0x68] sm:$0xff] %v1057_v29  ;;  %1450 = vtanh.f32 %v1079_v6  ;;  %v1308_v20 = vmul.f32 -1.442695, %v1079_v6 }
0x10ac   :  { %1452 = vpow2.f32 %v1307_v9 }
0x10ad   :  { %1454 = vpow2.f32 %v1308_v20 }
0x10b1   :  { %v1451_v16 = vpop.eup %1450 }
0x10b2   :  { %1126 = vrot.lane.b32.xlu1 %v1451_v16, %s1467_s1  ;;  %v1453_v10 = vpop.eup %1452 }
0x10b3   :  { %v1086_v11 = vadd.f32 1.0, %v1453_v10  ;;  %v1455_v12 = vpop.eup %1454 }
0x10b4   :  { %v1087_v13 = vadd.f32 1.0, %v1455_v12 }
0x10b5   :  { %1456 = vrcp.f32 %v1086_v11  ;;  %v1099_v27 = vand.u32 2147483648, %v1086_v11  ;;  %vm1093_vm13 = vweird.f32 %v1086_v11  ;;  %v1097_v28 = vand.u32 2147483647, %v1086_v11 }
0x10b6   :  { %1458 = vrcp.f32 %v1087_v13  ;;  %v1114_v36 = vand.u32 2147483648, %v1087_v13  ;;  %vm1108_vm2 = vweird.f32 %v1087_v13  ;;  %v1112_v37 = vand.u32 2147483647, %v1087_v13 }
0x10b7   :  { %v1100_v31 = vor.u32 1.1754944e-38, %v1099_v27  ;;  %vm1098_vm15 = vcmp.eq.f32.partialorder %v1097_v28, 8.507059e+37 }
0x10b8   :  { %v1115_v39 = vor.u32 1.1754944e-38, %v1114_v36  ;;  %vm1113_vm4 = vcmp.eq.f32.partialorder %v1112_v37, 8.507059e+37 }
0x10bb   :  { %v1457_v15 = vpop.eup %1456 }
0x10bc   :  { %v1089_v18 = vmul.f32 %v1457_v15, %v1086_v11  ;;  %v1459_v23 = vpop.eup %1458  ;;  %vm1094_vm12 = vweird.f32 %v1457_v15 }
0x10bd   :  { %v1104_v24 = vmul.f32 %v1459_v23, %v1087_v13  ;;  %vm1095_vm14 = vmor %vm1093_vm13, %vm1094_vm12  ;;  %vm1109_vm1 = vweird.f32 %v1459_v23 }
0x10be   :  { %v1090_v19 = vsub.f32 1.0, %v1089_v18  ;;  %vm1110_vm3 = vmor %vm1108_vm2, %vm1109_vm1 }
0x10bf   :  { %v1105_v26 = vsub.f32 1.0, %v1104_v24 }
0x10c0   :  { %v1091_v59 = vmul.f32 %v1457_v15, %v1090_v19 }
0x10c1   :  { %v1106_v30 = vmul.f32 %v1459_v23, %v1105_v26 }
0x10c2   :  { %v1092_v25 = vadd.f32 %v1457_v15, %v1091_v59 }
0x10c3   :  { %v1107_v35 = vadd.f32 %v1459_v23, %v1106_v30 }
0x10c4   :  { %v1096_v0 = vsel %vm1095_vm14, %v1457_v15, %v1092_v25 }
0x10c5   :  { %v1101_v22 = vsel %vm1098_vm15, %v1100_v31, %v1096_v0  ;;  %v1111_v14 = vsel %vm1110_vm3, %v1459_v23, %v1107_v35 }
0x10c6   :  { %v1116_v42 = vsel %vm1113_vm4, %v1115_v39, %v1111_v14  ;;  %v1120_v43 = vmul.f32 %v1101_v22, %v1794_v49 }
0x10c7   :  { %v1121_v47 = vmul.f32 %v1116_v42, %v1798_v54 }
0x111c   :  { %v1125_v33 = vpop.permute.xlu0 %1124 }
0x111d   :  { %v1130_v34 = vmul.f32 %v1125_v33, %v1101_v22 }
0x111f   :  { %1134 = vrot.lane.b32.xlu2 %v1130_v34, %s1467_s1 }
0x1124   :  { %v1127_v40 = vpop.permute.xlu1 %1126 }
0x1125   :  { %v1131_v32 = vmul.f32 %v1127_v40, %v1116_v42 }
0x1127   :  { %1136 = vrot.lane.b32.xlu0 %v1131_v32, %s1467_s1 }
0x1179   :  { %v1135_v44 = vpop.permute.xlu2 %1134 }
0x117a   :  { %v1140_v45 = vadd.f32 %v1135_v44, %v1120_v43 }
0x117c   :  { %1460 = vtanh.f32 %v1140_v45 }
0x1182   :  { %v1461_v46 = vpop.eup %1460 }
0x1183   :  { %1146 = vrot.lane.b32.xlu1 %v1461_v46, %s1467_s1 }
0x1199   :  { %v1137_v50 = vpop.permute.xlu0 %1136 }
0x119a   :  { %v1141_v51 = vadd.f32 %v1137_v50, %v1121_v47 }
0x119c   :  { %1462 = vtanh.f32 %v1141_v51 }
0x11a2   :  { %v1463_v52 = vpop.eup %1462 }
0x11a3   :  { %1148 = vrot.lane.b32.xlu2 %v1463_v52, %s1467_s1 }
0x11f5   :  { %v1147_v41 = vpop.permute.xlu1 %1146 }
0x11f6   :  { %v1152_v48 = vmul.f32 %v1147_v41, %v1101_v22 }
0x11f8   :  { %1180 = vrot.lane.b32.xlu1 %v1152_v48, %s1468_s4 }
0x11fd   :  { %v1149_v53 = vpop.permute.xlu2 %1148 }
0x11fe   :  { %v1153_v49 = vmul.f32 %v1149_v53, %v1116_v42 }
0x1200   :  { %v1154_v55 = vpack.c.bf16 %v1153_v49, %v1152_v48  ;;  %1192 = vrot.lane.b32.xlu1 %v1141_v51, %s1469_s7  ;;  %1182 = vrot.lane.b32.xlu2 %v1153_v49, %s1468_s4 }
0x1202   :  { %1156 = vrot.lane.b32.xlu0 %v1154_v55, %s1468_s4 }
0x120a   :  { %1190 = vrot.lane.b32.xlu0 %v1140_v45, %s1469_s7 }
0x125a   :  { %v1183_v54 = vpop.permute.xlu2 %1182 }
0x125b   :  { %1187 = vst.msk [vmem:[#allocation2 + $0x8] sm:$0xff] %vm33_vm0, %v1183_v54 }
0x126a   :  { %v1181_v56 = vpop.permute.xlu1 %1180 }
0x126b   :  { %1186 = vst.msk [vmem:[#allocation2] sm:$0xff] %vm33_vm0, %v1181_v56 }
0x1272   :  { %v1193_v57 = vpop.permute.xlu1 %1192 }
0x1273   :  { %1197 = vst.msk [vmem:[#allocation3 + $0x8] sm:$0xff] %vm33_vm0, %v1193_v57 }
0x1274   :  { %v1157_v1 = vpop.permute.xlu0 %1156 }
0x1275   :  { %1309 = vmatmul.msk.bf16.vlgmr.msrb.gmra.mxu1 %vm33_vm0, %v1157_v1 }
0x127c   :  { %v1191_v38 = vpop.permute.xlu0 %1190 }
0x127d   :  { %1196 = vst.msk [vmem:[#allocation3] sm:$0xff] %vm33_vm0, %v1191_v38 }
0x12f2   :  { %v1170_v4 = vpop.f32.mrf.mxu1 }
0x12f3   :  { %v1171_v58 = vadd.f32 %v1813_v63, %v1170_v4 }
0x12f5   :  { %1310 = vst [vmem:[%s1853_s6 + $0x70] sm:$0xff] %v1171_v58 }
0x12fa   :  { %v1172_v60 = vpop.f32.mrf.mxu1 }
0x12fb   :  { %v1173_v61 = vadd.f32 %v1813_v63, %v1172_v60 }
0x12fd   :  { %1311 = vst [vmem:[%s1853_s6 + $0x78] sm:$0xff] %v1173_v61 }

// kernel: lstm_model.2
= control target key start
LH: loop header
LB: loop body
LE: loop exit
PB: predicated region body
PF: predicated region fallthrough
CT: control target
= control target key end

     0   :  { %vm22_vm0 = vcmask 261120   ;;  %v1374_v2 = vmov 0.0   ;;  %vm95_vm1 = vcmask 130048   ;;  %s1376_s26 = smov 64   ;;  %s1377_s25 = smov 96   ;;  %s1775_s1 = inlined_call_operand.vmem [shape: bf16[16,128], index: 1, kind: input, shape index: {}]   ;;  %s1776_s2 = inlined_call_operand.vmem [shape: bf16[32,128], index: 2, kind: input, shape index: {}]   ;;  %s1777_s0 = inlined_call_operand.vmem [shape: bf16[8,16,16], index: 0, kind: input, shape index: {}]   ;;  %s1778_s3 = inlined_call_operand.vmem [shape: f32[1,128], index: 3, kind: input, shape index: {}]   ;;  %s1779_s4 = inlined_call_operand.vmem [shape: bf16[8,16,32], index: 4, kind: output, shape index: {}]  }
   0x1   :  { %v1236_v0 = vld [vmem:[%s1775_s1] sm:$0xff]  ;;  %v1409_v1 = vld [vmem:[%s1776_s2 + $0x8] sm:$0xff]  ;;  %23 = vst.msk [vmem:[#allocation2] sm:$0xff] %vm22_vm0, %v1374_v2 }
   0x2   :  { %v1228_v3 = vld [vmem:[%s1777_s0] sm:$0xff]  ;;  %24 = vst.msk [vmem:[#allocation2 + $0x8] sm:$0xff] %vm22_vm0, %v1374_v2  ;;  %127 = vmatpush.bf16.msra.mxu0 %v1236_v0  ;;  %218 = vmatpush.bf16.msra.mxu1 %v1409_v1 }
   0x3   :  { %v1420_v4 = vld [vmem:[%s1776_s2] sm:$0xff]  ;;  %25 = vst.msk [vmem:[#allocation3] sm:$0xff] %vm22_vm0, %v1374_v2  ;;  %339 = vmatpush.bf16.msra.mxu2 %v1409_v1  ;;  %1239 = vmatpush.bf16.msra.mxu3 %v1236_v0  ;;  %s1375_s2 = smov 32  }
   0x4   :  { %26 = vst.msk [vmem:[#allocation3 + $0x8] sm:$0xff] %vm22_vm0, %v1374_v2  ;;  %v1442_v10 = vld [vmem:[%s1778_s3] ss:$0 sm:$0xff]  ;;  %v1229_v2 = vld [vmem:[%s1777_s0 + $0x8] sm:$0xff] }
   0x5   :  { %1174 = vmatmul.msk.bf16.vlgmr.msra.gmra.mxu0 %vm95_vm1, %v1228_v3 }
   0x6   :  { %219 = vmatpush.bf16.msra.mxu1 %v1420_v4 }
   0x7   :  { %452 = vmatpush.bf16.msrb.mxu3 %v1409_v1  ;;  %340 = vmatpush.bf16.msra.mxu2 %v1420_v4 }
   0x8   :  { %v189_v5 = vld [vmem:[#allocation2] sm:$0xff] }
   0x9   :  { %v190_v6 = vld [vmem:[#allocation2 + $0x8] sm:$0xff] }
   0xa   :  { %565 = vmatpush.bf16.msrb.mxu1 %v1409_v1  ;;  %v195_v7 = vpack.c.bf16 %v190_v6, %v189_v5  ;;  %v191_v8 = vld [vmem:[#allocation3] sm:$0xff] }
   0xb   :  { %453 = vmatpush.bf16.msrb.mxu3 %v1420_v4  ;;  %678 = vmatpush.bf16.msrb.mxu2 %v1409_v1  ;;  %v192_v9 = vld [vmem:[#allocation3 + $0x8] sm:$0xff] }
   0xc   :  { %270 = vrot.lane.b32.xlu1 %v191_v8, %s1375_s2  ;;  %1190 = vmatmul.msk.bf16.vlgmr.msra.gmra.mxu1 %vm22_vm0, %v195_v7 }
   0xe   :  { %566 = vmatpush.bf16.msrb.mxu1 %v1420_v4 }
   0xf   :  { %679 = vmatpush.bf16.msrb.mxu2 %v1420_v4 }
  0x12   :  { %904 = vmatpush.bf16.msra.mxu1 %v1409_v1 }
  0x14   :  { %272 = vrot.lane.b32.xlu1 %v192_v9, %s1375_s2 }
  0x15   :  { %1175 = vmatmul.msk.bf16.gmra.mxu0 %vm95_vm1, %v1229_v2 }
  0x16   :  { %905 = vmatpush.bf16.msra.mxu1 %v1420_v4 }
  0x7e   :  { %v271_v55 = vpop.permute.xlu1 %270 }
  0x82   :  { %v129_v11 = vpop.f32.mrf.mxu0 }
  0x83   :  { %v130_v12 = vadd.f32 %v1442_v10, %v129_v11 }
  0x85   :  { %v169_v13 = vpack.c.bf16 %v130_v12, %v130_v12 }
  0x86   :  { %v273_v59 = vpop.permute.xlu1 %272 }
  0x87   :  { %v193_v14 = vunpack.c.l.bf16 %v169_v13 }
  0x89   :  { %v221_v15 = vpop.f32.mrf.mxu1 }
  0x8a   :  { %v226_v16 = vadd.f32 %v221_v15, %v193_v14  ;;  %v131_v17 = vpop.f32.mrf.mxu0 }
  0x8b   :  { %v132_v18 = vadd.f32 %v1442_v10, %v131_v17 }
  0x8c   :  { %1245 = vtanh.f32 %v226_v16  ;;  %v1191_v25 = vmul.f32 -1.442695, %v226_v16 }
  0x8d   :  { %v170_v19 = vpack.c.bf16 %v132_v18, %v132_v18 }
  0x8f   :  { %v194_v20 = vunpack.c.l.bf16 %v170_v19 }
  0x91   :  { %v223_v21 = vpop.f32.mrf.mxu1 }
  0x92   :  { %v1246_v22 = vpop.eup %1245  ;;  %v227_v23 = vadd.f32 %v223_v21, %v194_v20  ;;  %v134_v15 = vpop.f32.mrf.mxu0 }
  0x93   :  { %280 = vrot.lane.b32.xlu0 %v1246_v22, %s1375_s2  ;;  %v135_v16 = vadd.f32 %v1442_v10, %v134_v15 }
  0x94   :  { %1247 = vtanh.f32 %v227_v23  ;;  %v1192_v26 = vmul.f32 -1.442695, %v227_v23 }
  0x95   :  { %1249 = vpow2.f32 %v1191_v25  ;;  %v171_v17 = vpack.c.bf16 %v135_v16, %v135_v16 }
  0x96   :  { %1251 = vpow2.f32 %v1192_v26 }
  0x97   :  { %v323_v19 = vunpack.c.l.bf16 %v171_v17 }
  0x9a   :  { %v1248_v24 = vpop.eup %1247  ;;  %v136_v18 = vpop.f32.mrf.mxu0 }
  0x9b   :  { %282 = vrot.lane.b32.xlu0 %v1248_v24, %s1375_s2  ;;  %v1250_v27 = vpop.eup %1249  ;;  %v137_v20 = vadd.f32 %v1442_v10, %v136_v18 }
  0x9c   :  { %v234_v28 = vadd.f32 1.0, %v1250_v27  ;;  %v1252_v29 = vpop.eup %1251 }
  0x9d   :  { %v235_v30 = vadd.f32 1.0, %v1252_v29  ;;  %v172_v23 = vpack.c.bf16 %v137_v20, %v137_v20 }
  0x9e   :  { %1253 = vrcp.f32 %v234_v28  ;;  %v247_v39 = vand.u32 2147483648, %v234_v28  ;;  %vm241_vm3 = vweird.f32 %v234_v28  ;;  %v245_v40 = vand.u32 2147483647, %v234_v28 }
  0x9f   :  { %1255 = vrcp.f32 %v235_v30  ;;  %v262_v48 = vand.u32 2147483648, %v235_v30  ;;  %vm256_vm7 = vweird.f32 %v235_v30  ;;  %v260_v49 = vand.u32 2147483647, %v235_v30 }
  0xa0   :  { %v248_v43 = vor.u32 1.1754944e-38, %v247_v39  ;;  %vm246_vm5 = vcmp.eq.f32.partialorder %v245_v40, 8.507059e+37  ;;  %v324_v24 = vunpack.c.l.bf16 %v172_v23 }
  0xa1   :  { %v263_v51 = vor.u32 1.1754944e-38, %v262_v48  ;;  %vm261_vm9 = vcmp.eq.f32.partialorder %v260_v49, 8.507059e+37 }
  0xa4   :  { %v1254_v31 = vpop.eup %1253 }
  0xa5   :  { %v237_v32 = vmul.f32 %v1254_v31, %v234_v28  ;;  %v1256_v34 = vpop.eup %1255  ;;  %vm242_vm2 = vweird.f32 %v1254_v31 }
  0xa6   :  { %v252_v36 = vmul.f32 %v1256_v34, %v235_v30  ;;  %vm243_vm4 = vmor %vm241_vm3, %vm242_vm2  ;;  %vm257_vm6 = vweird.f32 %v1256_v34 }
  0xa7   :  { %v238_v33 = vsub.f32 1.0, %v237_v32  ;;  %vm258_vm8 = vmor %vm256_vm7, %vm257_vm6 }
  0xa8   :  { %v253_v38 = vsub.f32 1.0, %v252_v36 }
  0xa9   :  { %v239_v35 = vmul.f32 %v1254_v31, %v238_v33 }
  0xaa   :  { %v254_v42 = vmul.f32 %v1256_v34, %v253_v38 }
  0xab   :  { %v240_v37 = vadd.f32 %v1254_v31, %v239_v35 }
  0xac   :  { %v255_v46 = vadd.f32 %v1256_v34, %v254_v42 }
  0xad   :  { %v244_v41 = vsel %vm243_vm4, %v1254_v31, %v240_v37 }
  0xae   :  { %v249_v44 = vsel %vm246_vm5, %v248_v43, %v244_v41  ;;  %v259_v50 = vsel %vm258_vm8, %v1256_v34, %v255_v46 }
  0xaf   :  { %v264_v52 = vsel %vm261_vm9, %v263_v51, %v259_v50  ;;  %v276_v56 = vmul.f32 %v271_v55, %v249_v44 }
  0xb0   :  { %v277_v60 = vmul.f32 %v273_v59, %v264_v52 }
 0x105   :  { %v281_v45 = vpop.permute.xlu0 %280 }
 0x106   :  { %v286_v47 = vmul.f32 %v281_v45, %v249_v44 }
 0x108   :  { %290 = vrot.lane.b32.xlu2 %v286_v47, %s1375_s2 }
 0x10d   :  { %v283_v53 = vpop.permute.xlu0 %282 }
 0x10e   :  { %v287_v54 = vmul.f32 %v283_v53, %v264_v52 }
 0x110   :  { %292 = vrot.lane.b32.xlu2 %v287_v54, %s1375_s2 }
 0x162   :  { %v291_v57 = vpop.permute.xlu2 %290 }
 0x163   :  { %v1450_v58 = vadd.f32 %v291_v57, %v276_v56 }
 0x165   :  { %1257 = vtanh.f32 %v1450_v58 }
 0x16a   :  { %v293_v61 = vpop.permute.xlu2 %292 }
 0x16b   :  { %v1258_v62 = vpop.eup %1257  ;;  %v1453_v63 = vadd.f32 %v293_v61, %v277_v60 }
 0x16c   :  { %302 = vrot.lane.b32.xlu0 %v1258_v62, %s1375_s2 }
 0x16d   :  { %1259 = vtanh.f32 %v1453_v63 }
 0x173   :  { %v1260_v0 = vpop.eup %1259 }
 0x174   :  { %304 = vrot.lane.b32.xlu1 %v1260_v0, %s1375_s2 }
 0x1de   :  { %v303_v3 = vpop.permute.xlu0 %302 }
 0x1df   :  { %v308_v5 = vmul.f32 %v303_v3, %v249_v44 }
 0x1e1   :  { %v1462_v7 = vpack.c.bf16 %v308_v5, %v308_v5 }
 0x1e3   :  { %v325_v11 = vunpack.c.l.b16 %v1462_v7 }
 0x1e6   :  { %v305_v6 = vpop.permute.xlu1 %304 }
 0x1e7   :  { %v309_v8 = vmul.f32 %v305_v6, %v264_v52 }
 0x1e9   :  { %v1464_v9 = vpack.c.bf16 %v309_v8, %v309_v8  ;;  %v1230_v8 = vld [vmem:[%s1777_s0 + $0x10] sm:$0xff] }
 0x1ea   :  { %1176 = vmatmul.msk.bf16.gmra.mxu0 %vm95_vm1, %v1230_v8 }
 0x1eb   :  { %v326_v12 = vunpack.c.l.b16 %v1464_v9 }
 0x1ed   :  { %v327_v13 = vpack.c.b16 %v326_v12, %v325_v11 }
 0x1ef   :  { %328 = vrot.lane.b32.xlu2 %v327_v13, %s1376_s26 }
 0x249   :  { %v329_v14 = vpop.permute.xlu2 %328 }
 0x24a   :  { %1193 = vmatmul.msk.bf16.vlgmr.msra.gmra.mxu2 %vm22_vm0, %v329_v14 }
 0x24b   :  { %1017 = vmatpush.bf16.msra.mxu2 %v1409_v1 }
 0x24f   :  { %1018 = vmatpush.bf16.msra.mxu2 %v1420_v4 }
 0x2cd   :  { %v342_v21 = vpop.f32.mrf.mxu2 }
 0x2ce   :  { %v347_v22 = vadd.f32 %v342_v21, %v323_v19 }
 0x2d0   :  { %1261 = vtanh.f32 %v347_v22  ;;  %v1194_v29 = vmul.f32 -1.442695, %v347_v22 }
 0x2d5   :  { %v344_v25 = vpop.f32.mrf.mxu2 }
 0x2d6   :  { %v1262_v26 = vpop.eup %1261  ;;  %v348_v27 = vadd.f32 %v344_v25, %v324_v24  ;;  %v139_v25 = vpop.f32.mrf.mxu0 }
 0x2d7   :  { %393 = vrot.lane.b32.xlu0 %v1262_v26, %s1375_s2  ;;  %v140_v26 = vadd.f32 %v1442_v10, %v139_v25 }
 0x2d8   :  { %1263 = vtanh.f32 %v348_v27  ;;  %v1195_v30 = vmul.f32 -1.442695, %v348_v27 }
 0x2d9   :  { %1265 = vpow2.f32 %v1194_v29 }
 0x2da   :  { %1267 = vpow2.f32 %v1195_v30 }
 0x2de   :  { %v1264_v28 = vpop.eup %1263  ;;  %v141_v29 = vpop.f32.mrf.mxu0 }
 0x2df   :  { %395 = vrot.lane.b32.xlu1 %v1264_v28, %s1375_s2  ;;  %v1266_v31 = vpop.eup %1265  ;;  %v173_v28 = vpack.c.bf16 %v140_v26, %v140_v26 }
 0x2e0   :  { %v355_v32 = vadd.f32 1.0, %v1266_v31  ;;  %v1268_v33 = vpop.eup %1267  ;;  %v142_v31 = vadd.f32 %v1442_v10, %v141_v29 }
 0x2e1   :  { %v356_v34 = vadd.f32 1.0, %v1268_v33  ;;  %v436_v30 = vunpack.c.l.bf16 %v173_v28 }
 0x2e2   :  { %1269 = vrcp.f32 %v355_v32  ;;  %v368_v43 = vand.u32 2147483648, %v355_v32  ;;  %vm362_vm11 = vweird.f32 %v355_v32  ;;  %v366_v44 = vand.u32 2147483647, %v355_v32 }
 0x2e3   :  { %1271 = vrcp.f32 %v356_v34  ;;  %v383_v52 = vand.u32 2147483648, %v356_v34  ;;  %vm377_vm15 = vweird.f32 %v356_v34  ;;  %v381_v53 = vand.u32 2147483647, %v356_v34 }
 0x2e4   :  { %v369_v47 = vor.u32 1.1754944e-38, %v368_v43  ;;  %vm367_vm13 = vcmp.eq.f32.partialorder %v366_v44, 8.507059e+37 }
 0x2e5   :  { %v384_v55 = vor.u32 1.1754944e-38, %v383_v52  ;;  %vm382_vm3 = vcmp.eq.f32.partialorder %v381_v53, 8.507059e+37 }
 0x2e8   :  { %v1270_v35 = vpop.eup %1269 }
 0x2e9   :  { %v358_v36 = vmul.f32 %v1270_v35, %v355_v32  ;;  %v1272_v38 = vpop.eup %1271  ;;  %vm363_vm10 = vweird.f32 %v1270_v35 }
 0x2ea   :  { %v373_v40 = vmul.f32 %v1272_v38, %v356_v34  ;;  %vm364_vm12 = vmor %vm362_vm11, %vm363_vm10  ;;  %vm378_vm14 = vweird.f32 %v1272_v38  ;;  %v174_v34 = vpack.c.bf16 %v142_v31, %v142_v31 }
 0x2eb   :  { %v359_v37 = vsub.f32 1.0, %v358_v36  ;;  %vm379_vm2 = vmor %vm377_vm15, %vm378_vm14 }
 0x2ec   :  { %v374_v42 = vsub.f32 1.0, %v373_v40 }
 0x2ed   :  { %v360_v39 = vmul.f32 %v1270_v35, %v359_v37 }
 0x2ee   :  { %v375_v46 = vmul.f32 %v1272_v38, %v374_v42 }
 0x2ef   :  { %v361_v41 = vadd.f32 %v1270_v35, %v360_v39 }
 0x2f0   :  { %v376_v51 = vadd.f32 %v1272_v38, %v375_v46 }
 0x2f1   :  { %v365_v45 = vsel %vm364_vm12, %v1270_v35, %v361_v41  ;;  %v437_v35 = vunpack.c.l.bf16 %v174_v34 }
 0x2f2   :  { %v370_v49 = vsel %vm367_vm13, %v369_v47, %v365_v45  ;;  %v380_v54 = vsel %vm379_vm2, %v1272_v38, %v376_v51 }
 0x2f3   :  { %v385_v57 = vsel %vm382_vm3, %v384_v55, %v380_v54  ;;  %v389_v60 = vmul.f32 %v370_v49, %v1450_v58  ;;  %v1233_v58 = vld [vmem:[%s1777_s0 + $0x28] sm:$0xff] }
 0x2f4   :  { %v390_v2 = vmul.f32 %v385_v57, %v1453_v63  ;;  %1179 = vmatmul.msk.bf16.vlgmr.msra.gmra.mxu3 %vm95_vm1, %v1233_v58  ;;  %v1234_v63 = vld [vmem:[%s1777_s0 + $0x30] sm:$0xff] }
 0x2f5   :  { %791 = vmatpush.bf16.msra.mxu3 %v1409_v1 }
 0x2f9   :  { %792 = vmatpush.bf16.msra.mxu3 %v1420_v4  ;;  %v1235_v4 = vld [vmem:[%s1777_s0 + $0x38] sm:$0xff] }
 0x304   :  { %1180 = vmatmul.msk.bf16.gmra.mxu3 %vm95_vm1, %v1234_v63 }
 0x314   :  { %1181 = vmatmul.msk.bf16.gmra.mxu3 %vm95_vm1, %v1235_v4 }
 0x349   :  { %v394_v48 = vpop.permute.xlu0 %393 }
 0x34a   :  { %v399_v50 = vmul.f32 %v394_v48, %v370_v49 }
 0x34c   :  { %403 = vrot.lane.b32.xlu2 %v399_v50, %s1375_s2 }
 0x351   :  { %v396_v56 = vpop.permute.xlu1 %395 }
 0x352   :  { %v400_v59 = vmul.f32 %v396_v56, %v385_v57 }
 0x354   :  { %405 = vrot.lane.b32.xlu0 %v400_v59, %s1375_s2 }
 0x377   :  { %v1514_v20 = vpop.f32.mrf.mxu3 }
 0x37f   :  { %v1516_v21 = vpop.f32.mrf.mxu3 }
 0x387   :  { %v1518_v22 = vpop.f32.mrf.mxu3 }
 0x38f   :  { %v1520_v23 = vpop.f32.mrf.mxu3 }
 0x397   :  { %v1522_v24 = vpop.f32.mrf.mxu3 }
 0x39f   :  { %v1525_v27 = vpop.f32.mrf.mxu3 }
 0x3a6   :  { %v404_v61 = vpop.permute.xlu2 %403 }
 0x3a7   :  { %v1479_v62 = vadd.f32 %v404_v61, %v389_v60 }
 0x3a9   :  { %1273 = vtanh.f32 %v1479_v62 }
 0x3af   :  { %v1274_v0 = vpop.eup %1273 }
 0x3b0   :  { %415 = vrot.lane.b32.xlu1 %v1274_v0, %s1375_s2 }
 0x3c6   :  { %v406_v3 = vpop.permute.xlu0 %405 }
 0x3c7   :  { %v1484_v5 = vadd.f32 %v406_v3, %v390_v2 }
 0x3c9   :  { %1275 = vtanh.f32 %v1484_v5 }
 0x3cf   :  { %v1276_v6 = vpop.eup %1275 }
 0x3d0   :  { %417 = vrot.lane.b32.xlu2 %v1276_v6, %s1375_s2 }
 0x422   :  { %v416_v11 = vpop.permute.xlu1 %415 }
 0x423   :  { %v421_v12 = vmul.f32 %v416_v11, %v370_v49 }
 0x425   :  { %v1502_v14 = vpack.c.bf16 %v421_v12, %v421_v12 }
 0x427   :  { %v438_v1 = vunpack.c.l.b16 %v1502_v14 }
 0x42a   :  { %v418_v13 = vpop.permute.xlu2 %417 }
 0x42b   :  { %v422_v15 = vmul.f32 %v418_v13, %v385_v57 }
 0x42d   :  { %v1504_v16 = vpack.c.bf16 %v422_v15, %v422_v15 }
 0x42f   :  { %v439_v17 = vunpack.c.l.b16 %v1504_v16 }
 0x431   :  { %v440_v18 = vpack.c.b16 %v439_v17, %v438_v1 }
 0x433   :  { %441 = vrot.lane.b32.xlu0 %v440_v18, %s1376_s26 }
 0x4a5   :  { %v442_v19 = vpop.permute.xlu0 %441 }
 0x4a6   :  { %1198 = vmatmul.msk.bf16.vlgmr.msrb.gmra.mxu3 %vm22_vm0, %v442_v19 }
 0x529   :  { %v455_v32 = vpop.f32.mrf.mxu3 }
 0x52a   :  { %v460_v33 = vadd.f32 %v455_v32, %v436_v30 }
 0x52c   :  { %1277 = vtanh.f32 %v460_v33  ;;  %v1199_v43 = vmul.f32 -1.442695, %v460_v33 }
 0x531   :  { %v457_v36 = vpop.f32.mrf.mxu3 }
 0x532   :  { %v1278_v37 = vpop.eup %1277  ;;  %v461_v38 = vadd.f32 %v457_v36, %v437_v35 }
 0x533   :  { %506 = vrot.lane.b32.xlu1 %v1278_v37, %s1375_s2 }
 0x534   :  { %1279 = vtanh.f32 %v461_v38  ;;  %v1200_v40 = vmul.f32 -1.442695, %v461_v38 }
 0x536   :  { %1281 = vpow2.f32 %v1200_v40 }
 0x53a   :  { %v1280_v39 = vpop.eup %1279 }
 0x53b   :  { %508 = vrot.lane.b32.xlu2 %v1280_v39, %s1375_s2 }
 0x53c   :  { %v1282_v41 = vpop.eup %1281 }
 0x53d   :  { %v469_v42 = vadd.f32 1.0, %v1282_v41 }
 0x53f   :  { %1283 = vrcp.f32 %v469_v42  ;;  %v496_v52 = vand.u32 2147483648, %v469_v42  ;;  %vm490_vm5 = vweird.f32 %v469_v42  ;;  %v494_v53 = vand.u32 2147483647, %v469_v42 }
 0x540   :  { %1285 = vpow2.f32 %v1199_v43 }
 0x541   :  { %v497_v56 = vor.u32 1.1754944e-38, %v496_v52  ;;  %vm495_vm7 = vcmp.eq.f32.partialorder %v494_v53, 8.507059e+37 }
 0x545   :  { %v1284_v44 = vpop.eup %1283 }
 0x546   :  { %v1286_v45 = vpop.eup %1285  ;;  %v486_v46 = vmul.f32 %v1284_v44, %v469_v42  ;;  %vm491_vm4 = vweird.f32 %v1284_v44 }
 0x547   :  { %v468_v47 = vadd.f32 1.0, %v1286_v45  ;;  %vm492_vm6 = vmor %vm490_vm5, %vm491_vm4 }
 0x548   :  { %v487_v48 = vsub.f32 1.0, %v486_v46 }
 0x549   :  { %1287 = vrcp.f32 %v468_v47  ;;  %v481_v3 = vand.u32 2147483648, %v468_v47  ;;  %vm475_vm9 = vweird.f32 %v468_v47  ;;  %v479_v6 = vand.u32 2147483647, %v468_v47 }
 0x54a   :  { %v488_v49 = vmul.f32 %v1284_v44, %v487_v48 }
 0x54b   :  { %v482_v8 = vor.u32 1.1754944e-38, %v481_v3  ;;  %vm480_vm11 = vcmp.eq.f32.partialorder %v479_v6, 8.507059e+37 }
 0x54c   :  { %v489_v50 = vadd.f32 %v1284_v44, %v488_v49 }
 0x54e   :  { %v493_v54 = vsel %vm492_vm6, %v1284_v44, %v489_v50 }
 0x54f   :  { %v1288_v51 = vpop.eup %1287  ;;  %v498_v59 = vsel %vm495_vm7, %v497_v56, %v493_v54 }
 0x550   :  { %v471_v55 = vmul.f32 %v1288_v51, %v468_v47  ;;  %vm476_vm8 = vweird.f32 %v1288_v51  ;;  %v503_v13 = vmul.f32 %v498_v59, %v1484_v5  ;;  %v1231_v5 = vld [vmem:[%s1777_s0 + $0x18] sm:$0xff] }
 0x551   :  { %vm477_vm10 = vmor %vm475_vm9, %vm476_vm8  ;;  %1177 = vmatmul.msk.bf16.gmra.mxu0 %vm95_vm1, %v1231_v5 }
 0x552   :  { %v472_v61 = vsub.f32 1.0, %v471_v55 }
 0x554   :  { %v473_v0 = vmul.f32 %v1288_v51, %v472_v61 }
 0x556   :  { %v474_v2 = vadd.f32 %v1288_v51, %v473_v0 }
 0x558   :  { %v478_v58 = vsel %vm477_vm10, %v1288_v51, %v474_v2 }
 0x559   :  { %v483_v11 = vsel %vm480_vm11, %v482_v8, %v478_v58 }
 0x55a   :  { %v502_v18 = vmul.f32 %v483_v11, %v1479_v62 }
 0x595   :  { %v509_v57 = vpop.permute.xlu2 %508 }
 0x596   :  { %v513_v60 = vmul.f32 %v509_v57, %v498_v59 }
 0x598   :  { %518 = vrot.lane.b32.xlu1 %v513_v60, %s1375_s2 }
 0x5a5   :  { %v507_v63 = vpop.permute.xlu1 %506 }
 0x5a6   :  { %v512_v12 = vmul.f32 %v507_v63, %v483_v11 }
 0x5a8   :  { %516 = vrot.lane.b32.xlu0 %v512_v12, %s1375_s2 }
 0x5ce   :  { %v144_v36 = vpop.f32.mrf.mxu0 }
 0x5cf   :  { %v145_v37 = vadd.f32 %v1442_v10, %v144_v36 }
 0x5d1   :  { %v175_v38 = vpack.c.bf16 %v145_v37, %v145_v37 }
 0x5d3   :  { %v549_v40 = vunpack.c.l.bf16 %v175_v38 }
 0x5d6   :  { %v146_v39 = vpop.f32.mrf.mxu0 }
 0x5d7   :  { %v147_v41 = vadd.f32 %v1442_v10, %v146_v39 }
 0x5d9   :  { %v176_v44 = vpack.c.bf16 %v147_v41, %v147_v41 }
 0x5db   :  { %v550_v45 = vunpack.c.l.bf16 %v176_v44 }
 0x60a   :  { %v519_v15 = vpop.permute.xlu1 %518 }
 0x60b   :  { %v1533_v1 = vadd.f32 %v519_v15, %v503_v13 }
 0x60d   :  { %1289 = vtanh.f32 %v1533_v1 }
 0x613   :  { %v1290_v17 = vpop.eup %1289 }
 0x614   :  { %530 = vrot.lane.b32.xlu0 %v1290_v17, %s1375_s2 }
 0x61a   :  { %v517_v4 = vpop.permute.xlu0 %516 }
 0x61b   :  { %v1538_v19 = vadd.f32 %v517_v4, %v502_v18 }
 0x61d   :  { %1291 = vtanh.f32 %v1538_v19 }
 0x623   :  { %v1292_v25 = vpop.eup %1291 }
 0x624   :  { %528 = vrot.lane.b32.xlu2 %v1292_v25, %s1375_s2 }
 0x67e   :  { %v529_v26 = vpop.permute.xlu2 %528 }
 0x67f   :  { %v534_v28 = vmul.f32 %v529_v26, %v483_v11 }
 0x681   :  { %v1546_v30 = vpack.c.bf16 %v534_v28, %v534_v28 }
 0x683   :  { %v551_v32 = vunpack.c.l.b16 %v1546_v30 }
 0x686   :  { %v531_v29 = vpop.permute.xlu0 %530 }
 0x687   :  { %v535_v62 = vmul.f32 %v531_v29, %v498_v59 }
 0x689   :  { %v1548_v31 = vpack.c.bf16 %v535_v62, %v535_v62 }
 0x68b   :  { %v552_v33 = vunpack.c.l.b16 %v1548_v31 }
 0x68d   :  { %v553_v34 = vpack.c.b16 %v552_v33, %v551_v32 }
 0x68f   :  { %554 = vrot.lane.b32.xlu1 %v553_v34, %s1376_s26 }
 0x701   :  { %v555_v35 = vpop.permute.xlu1 %554 }
 0x702   :  { %1203 = vmatmul.msk.bf16.vlgmr.msrb.gmra.mxu1 %vm22_vm0, %v555_v35 }
 0x77f   :  { %v568_v42 = vpop.f32.mrf.mxu1 }
 0x780   :  { %v573_v43 = vadd.f32 %v568_v42, %v549_v40 }
 0x782   :  { %1293 = vtanh.f32 %v573_v43  ;;  %v1204_v50 = vmul.f32 -1.442695, %v573_v43 }
 0x787   :  { %v570_v46 = vpop.f32.mrf.mxu1 }
 0x788   :  { %v1294_v47 = vpop.eup %1293  ;;  %v574_v48 = vadd.f32 %v570_v46, %v550_v45 }
 0x789   :  { %619 = vrot.lane.b32.xlu2 %v1294_v47, %s1375_s2 }
 0x78a   :  { %1295 = vtanh.f32 %v574_v48  ;;  %v1205_v56 = vmul.f32 -1.442695, %v574_v48 }
 0x78b   :  { %1297 = vpow2.f32 %v1204_v50 }
 0x790   :  { %v1296_v49 = vpop.eup %1295 }
 0x791   :  { %621 = vrot.lane.b32.xlu0 %v1296_v49, %s1375_s2  ;;  %v1298_v51 = vpop.eup %1297 }
 0x792   :  { %v581_v52 = vadd.f32 1.0, %v1298_v51 }
 0x794   :  { %1299 = vrcp.f32 %v581_v52  ;;  %v594_v60 = vand.u32 2147483648, %v581_v52  ;;  %vm588_vm13 = vweird.f32 %v581_v52  ;;  %v592_v61 = vand.u32 2147483647, %v581_v52 }
 0x795   :  { %1301 = vpow2.f32 %v1205_v56 }
 0x796   :  { %v595_v3 = vor.u32 1.1754944e-38, %v594_v60  ;;  %vm593_vm15 = vcmp.eq.f32.partialorder %v592_v61, 8.507059e+37 }
 0x79a   :  { %v1300_v53 = vpop.eup %1299 }
 0x79b   :  { %v584_v54 = vmul.f32 %v1300_v53, %v581_v52  ;;  %vm589_vm12 = vweird.f32 %v1300_v53  ;;  %v1302_v0 = vpop.eup %1301 }
 0x79c   :  { %vm590_vm14 = vmor %vm588_vm13, %vm589_vm12  ;;  %v582_v6 = vadd.f32 1.0, %v1302_v0 }
 0x79d   :  { %v585_v55 = vsub.f32 1.0, %v584_v54 }
 0x79e   :  { %1303 = vrcp.f32 %v582_v6  ;;  %v609_v18 = vand.u32 2147483648, %v582_v6  ;;  %vm603_vm3 = vweird.f32 %v582_v6  ;;  %v607_v4 = vand.u32 2147483647, %v582_v6 }
 0x79f   :  { %v586_v57 = vmul.f32 %v1300_v53, %v585_v55 }
 0x7a0   :  { %v610_v5 = vor.u32 1.1754944e-38, %v609_v18  ;;  %vm608_vm5 = vcmp.eq.f32.partialorder %v607_v4, 8.507059e+37 }
 0x7a1   :  { %v587_v59 = vadd.f32 %v1300_v53, %v586_v57 }
 0x7a3   :  { %v591_v2 = vsel %vm590_vm14, %v1300_v53, %v587_v59 }
 0x7a4   :  { %v596_v8 = vsel %vm593_vm15, %v595_v3, %v591_v2  ;;  %v1304_v11 = vpop.eup %1303 }
 0x7a5   :  { %v599_v12 = vmul.f32 %v1304_v11, %v582_v6  ;;  %vm604_vm2 = vweird.f32 %v1304_v11  ;;  %v615_v62 = vmul.f32 %v596_v8, %v1538_v19  ;;  %v1232_v19 = vld [vmem:[%s1777_s0 + $0x20] sm:$0xff] }
 0x7a6   :  { %vm605_vm4 = vmor %vm603_vm3, %vm604_vm2  ;;  %1178 = vmatmul.msk.bf16.gmra.mxu0 %vm95_vm1, %v1232_v19 }
 0x7a7   :  { %v600_v13 = vsub.f32 1.0, %v599_v12 }
 0x7a9   :  { %v601_v15 = vmul.f32 %v1304_v11, %v600_v13 }
 0x7ab   :  { %v602_v17 = vadd.f32 %v1304_v11, %v601_v15 }
 0x7ad   :  { %v606_v25 = vsel %vm605_vm4, %v1304_v11, %v602_v17 }
 0x7ae   :  { %v611_v28 = vsel %vm608_vm5, %v610_v5, %v606_v25 }
 0x7af   :  { %v616_v34 = vmul.f32 %v611_v28, %v1533_v1 }
 0x7e3   :  { %v620_v58 = vpop.permute.xlu2 %619 }
 0x7e4   :  { %v625_v63 = vmul.f32 %v620_v58, %v596_v8 }
 0x7e6   :  { %629 = vrot.lane.b32.xlu1 %v625_v63, %s1375_s2 }
 0x803   :  { %v622_v26 = vpop.permute.xlu0 %621 }
 0x804   :  { %v626_v29 = vmul.f32 %v622_v26, %v611_v28 }
 0x806   :  { %631 = vrot.lane.b32.xlu2 %v626_v29, %s1375_s2 }
 0x823   :  { %v149_v48 = vpop.f32.mrf.mxu0 }
 0x824   :  { %v150_v49 = vadd.f32 %v1442_v10, %v149_v48 }
 0x826   :  { %v177_v50 = vpack.c.bf16 %v150_v49, %v150_v49 }
 0x828   :  { %v662_v52 = vunpack.c.l.bf16 %v177_v50 }
 0x82b   :  { %v151_v51 = vpop.f32.mrf.mxu0 }
 0x82c   :  { %v152_v53 = vadd.f32 %v1442_v10, %v151_v51 }
 0x82e   :  { %v178_v56 = vpack.c.bf16 %v152_v53, %v152_v53 }
 0x830   :  { %v663_v57 = vunpack.c.l.bf16 %v178_v56 }
 0x858   :  { %v630_v32 = vpop.permute.xlu1 %629 }
 0x859   :  { %v1561_v33 = vadd.f32 %v630_v32, %v615_v62 }
 0x85b   :  { %1305 = vtanh.f32 %v1561_v33 }
 0x860   :  { %v632_v35 = vpop.permute.xlu2 %631 }
 0x861   :  { %v1306_v36 = vpop.eup %1305  ;;  %v1565_v37 = vadd.f32 %v632_v35, %v616_v34 }
 0x862   :  { %641 = vrot.lane.b32.xlu0 %v1306_v36, %s1375_s2 }
 0x863   :  { %1307 = vtanh.f32 %v1565_v37 }
 0x869   :  { %v1308_v38 = vpop.eup %1307 }
 0x86a   :  { %643 = vrot.lane.b32.xlu1 %v1308_v38, %s1375_s2 }
 0x8d4   :  { %v642_v39 = vpop.permute.xlu0 %641 }
 0x8d5   :  { %v647_v40 = vmul.f32 %v642_v39, %v596_v8 }
 0x8d7   :  { %v1574_v41 = vpack.c.bf16 %v647_v40, %v647_v40 }
 0x8d9   :  { %v664_v44 = vunpack.c.l.b16 %v1574_v41 }
 0x8dc   :  { %v644_v1 = vpop.permute.xlu1 %643 }
 0x8dd   :  { %v648_v42 = vmul.f32 %v644_v1, %v611_v28 }
 0x8df   :  { %v1576_v43 = vpack.c.bf16 %v648_v42, %v648_v42 }
 0x8e1   :  { %v665_v45 = vunpack.c.l.b16 %v1576_v43 }
 0x8e3   :  { %v666_v46 = vpack.c.b16 %v665_v45, %v664_v44 }
 0x8e5   :  { %667 = vrot.lane.b32.xlu2 %v666_v46, %s1376_s26 }
 0x93f   :  { %v668_v47 = vpop.permute.xlu2 %667 }
 0x940   :  { %1208 = vmatmul.msk.bf16.vlgmr.msrb.gmra.mxu2 %vm22_vm0, %v668_v47 }
 0x9c3   :  { %v681_v54 = vpop.f32.mrf.mxu2 }
 0x9c4   :  { %v686_v55 = vadd.f32 %v681_v54, %v662_v52 }
 0x9c6   :  { %1309 = vtanh.f32 %v686_v55  ;;  %v1209_v2 = vmul.f32 -1.442695, %v686_v55 }
 0x9cb   :  { %v683_v59 = vpop.f32.mrf.mxu2 }
 0x9cc   :  { %v1310_v60 = vpop.eup %1309  ;;  %v687_v61 = vadd.f32 %v683_v59, %v663_v57 }
 0x9cd   :  { %732 = vrot.lane.b32.xlu0 %v1310_v60, %s1375_s2 }
 0x9ce   :  { %1311 = vtanh.f32 %v687_v61  ;;  %v1210_v3 = vmul.f32 -1.442695, %v687_v61 }
 0x9cf   :  { %1313 = vpow2.f32 %v1209_v2 }
 0x9d0   :  { %1315 = vpow2.f32 %v1210_v3 }
 0x9d4   :  { %v1312_v0 = vpop.eup %1311 }
 0x9d5   :  { %734 = vrot.lane.b32.xlu1 %v1312_v0, %s1375_s2  ;;  %v1314_v6 = vpop.eup %1313  ;;  %v155_v0 = vadd.f32 %v1442_v10, %v1514_v20 }
 0x9d6   :  { %v694_v58 = vadd.f32 1.0, %v1314_v6  ;;  %v1316_v8 = vpop.eup %1315  ;;  %v157_v6 = vadd.f32 %v1442_v10, %v1516_v21 }
 0x9d7   :  { %v695_v63 = vadd.f32 1.0, %v1316_v8  ;;  %v179_v2 = vpack.c.bf16 %v155_v0, %v155_v0 }
 0x9d8   :  { %1317 = vrcp.f32 %v694_v58  ;;  %v707_v5 = vand.u32 2147483648, %v694_v58  ;;  %vm701_vm6 = vweird.f32 %v694_v58  ;;  %v705_v26 = vand.u32 2147483647, %v694_v58 }
 0x9d9   :  { %1319 = vrcp.f32 %v695_v63  ;;  %v722_v38 = vand.u32 2147483648, %v695_v63  ;;  %vm716_vm10 = vweird.f32 %v695_v63  ;;  %v720_v19 = vand.u32 2147483647, %v695_v63 }
 0x9da   :  { %v708_v62 = vor.u32 1.1754944e-38, %v707_v5  ;;  %vm706_vm8 = vcmp.eq.f32.partialorder %v705_v26, 8.507059e+37  ;;  %v775_v3 = vunpack.c.l.bf16 %v179_v2 }
 0x9db   :  { %v723_v40 = vor.u32 1.1754944e-38, %v722_v38  ;;  %vm721_vm12 = vcmp.eq.f32.partialorder %v720_v19, 8.507059e+37 }
 0x9de   :  { %v1318_v11 = vpop.eup %1317 }
 0x9df   :  { %v697_v12 = vmul.f32 %v1318_v11, %v694_v58  ;;  %v1320_v15 = vpop.eup %1319  ;;  %vm702_vm1 = vweird.f32 %v1318_v11 }
 0x9e0   :  { %v712_v18 = vmul.f32 %v1320_v15, %v695_v63  ;;  %vm703_vm7 = vmor %vm701_vm6, %vm702_vm1  ;;  %vm717_vm9 = vweird.f32 %v1320_v15  ;;  %v180_v63 = vpack.c.bf16 %v157_v6, %v157_v6 }
 0x9e1   :  { %v698_v13 = vsub.f32 1.0, %v697_v12  ;;  %vm718_vm11 = vmor %vm716_vm10, %vm717_vm9 }
 0x9e2   :  { %v713_v25 = vsub.f32 1.0, %v712_v18 }
 0x9e3   :  { %v699_v17 = vmul.f32 %v1318_v11, %v698_v13 }
 0x9e4   :  { %v714_v29 = vmul.f32 %v1320_v15, %v713_v25 }
 0x9e5   :  { %v700_v4 = vadd.f32 %v1318_v11, %v699_v17 }
 0x9e6   :  { %v715_v36 = vadd.f32 %v1320_v15, %v714_v29 }
 0x9e7   :  { %v704_v28 = vsel %vm703_vm7, %v1318_v11, %v700_v4  ;;  %v776_v11 = vunpack.c.l.bf16 %v180_v63 }
 0x9e8   :  { %v709_v34 = vsel %vm706_vm8, %v708_v62, %v704_v28  ;;  %v719_v39 = vsel %vm718_vm11, %v1320_v15, %v715_v36 }
 0x9e9   :  { %v724_v42 = vsel %vm721_vm12, %v723_v40, %v719_v39  ;;  %v728_v45 = vmul.f32 %v709_v34, %v1561_v33 }
 0x9ea   :  { %v729_v49 = vmul.f32 %v724_v42, %v1565_v37 }
 0xa3f   :  { %v733_v32 = vpop.permute.xlu0 %732 }
 0xa40   :  { %v738_v35 = vmul.f32 %v733_v32, %v709_v34 }
 0xa42   :  { %742 = vrot.lane.b32.xlu2 %v738_v35, %s1375_s2 }
 0xa47   :  { %v735_v1 = vpop.permute.xlu1 %734 }
 0xa48   :  { %v739_v44 = vmul.f32 %v735_v1, %v724_v42 }
 0xa4a   :  { %744 = vrot.lane.b32.xlu0 %v739_v44, %s1375_s2 }
 0xa9c   :  { %v743_v46 = vpop.permute.xlu2 %742 }
 0xa9d   :  { %v1589_v47 = vadd.f32 %v743_v46, %v728_v45 }
 0xa9f   :  { %1321 = vtanh.f32 %v1589_v47 }
 0xaa5   :  { %v1322_v48 = vpop.eup %1321 }
 0xaa6   :  { %754 = vrot.lane.b32.xlu1 %v1322_v48, %s1375_s2 }
 0xabc   :  { %v745_v50 = vpop.permute.xlu0 %744 }
 0xabd   :  { %v1594_v51 = vadd.f32 %v745_v50, %v729_v49 }
 0xabf   :  { %1323 = vtanh.f32 %v1594_v51 }
 0xac5   :  { %v1324_v52 = vpop.eup %1323 }
 0xac6   :  { %756 = vrot.lane.b32.xlu2 %v1324_v52, %s1375_s2 }
 0xb18   :  { %v755_v53 = vpop.permute.xlu1 %754 }
 0xb19   :  { %v760_v33 = vmul.f32 %v755_v53, %v709_v34 }
 0xb1b   :  { %v1598_v55 = vpack.c.bf16 %v760_v33, %v760_v33 }
 0xb1d   :  { %v777_v59 = vunpack.c.l.b16 %v1598_v55 }
 0xb20   :  { %v757_v54 = vpop.permute.xlu2 %756 }
 0xb21   :  { %v761_v56 = vmul.f32 %v757_v54, %v724_v42 }
 0xb23   :  { %v1600_v57 = vpack.c.bf16 %v761_v56, %v761_v56 }
 0xb25   :  { %v778_v37 = vunpack.c.l.b16 %v1600_v57 }
 0xb27   :  { %v779_v60 = vpack.c.b16 %v778_v37, %v777_v59 }
 0xb29   :  { %780 = vrot.lane.b32.xlu0 %v779_v60, %s1376_s26 }
 0xb9b   :  { %v781_v61 = vpop.permute.xlu0 %780 }
 0xb9c   :  { %1213 = vmatmul.msk.bf16.vlgmr.msra.gmra.mxu3 %vm22_vm0, %v781_v61 }
 0xc1f   :  { %v794_v58 = vpop.f32.mrf.mxu3 }
 0xc20   :  { %v799_v8 = vadd.f32 %v794_v58, %v775_v3 }
 0xc22   :  { %1325 = vtanh.f32 %v799_v8  ;;  %v1214_v25 = vmul.f32 -1.442695, %v799_v8 }
 0xc27   :  { %v796_v12 = vpop.f32.mrf.mxu3 }
 0xc28   :  { %v1326_v13 = vpop.eup %1325  ;;  %v800_v15 = vadd.f32 %v796_v12, %v776_v11 }
 0xc29   :  { %845 = vrot.lane.b32.xlu1 %v1326_v13, %s1375_s2 }
 0xc2a   :  { %1327 = vtanh.f32 %v800_v15  ;;  %v1215_v20 = vmul.f32 -1.442695, %v800_v15  ;;  %v1635_v15 = vld [vmem:[%s1778_s3] ss:$0 sm:$0xff] }
 0xc2c   :  { %1329 = vpow2.f32 %v1215_v20 }
 0xc30   :  { %v1328_v17 = vpop.eup %1327 }
 0xc31   :  { %847 = vrot.lane.b32.xlu2 %v1328_v17, %s1375_s2  ;;  %v160_v17 = vadd.f32 %v1635_v15, %v1518_v22 }
 0xc32   :  { %v1330_v18 = vpop.eup %1329 }
 0xc33   :  { %v808_v4 = vadd.f32 1.0, %v1330_v18  ;;  %v181_v20 = vpack.c.bf16 %v160_v17, %v160_v17 }
 0xc35   :  { %1331 = vrcp.f32 %v808_v4  ;;  %v835_v34 = vand.u32 2147483648, %v808_v4  ;;  %vm829_vm14 = vweird.f32 %v808_v4  ;;  %v833_v35 = vand.u32 2147483647, %v808_v4 }
 0xc36   :  { %1333 = vpow2.f32 %v1214_v25  ;;  %v888_v18 = vunpack.c.l.bf16 %v181_v20 }
 0xc37   :  { %v836_v19 = vor.u32 1.1754944e-38, %v835_v34  ;;  %vm834_vm2 = vcmp.eq.f32.partialorder %v833_v35, 8.507059e+37 }
 0xc3b   :  { %v1332_v10 = vpop.eup %1331 }
 0xc3c   :  { %v1334_v21 = vpop.eup %1333  ;;  %v825_v5 = vmul.f32 %v1332_v10, %v808_v4  ;;  %vm830_vm13 = vweird.f32 %v1332_v10  ;;  %v162_v4 = vadd.f32 %v1635_v15, %v1520_v23 }
 0xc3d   :  { %v807_v26 = vadd.f32 1.0, %v1334_v21  ;;  %vm831_vm15 = vmor %vm829_vm14, %vm830_vm13 }
 0xc3e   :  { %v826_v28 = vsub.f32 1.0, %v825_v5  ;;  %v182_v21 = vpack.c.bf16 %v162_v4, %v162_v4 }
 0xc3f   :  { %1335 = vrcp.f32 %v807_v26  ;;  %v820_v46 = vand.u32 2147483648, %v807_v26  ;;  %vm814_vm4 = vweird.f32 %v807_v26  ;;  %v818_v48 = vand.u32 2147483647, %v807_v26 }
 0xc40   :  { %v827_v29 = vmul.f32 %v1332_v10, %v826_v28  ;;  %v889_v5 = vunpack.c.l.bf16 %v182_v21 }
 0xc41   :  { %v821_v50 = vor.u32 1.1754944e-38, %v820_v46  ;;  %vm819_vm1 = vcmp.eq.f32.partialorder %v818_v48, 8.507059e+37 }
 0xc42   :  { %v828_v62 = vadd.f32 %v1332_v10, %v827_v29 }
 0xc44   :  { %v832_v36 = vsel %vm831_vm15, %v1332_v10, %v828_v62 }
 0xc45   :  { %v1336_v32 = vpop.eup %1335  ;;  %v837_v40 = vsel %vm834_vm2, %v836_v19, %v832_v36 }
 0xc46   :  { %v810_v38 = vmul.f32 %v1336_v32, %v807_v26  ;;  %vm815_vm3 = vweird.f32 %v1336_v32  ;;  %v842_v54 = vmul.f32 %v837_v40, %v1594_v51 }
 0xc47   :  { %vm816_vm5 = vmor %vm814_vm4, %vm815_vm3 }
 0xc48   :  { %v811_v42 = vsub.f32 1.0, %v810_v38 }
 0xc4a   :  { %v812_v44 = vmul.f32 %v1336_v32, %v811_v42 }
 0xc4c   :  { %v813_v45 = vadd.f32 %v1336_v32, %v812_v44 }
 0xc4e   :  { %v817_v49 = vsel %vm816_vm5, %v1336_v32, %v813_v45 }
 0xc4f   :  { %v822_v53 = vsel %vm819_vm1, %v821_v50, %v817_v49 }
 0xc50   :  { %v841_v60 = vmul.f32 %v822_v53, %v1589_v47 }
 0xc8b   :  { %v848_v39 = vpop.permute.xlu2 %847 }
 0xc8c   :  { %v852_v1 = vmul.f32 %v848_v39, %v837_v40 }
 0xc8e   :  { %857 = vrot.lane.b32.xlu1 %v852_v1, %s1375_s2 }
 0xc9b   :  { %v846_v52 = vpop.permute.xlu1 %845 }
 0xc9c   :  { %v851_v33 = vmul.f32 %v846_v52, %v822_v53 }
 0xc9e   :  { %855 = vrot.lane.b32.xlu0 %v851_v33, %s1375_s2 }
 0xd00   :  { %v858_v56 = vpop.permute.xlu1 %857 }
 0xd01   :  { %v1615_v59 = vadd.f32 %v858_v56, %v842_v54 }
 0xd03   :  { %1337 = vtanh.f32 %v1615_v59 }
 0xd09   :  { %v1338_v37 = vpop.eup %1337 }
 0xd0a   :  { %869 = vrot.lane.b32.xlu0 %v1338_v37, %s1375_s2 }
 0xd10   :  { %v856_v61 = vpop.permute.xlu0 %855 }
 0xd11   :  { %v1620_v0 = vadd.f32 %v856_v61, %v841_v60 }
 0xd13   :  { %1339 = vtanh.f32 %v1620_v0 }
 0xd19   :  { %v1340_v2 = vpop.eup %1339 }
 0xd1a   :  { %867 = vrot.lane.b32.xlu2 %v1340_v2, %s1375_s2 }
 0xd74   :  { %v868_v3 = vpop.permute.xlu2 %867 }
 0xd75   :  { %v873_v51 = vmul.f32 %v868_v3, %v822_v53 }
 0xd77   :  { %v1624_v58 = vpack.c.bf16 %v873_v51, %v873_v51 }
 0xd79   :  { %v890_v11 = vunpack.c.l.b16 %v1624_v58 }
 0xd7c   :  { %v870_v6 = vpop.permute.xlu0 %869 }
 0xd7d   :  { %v874_v8 = vmul.f32 %v870_v6, %v837_v40 }
 0xd7f   :  { %v1626_v63 = vpack.c.bf16 %v874_v8, %v874_v8 }
 0xd81   :  { %v891_v47 = vunpack.c.l.b16 %v1626_v63 }
 0xd83   :  { %v892_v12 = vpack.c.b16 %v891_v47, %v890_v11 }
 0xd85   :  { %893 = vrot.lane.b32.xlu1 %v892_v12, %s1376_s26 }
 0xdf7   :  { %v894_v13 = vpop.permute.xlu1 %893 }
 0xdf8   :  { %1218 = vmatmul.msk.bf16.vlgmr.msra.gmra.mxu1 %vm22_vm0, %v894_v13 }
 0xe75   :  { %v907_v25 = vpop.f32.mrf.mxu1 }
 0xe76   :  { %v912_v10 = vadd.f32 %v907_v25, %v888_v18 }
 0xe78   :  { %1341 = vtanh.f32 %v912_v10  ;;  %v1219_v22 = vmul.f32 -1.442695, %v912_v10 }
 0xe7d   :  { %v909_v26 = vpop.f32.mrf.mxu1 }
 0xe7e   :  { %v1342_v28 = vpop.eup %1341  ;;  %v913_v29 = vadd.f32 %v909_v26, %v889_v5 }
 0xe7f   :  { %958 = vrot.lane.b32.xlu2 %v1342_v28, %s1375_s2 }
 0xe80   :  { %1343 = vtanh.f32 %v913_v29  ;;  %v1220_v38 = vmul.f32 -1.442695, %v913_v29 }
 0xe81   :  { %1345 = vpow2.f32 %v1219_v22 }
 0xe86   :  { %v1344_v62 = vpop.eup %1343 }
 0xe87   :  { %960 = vrot.lane.b32.xlu0 %v1344_v62, %s1375_s2  ;;  %v1346_v32 = vpop.eup %1345  ;;  %v165_v62 = vadd.f32 %v1635_v15, %v1522_v24 }
 0xe88   :  { %v920_v34 = vadd.f32 1.0, %v1346_v32 }
 0xe89   :  { %v183_v22 = vpack.c.bf16 %v165_v62, %v165_v62 }
 0xe8a   :  { %1347 = vrcp.f32 %v920_v34  ;;  %v933_v40 = vand.u32 2147483648, %v920_v34  ;;  %vm927_vm7 = vweird.f32 %v920_v34  ;;  %v931_v1 = vand.u32 2147483647, %v920_v34 }
 0xe8b   :  { %1349 = vpow2.f32 %v1220_v38  ;;  %v1001_v32 = vunpack.c.l.bf16 %v183_v22 }
 0xe8c   :  { %v934_v45 = vor.u32 1.1754944e-38, %v933_v40  ;;  %vm932_vm9 = vcmp.eq.f32.partialorder %v931_v1, 8.507059e+37 }
 0xe90   :  { %v1348_v23 = vpop.eup %1347 }
 0xe91   :  { %v923_v35 = vmul.f32 %v1348_v23, %v920_v34  ;;  %vm928_vm6 = vweird.f32 %v1348_v23  ;;  %v1350_v42 = vpop.eup %1349  ;;  %v167_v34 = vadd.f32 %v1635_v15, %v1525_v27 }
 0xe92   :  { %vm929_vm8 = vmor %vm927_vm7, %vm928_vm6  ;;  %v921_v46 = vadd.f32 1.0, %v1350_v42  ;;  %vm320_vm7 = vcmask 257024  }
 0xe93   :  { %v924_v36 = vsub.f32 1.0, %v923_v35 }
 0xe94   :  { %1351 = vrcp.f32 %v921_v46  ;;  %v948_v37 = vand.u32 2147483648, %v921_v46  ;;  %vm942_vm11 = vweird.f32 %v921_v46  ;;  %v946_v60 = vand.u32 2147483647, %v921_v46 }
 0xe95   :  { %v925_v19 = vmul.f32 %v1348_v23, %v924_v36  ;;  %v184_v36 = vpack.c.bf16 %v167_v34, %v167_v34 }
 0xe96   :  { %v949_v2 = vor.u32 1.1754944e-38, %v948_v37  ;;  %vm947_vm13 = vcmp.eq.f32.partialorder %v946_v60, 8.507059e+37 }
 0xe97   :  { %v926_v39 = vadd.f32 %v1348_v23, %v925_v19  ;;  %v1002_v38 = vunpack.c.l.bf16 %v184_v36 }
 0xe99   :  { %v930_v44 = vsel %vm929_vm8, %v1348_v23, %v926_v39 }
 0xe9a   :  { %v935_v49 = vsel %vm932_vm9, %v934_v45, %v930_v44  ;;  %v1352_v52 = vpop.eup %1351 }
 0xe9b   :  { %v938_v53 = vmul.f32 %v1352_v52, %v921_v46  ;;  %vm943_vm10 = vweird.f32 %v1352_v52  ;;  %v954_v8 = vmul.f32 %v935_v49, %v1620_v0 }
 0xe9c   :  { %vm944_vm12 = vmor %vm942_vm11, %vm943_vm10 }
 0xe9d   :  { %v939_v33 = vsub.f32 1.0, %v938_v53 }
 0xe9f   :  { %v940_v54 = vmul.f32 %v1352_v52, %v939_v33 }
 0xea1   :  { %v941_v56 = vadd.f32 %v1352_v52, %v940_v54 }
 0xea3   :  { %v945_v61 = vsel %vm944_vm12, %v1352_v52, %v941_v56 }
 0xea4   :  { %v950_v51 = vsel %vm947_vm13, %v949_v2, %v945_v61 }
 0xea5   :  { %v955_v12 = vmul.f32 %v950_v51, %v1615_v59 }
 0xed9   :  { %v959_v48 = vpop.permute.xlu2 %958 }
 0xeda   :  { %v964_v50 = vmul.f32 %v959_v48, %v935_v49 }
 0xedc   :  { %968 = vrot.lane.b32.xlu1 %v964_v50, %s1375_s2 }
 0xef9   :  { %v961_v3 = vpop.permute.xlu0 %960 }
 0xefa   :  { %v965_v6 = vmul.f32 %v961_v3, %v950_v51 }
 0xefc   :  { %970 = vrot.lane.b32.xlu2 %v965_v6, %s1375_s2 }
 0xf4e   :  { %v969_v11 = vpop.permute.xlu1 %968 }
 0xf4f   :  { %v1646_v47 = vadd.f32 %v969_v11, %v954_v8 }
 0xf51   :  { %1353 = vtanh.f32 %v1646_v47 }
 0xf56   :  { %v971_v13 = vpop.permute.xlu2 %970 }
 0xf57   :  { %v1354_v17 = vpop.eup %1353  ;;  %v1650_v20 = vadd.f32 %v971_v13, %v955_v12 }
 0xf58   :  { %980 = vrot.lane.b32.xlu0 %v1354_v17, %s1375_s2 }
 0xf59   :  { %1355 = vtanh.f32 %v1650_v20 }
 0xf5f   :  { %v1356_v18 = vpop.eup %1355 }
 0xf60   :  { %982 = vrot.lane.b32.xlu1 %v1356_v18, %s1375_s2 }
 0xfca   :  { %v981_v4 = vpop.permute.xlu0 %980 }
 0xfcb   :  { %v986_v0 = vmul.f32 %v981_v4, %v935_v49 }
 0xfcd   :  { %v1655_v10 = vpack.c.bf16 %v986_v0, %v986_v0 }
 0xfcf   :  { %v1003_v59 = vunpack.c.l.b16 %v1655_v10 }
 0xfd2   :  { %v983_v25 = vpop.permute.xlu1 %982 }
 0xfd3   :  { %v987_v21 = vmul.f32 %v983_v25, %v950_v51 }
 0xfd5   :  { %v1657_v5 = vpack.c.bf16 %v987_v21, %v987_v21 }
 0xfd7   :  { %v1004_v26 = vunpack.c.l.b16 %v1657_v5 }
 0xfd9   :  { %v1005_v28 = vpack.c.b16 %v1004_v26, %v1003_v59 }
 0xfdb   :  { %1006 = vrot.lane.b32.xlu2 %v1005_v28, %s1376_s26 }
0x1035   :  { %v1007_v29 = vpop.permute.xlu2 %1006 }
0x1036   :  { %1223 = vmatmul.msk.bf16.vlgmr.msra.gmra.mxu2 %vm22_vm0, %v1007_v29 }
0x10b9   :  { %v1020_v23 = vpop.f32.mrf.mxu2 }
0x10ba   :  { %v1025_v35 = vadd.f32 %v1020_v23, %v1001_v32 }
0x10bc   :  { %1357 = vtanh.f32 %v1025_v35  ;;  %v1224_v24 = vmul.f32 -1.442695, %v1025_v35 }
0x10c1   :  { %v1022_v19 = vpop.f32.mrf.mxu2 }
0x10c2   :  { %v1358_v39 = vpop.eup %1357  ;;  %v1026_v40 = vadd.f32 %v1022_v19, %v1002_v38 }
0x10c3   :  { %1071 = vrot.lane.b32.xlu0 %v1358_v39, %s1375_s2 }
0x10c4   :  { %1359 = vtanh.f32 %v1026_v40  ;;  %v1225_v27 = vmul.f32 -1.442695, %v1026_v40 }
0x10c5   :  { %1361 = vpow2.f32 %v1224_v24 }
0x10c6   :  { %1363 = vpow2.f32 %v1225_v27 }
0x10ca   :  { %v1360_v1 = vpop.eup %1359 }
0x10cb   :  { %1073 = vrot.lane.b32.xlu1 %v1360_v1, %s1375_s2  ;;  %v1362_v15 = vpop.eup %1361 }
0x10cc   :  { %v1033_v42 = vadd.f32 1.0, %v1362_v15  ;;  %v1364_v44 = vpop.eup %1363 }
0x10cd   :  { %v1034_v45 = vadd.f32 1.0, %v1364_v44 }
0x10ce   :  { %1365 = vrcp.f32 %v1033_v42  ;;  %vm1040_vm15 = vweird.f32 %v1033_v42  ;;  %v1044_v56 = vand.u32 2147483647, %v1033_v42 }
0x10cf   :  { %1367 = vrcp.f32 %v1034_v45  ;;  %v1061_v8 = vand.u32 2147483648, %v1034_v45  ;;  %vm1055_vm5 = vweird.f32 %v1034_v45  ;;  %v1059_v11 = vand.u32 2147483647, %v1034_v45 }
0x10d0   :  { %vm1045_vm3 = vcmp.eq.f32.partialorder %v1044_v56, 8.507059e+37 }
0x10d1   :  { %v1062_v13 = vor.u32 1.1754944e-38, %v1061_v8  ;;  %vm1060_vm6 = vcmp.eq.f32.partialorder %v1059_v11, 8.507059e+37 }
0x10d3   :  { %316 = vrot.lane.b32.xlu1 %v1464_v9, %s1376_s26  ;;  %v1046_v9 = vand.u32 2147483648, %v1033_v42 }
0x10d4   :  { %v1366_v46 = vpop.eup %1365 }
0x10d5   :  { %v1036_v48 = vmul.f32 %v1366_v46, %v1033_v42  ;;  %v1368_v50 = vpop.eup %1367  ;;  %vm1041_vm14 = vweird.f32 %v1366_v46  ;;  %v1047_v61 = vor.u32 1.1754944e-38, %v1046_v9 }
0x10d6   :  { %v1051_v53 = vmul.f32 %v1368_v50, %v1034_v45  ;;  %vm1042_vm2 = vmor %vm1040_vm15, %vm1041_vm14  ;;  %vm1056_vm4 = vweird.f32 %v1368_v50 }
0x10d7   :  { %v1037_v49 = vsub.f32 1.0, %v1036_v48  ;;  %vm1057_vm1 = vmor %vm1055_vm5, %vm1056_vm4 }
0x10d8   :  { %v1052_v54 = vsub.f32 1.0, %v1051_v53 }
0x10d9   :  { %v1038_v52 = vmul.f32 %v1366_v46, %v1037_v49 }
0x10da   :  { %v1053_v60 = vmul.f32 %v1368_v50, %v1052_v54 }
0x10db   :  { %v1039_v33 = vadd.f32 %v1366_v46, %v1038_v52 }
0x10dc   :  { %v1054_v6 = vadd.f32 %v1368_v50, %v1053_v60 }
0x10dd   :  { %v1043_v37 = vsel %vm1042_vm2, %v1366_v46, %v1039_v33 }
0x10de   :  { %v1048_v3 = vsel %vm1045_vm3, %v1047_v61, %v1043_v37  ;;  %v1058_v12 = vsel %vm1057_vm1, %v1368_v50, %v1054_v6 }
0x10df   :  { %v1063_v18 = vsel %vm1060_vm6, %v1062_v13, %v1058_v12  ;;  %v1067_v25 = vmul.f32 %v1048_v3, %v1646_v47 }
0x1135   :  { %v1072_v2 = vpop.permute.xlu0 %1071 }
0x1136   :  { %v1077_v51 = vmul.f32 %v1072_v2, %v1048_v3 }
0x1138   :  { %1081 = vrot.lane.b32.xlu2 %v1077_v51, %s1375_s2 }
0x113d   :  { %v1074_v17 = vpop.permute.xlu1 %1073 }
0x113e   :  { %v1078_v4 = vmul.f32 %v1074_v17, %v1063_v18 }
0x1140   :  { %1083 = vrot.lane.b32.xlu0 %v1078_v4, %s1375_s2 }
0x1145   :  { %v317_v0 = vpop.permute.xlu1 %316 }
0x1146   :  { %322 = vst.msk [vmem:[%s1779_s4 + $0x4] sm:$0xf] %vm320_vm7, %v317_v0 }
0x1148   :  { %314 = vrot.lane.b32.xlu0 %v1462_v7, %s1376_s26  ;;  %v1068_v7 = vmul.f32 %v1063_v18, %v1650_v20 }
0x1150   :  { %429 = vrot.lane.b32.xlu0 %v1504_v16, %s1376_s26 }
0x1158   :  { %653 = vrot.lane.b32.xlu0 %v1574_v41, %s1376_s26 }
0x1160   :  { %768 = vrot.lane.b32.xlu0 %v1600_v57, %s1376_s26 }
0x1168   :  { %992 = vrot.lane.b32.xlu0 %v1655_v10, %s1376_s26 }
0x1192   :  { %v1082_v21 = vpop.permute.xlu2 %1081 }
0x1193   :  { %v1087_v59 = vadd.f32 %v1082_v21, %v1067_v25 }
0x1195   :  { %1369 = vtanh.f32 %v1087_v59 }
0x119b   :  { %v1370_v26 = vpop.eup %1369 }
0x119c   :  { %1093 = vrot.lane.b32.xlu1 %v1370_v26, %s1375_s2 }
0x11a4   :  { %540 = vrot.lane.b32.xlu1 %v1546_v30, %s1376_s26 }
0x11ac   :  { %655 = vrot.lane.b32.xlu1 %v1576_v43, %s1376_s26 }
0x11b2   :  { %v1084_v16 = vpop.permute.xlu0 %1083 }
0x11b3   :  { %v1088_v41 = vadd.f32 %v1084_v16, %v1068_v7 }
0x11b4   :  { %879 = vrot.lane.b32.xlu1 %v1624_v58, %s1376_s26 }
0x11b5   :  { %1371 = vtanh.f32 %v1088_v41 }
0x11ba   :  { %v315_v57 = vpop.permute.xlu0 %314 }
0x11bb   :  { %v1372_v47 = vpop.eup %1371  ;;  %321 = vst.msk [vmem:[%s1779_s4] sm:$0xf] %vm320_vm7, %v315_v57 }
0x11bc   :  { %994 = vrot.lane.b32.xlu1 %v1657_v5, %s1376_s26  ;;  %1095 = vrot.lane.b32.xlu2 %v1372_v47, %s1375_s2 }
0x11c2   :  { %v430_v30 = vpop.permute.xlu0 %429 }
0x11c3   :  { %1197 = vst.msk [vmem:[%s1779_s4 + $0xc] sm:$0xf] %vm320_vm7, %v430_v30 }
0x11c4   :  { %427 = vrot.lane.b32.xlu2 %v1502_v14, %s1376_s26 }
0x11ca   :  { %v654_v43 = vpop.permute.xlu0 %653 }
0x11cb   :  { %1206 = vst.msk [vmem:[%s1779_s4 + $0x18] sm:$0xf] %vm320_vm7, %v654_v43 }
0x11cc   :  { %542 = vrot.lane.b32.xlu2 %v1548_v31, %s1376_s26 }
0x11d2   :  { %v769_v58 = vpop.permute.xlu0 %768 }
0x11d3   :  { %1212 = vst.msk [vmem:[%s1779_s4 + $0x24] sm:$0xf] %vm320_vm7, %v769_v58 }
0x11d4   :  { %766 = vrot.lane.b32.xlu2 %v1598_v55, %s1376_s26 }
0x11da   :  { %v993_v20 = vpop.permute.xlu0 %992 }
0x11db   :  { %1221 = vst.msk [vmem:[%s1779_s4 + $0x30] sm:$0xf] %vm320_vm7, %v993_v20 }
0x11dc   :  { %881 = vrot.lane.b32.xlu2 %v1626_v63, %s1376_s26 }
0x120e   :  { %v1094_v14 = vpop.permute.xlu1 %1093 }
0x120f   :  { %v1099_v31 = vmul.f32 %v1094_v14, %v1048_v3 }
0x1211   :  { %v1101_v10 = vpack.c.bf16 %v1099_v31, %v1099_v31  ;;  %1116 = vrot.lane.b32.xlu1 %v1099_v31, %s1376_s26 }
0x1213   :  { %1105 = vrot.lane.b32.xlu2 %v1101_v10, %s1376_s26 }
0x1216   :  { %v541_v5 = vpop.permute.xlu1 %540  ;;  %v1096_v28 = vpop.permute.xlu2 %1095 }
0x1217   :  { %1201 = vst.msk [vmem:[%s1779_s4 + $0x10] sm:$0xf] %vm320_vm7, %v541_v5  ;;  %v1100_v55 = vmul.f32 %v1096_v28, %v1063_v18 }
0x1219   :  { %v1102_v29 = vpack.c.bf16 %v1100_v55, %v1100_v55  ;;  %1128 = vrot.lane.b32.xlu1 %v1088_v41, %s1377_s25 }
0x121b   :  { %1118 = vrot.lane.b32.xlu2 %v1100_v55, %s1376_s26  ;;  %1107 = vrot.lane.b32.xlu0 %v1102_v29, %s1376_s26 }
0x121e   :  { %v656_v63 = vpop.permute.xlu1 %655  ;;  %v428_v62 = vpop.permute.xlu2 %427 }
0x121f   :  { %1207 = vst.msk [vmem:[%s1779_s4 + $0x1c] sm:$0xf] %vm320_vm7, %v656_v63 }
0x1220   :  { %1196 = vst.msk [vmem:[%s1779_s4 + $0x8] sm:$0xf] %vm320_vm7, %v428_v62 }
0x1223   :  { %1126 = vrot.lane.b32.xlu0 %v1087_v59, %s1377_s25 }
0x1226   :  { %v880_v22 = vpop.permute.xlu1 %879  ;;  %v543_v32 = vpop.permute.xlu2 %542 }
0x1227   :  { %1216 = vst.msk [vmem:[%s1779_s4 + $0x28] sm:$0xf] %vm320_vm7, %v880_v22 }
0x1228   :  { %1202 = vst.msk [vmem:[%s1779_s4 + $0x14] sm:$0xf] %vm320_vm7, %v543_v32 }
0x122e   :  { %v995_v34 = vpop.permute.xlu1 %994  ;;  %v767_v23 = vpop.permute.xlu2 %766 }
0x122f   :  { %1222 = vst.msk [vmem:[%s1779_s4 + $0x34] sm:$0xf] %vm320_vm7, %v995_v34 }
0x1230   :  { %1211 = vst.msk [vmem:[%s1779_s4 + $0x20] sm:$0xf] %vm320_vm7, %v767_v23 }
0x1236   :  { %v882_v35 = vpop.permute.xlu2 %881 }
0x1237   :  { %1217 = vst.msk [vmem:[%s1779_s4 + $0x2c] sm:$0xf] %vm320_vm7, %v882_v35 }
0x126d   :  { %v1106_v36 = vpop.permute.xlu2 %1105 }
0x126e   :  { %1226 = vst.msk [vmem:[%s1779_s4 + $0x38] sm:$0xf] %vm320_vm7, %v1106_v36 }
0x1275   :  { %v1119_v38 = vpop.permute.xlu2 %1118 }
0x1276   :  { %1123 = vst.msk [vmem:[#allocation2 + $0x8] sm:$0xff] %vm22_vm0, %v1119_v38 }
0x1283   :  { %v1117_v19 = vpop.permute.xlu1 %1116 }
0x1284   :  { %1122 = vst.msk [vmem:[#allocation2] sm:$0xff] %vm22_vm0, %v1117_v19 }
0x128b   :  { %v1129_v39 = vpop.permute.xlu1 %1128 }
0x128c   :  { %1133 = vst.msk [vmem:[#allocation3 + $0x8] sm:$0xff] %vm22_vm0, %v1129_v39 }
0x128d   :  { %v1108_v40 = vpop.permute.xlu0 %1107 }
0x128e   :  { %1227 = vst.msk [vmem:[%s1779_s4 + $0x3c] sm:$0xf] %vm320_vm7, %v1108_v40 }
0x1295   :  { %v1127_v1 = vpop.permute.xlu0 %1126 }
0x1296   :  { %1132 = vst.msk [vmem:[#allocation3] sm:$0xff] %vm22_vm0, %v1127_v1 }

</bundles_post_ra>
